<compile_context>
chip_gen: v5e
topology: v5e:2x2
jax: 0.10.0
libtpu: 0.0.40
codegen_flags: <defaults>
</compile_context>

<pallas_src>
import functools

import jax
import jax.numpy as jnp
from jax.experimental import pallas as pl
from jax.experimental.pallas import tpu as pltpu

F_IN = 31      # input node feature dim (TAGConv(31, 64, 2))
F_HID = 64     # hidden dim
K_HOPS = 2     # TAGConv k
GROUP = 50     # forward reshapes to (B, 50, 64)


def _dtitag_kernel(npg, gb, x_ref, a_ref,
                   w1_ref, b1_ref, w2_ref, b2_ref,
                   w3_ref, b3_ref, w4_ref, b4_ref,
                   wg_ref, bg_ref, out_ref):
    # One grid step = one block of `gb` graphs x `npg` nodes (NB = gb * npg).
    a = a_ref[...]                                                  # (NB, NB) bf16
    # Hoist A^2: one matmul per block, reused by all 4 TAG layers.
    a2 = jnp.dot(a, a, preferred_element_type=jnp.float32).astype(jnp.bfloat16)

    def tag_layer(h, w_ref, b_ref):
        hb = h.astype(jnp.bfloat16)
        ah = jnp.dot(a, hb, preferred_element_type=jnp.float32).astype(jnp.bfloat16)
        aah = jnp.dot(a2, hb, preferred_element_type=jnp.float32).astype(jnp.bfloat16)
        # Fuse the 3 hop matmuls into a single wide-K MXU call.
        hop = jnp.concatenate([hb, ah, aah], axis=-1)               # (NB, 3*din)
        out = jnp.dot(hop, w_ref[...], preferred_element_type=jnp.float32) + b_ref[...]
        return jnp.maximum(out, 0.0)                                # (NB, 64) f32

    h = x_ref[...]                                                  # (NB, F_pad) bf16
    h = tag_layer(h, w1_ref, b1_ref)
    h = tag_layer(h, w2_ref, b2_ref)
    h = tag_layer(h, w3_ref, b3_ref)
    h = tag_layer(h, w4_ref, b4_ref)

    # GlobalAttentionPooling. Gate Linear(64, 1) as VPU multiply + lane reduce
    # (a 1-wide matmul would waste the MXU). Softmax is exactly per graph because
    # each graph owns `npg` contiguous sublanes of the block.
    h3 = h.reshape(gb, npg, F_HID)                                  # sublane split only
    gate = jnp.sum(h3 * wg_ref[...], axis=-1, keepdims=True) + bg_ref[...]  # (gb,npg,1) f32
    m = jnp.max(gate, axis=1, keepdims=True)                        # per-graph max
    e = jnp.exp(gate - m)
    alpha = e / jnp.sum(e, axis=1, keepdims=True)                   # (gb, npg, 1)
    out_ref[...] = jnp.sum(alpha * h3, axis=1)                      # (gb, 64) f32


def dtitag_forward(x, a_hat, params, *, nodes_per_graph, block_nodes=128):
    """x: (N, 31) node feats, a_hat: (N, N) block-diag normalized adjacency.
    Returns (B, 50, 64).  Assumes uniform, contiguous graphs of `nodes_per_graph`."""
    n = x.shape[0]
    npg = nodes_per_graph
    n_graphs = n // npg
    assert n_graphs * npg == n

    # Graphs per grid block: multiple of 8 so both the (gb, 64) output block and the
    # (gb*npg, F) node block are sublane-aligned.  npg=8, block_nodes=128 -> gb=16, NB=128.
    gb = max(1, block_nodes // npg)
    gb = max(8, (gb // 8) * 8)
    nb = gb * npg
    n_blocks = -(-n_graphs // gb)
    g_pad = n_blocks * gb
    n_pad = g_pad * npg

    f_pad = ((F_IN + 31) // 32) * 32            # pad 31 -> 32 once, host-side

    # Node features: pad and cast to bf16 (matmuls accumulate in f32 on the MXU).
    x_p = jnp.zeros((n_pad, f_pad), jnp.float32).at[:n, :F_IN].set(x)
    x_p = x_p.astype(jnp.bfloat16)

    # Pack the block-diagonal adjacency into per-block tiles: the kernel never sees
    # the dense (N, N) matrix, only (n_blocks, NB, NB).
    a_p = jnp.zeros((n_pad, n_pad), jnp.float32).at[:n, :n].set(a_hat)
    bi = jnp.arange(n_blocks)
    a_blk = a_p.reshape(n_blocks, nb, n_blocks, nb)[bi, :, bi, :].astype(jnp.bfloat16)

    # Fused TAG weights: stacked (3, din, 64) -> (3*din, 64); layer-1 din padded to 32.
    weight_inputs = []
    for li, (w, b) in enumerate(params["tag"]):
        din = w.shape[1]
        din_p = f_pad if li == 0 else din
        if din_p != din:
            w = jnp.zeros((K_HOPS + 1, din_p, F_HID), w.dtype).at[:, :din, :].set(w)
        weight_inputs += [w.reshape((K_HOPS + 1) * din_p, F_HID).astype(jnp.bfloat16),
                          b.astype(jnp.float32)]
    weight_inputs += [params["gate_w"].reshape(1, F_HID).astype(jnp.float32),  # (1, 64)
                      params["gate_b"].astype(jnp.float32)]                    # (1, 1)

    # Tiny weights: full-array VMEM residency (constant index map -> no per-step re-DMA).
    weight_specs = [pl.BlockSpec(wi.shape, lambda i, nd=wi.ndim: (0,) * nd)
                    for wi in weight_inputs]

    out_pad = pl.pallas_call(
        functools.partial(_dtitag_kernel, npg, gb),
        out_shape=jax.ShapeDtypeStruct((g_pad, F_HID), jnp.float32),
        grid=(n_blocks,),
        in_specs=[pl.BlockSpec((nb, f_pad), lambda i: (i, 0)),            # x block
                  pl.BlockSpec((None, nb, nb), lambda i: (i, 0, 0)),      # A_hat block
                  *weight_specs],
        out_specs=pl.BlockSpec((gb, F_HID), lambda i: (i, 0)),
        compiler_params=pltpu.CompilerParams(
            dimension_semantics=("parallel",)),   # v7x: split graph blocks across 2 TCs
    )(x_p, a_blk, *weight_inputs)

    out = out_pad[:n_graphs]                     # drop padded graphs
    return out.reshape(n_graphs // GROUP, GROUP, F_HID)


def dtitag_reference(x, a_hat, seg_t, params):
    h = x
    for w, b in params["tag"]:
        ah = a_hat @ h
        aah = a_hat @ ah
        h = jax.nn.relu(h @ w[0] + ah @ w[1] + aah @ w[2] + b)
    gate = h @ params["gate_w"] + params["gate_b"]          # (N, 1)
    mask = seg_t > 0.5                                      # (N, G)
    masked = jnp.where(mask, gate, -1e30)
    m = jnp.max(masked, axis=0, keepdims=True)
    e = jnp.where(mask, jnp.exp(gate - m), 0.0)
    alpha = e / jnp.sum(e, axis=0, keepdims=True)
    out = jnp.einsum("ng,nd->gd", alpha, h)
    return out.reshape(seg_t.shape[1] // GROUP, GROUP, F_HID)


def init_params(key):
    params = {"tag": []}
    dims = [(F_IN, F_HID)] + [(F_HID, F_HID)] * 3
    for (din, dout) in dims:
        key, kw, kb = jax.random.split(key, 3)
        w = 0.1 * jax.random.normal(kw, (K_HOPS + 1, din, dout), jnp.float32)
        b = 0.1 * jax.random.normal(kb, (1, dout), jnp.float32)
        params["tag"].append((w, b))
    key, kg, kgb = jax.random.split(key, 3)
    params["gate_w"] = 0.1 * jax.random.normal(kg, (F_HID, 1), jnp.float32)
    params["gate_b"] = 0.1 * jax.random.normal(kgb, (1, 1), jnp.float32)
    return params


def build_graph(n_graphs, nodes_per_graph):
    """Block-diagonal batched ring graphs + symmetric normalization + membership."""
    npg = nodes_per_graph
    n = n_graphs * npg
    idx = jnp.arange(npg)
    a_local = jnp.zeros((npg, npg), jnp.float32)
    a_local = a_local.at[idx, (idx + 1) % npg].set(1.0)
    a_local = a_local.at[(idx + 1) % npg, idx].set(1.0)
    a = jnp.kron(jnp.eye(n_graphs, dtype=jnp.float32), a_local)      # (N, N)
    deg = jnp.clip(a.sum(axis=1), 1.0)
    d_inv_sqrt = 1.0 / jnp.sqrt(deg)
    a_hat = d_inv_sqrt[:, None] * a * d_inv_sqrt[None, :]
    graph_id = jnp.arange(n) // npg
    seg_t = (graph_id[:, None] == jnp.arange(n_graphs)[None, :]).astype(jnp.float32)  # (N, G)
    return a_hat, seg_t


# TODO(synk): bilstm / fc_in / fc_out / pooling_ligand exist in DTITAG.__init__ but are
# never used in its forward, so they are intentionally not implemented.

if __name__ == "__main__":
    key = jax.random.PRNGKey(0)
    key, k_x, k_p = jax.random.split(key, 3)

    batch = 2                      # output (2, 50, 64)
    n_graphs = batch * GROUP       # 100 pocket graphs in one batched graph
    nodes_per_graph = 8
    n_nodes = n_graphs * nodes_per_graph

    x = jax.random.normal(k_x, (n_nodes, F_IN), jnp.float32)
    a_hat, seg_t = build_graph(n_graphs, nodes_per_graph)
    params = init_params(k_p)

    fwd = jax.jit(functools.partial(dtitag_forward, nodes_per_graph=nodes_per_graph))
    out = jax.block_until_ready(fwd(x, a_hat, params))
    assert out.shape == (batch, GROUP, F_HID)

    ref = dtitag_reference(x, a_hat, seg_t, params)
    err = float(jnp.max(jnp.abs(out - ref)))
    assert jnp.allclose(out, ref, atol=3e-2, rtol=3e-2), (
        f"kernel/reference mismatch: max abs err {err:.4f}")

    print("KERNEL_OK")
</pallas_src>

<mosaic_0001>
module attributes {stable_mosaic.version = 11 : i64} {
  func.func @_dtitag_kernel(%arg0: i32, %arg1: memref<128x32xbf16, #tpu.memory_space<vmem>>, %arg2: memref<1x128x128xbf16, #tpu.memory_space<vmem>>, %arg3: memref<96x64xbf16, #tpu.memory_space<vmem>>, %arg4: memref<1x64xf32, #tpu.memory_space<vmem>>, %arg5: memref<192x64xbf16, #tpu.memory_space<vmem>>, %arg6: memref<1x64xf32, #tpu.memory_space<vmem>>, %arg7: memref<192x64xbf16, #tpu.memory_space<vmem>>, %arg8: memref<1x64xf32, #tpu.memory_space<vmem>>, %arg9: memref<192x64xbf16, #tpu.memory_space<vmem>>, %arg10: memref<1x64xf32, #tpu.memory_space<vmem>>, %arg11: memref<1x64xf32, #tpu.memory_space<vmem>>, %arg12: memref<1x1xf32, #tpu.memory_space<vmem>>, %arg13: memref<16x64xf32, #tpu.memory_space<vmem>>) attributes {dimension_semantics = [#tpu.dimension_semantics<parallel>], iteration_bounds = array<i64: 7>, scalar_prefetch = 0 : i64, scratch_operands = 0 : i64, tpu.core_type = #tpu.core_type<tc>, window_params = [{transform_indices = @transform_0, window_bounds = array<i64: 128, 32>}, {transform_indices = @transform_1, window_bounds = array<i64: 1, 128, 128>}, {pipeline_mode = #tpu.pipeline_mode<synchronous>, transform_indices = @transform_2, window_bounds = array<i64: 96, 64>}, {pipeline_mode = #tpu.pipeline_mode<synchronous>, transform_indices = @transform_3, window_bounds = array<i64: 1, 64>}, {pipeline_mode = #tpu.pipeline_mode<synchronous>, transform_indices = @transform_4, window_bounds = array<i64: 192, 64>}, {pipeline_mode = #tpu.pipeline_mode<synchronous>, transform_indices = @transform_5, window_bounds = array<i64: 1, 64>}, {pipeline_mode = #tpu.pipeline_mode<synchronous>, transform_indices = @transform_6, window_bounds = array<i64: 192, 64>}, {pipeline_mode = #tpu.pipeline_mode<synchronous>, transform_indices = @transform_7, window_bounds = array<i64: 1, 64>}, {pipeline_mode = #tpu.pipeline_mode<synchronous>, transform_indices = @transform_8, window_bounds = array<i64: 192, 64>}, {pipeline_mode = #tpu.pipeline_mode<synchronous>, transform_indices = @transform_9, window_bounds = array<i64: 1, 64>}, {pipeline_mode = #tpu.pipeline_mode<synchronous>, transform_indices = @transform_10, window_bounds = array<i64: 1, 64>}, {pipeline_mode = #tpu.pipeline_mode<synchronous>, transform_indices = @transform_11, window_bounds = array<i64: 1, 1>}, {transform_indices = @transform_12, window_bounds = array<i64: 16, 64>}]} {
    %c0 = arith.constant 0 : index
    %c0_0 = arith.constant 0 : index
    %c0_1 = arith.constant 0 : index
    %0 = vector.load %arg2[%c0, %c0_0, %c0_1] : memref<1x128x128xbf16, #tpu.memory_space<vmem>>, vector<1x128x128xbf16>
    %1 = vector.shape_cast %0 : vector<1x128x128xbf16> to vector<128x128xbf16>
    %cst = arith.constant dense<0.000000e+00> : vector<128x128xf32>
    %2 = tpu.matmul %1, %1, %cst {dimension_numbers = #tpu.dot_dimension_numbers<[1], [0], [0], [1], [0, 0, 1, 1], [], []>} : vector<128x128xbf16>, vector<128x128xbf16>, vector<128x128xf32> -> vector<128x128xf32>
    %3 = arith.truncf %2 : vector<128x128xf32> to vector<128x128xbf16>
    %c0_2 = arith.constant 0 : index
    %c0_3 = arith.constant 0 : index
    %4 = vector.load %arg1[%c0_2, %c0_3] : memref<128x32xbf16, #tpu.memory_space<vmem>>, vector<128x32xbf16>
    %cst_4 = arith.constant dense<0.000000e+00> : vector<128x32xf32>
    %5 = tpu.matmul %1, %4, %cst_4 {dimension_numbers = #tpu.dot_dimension_numbers<[1], [0], [0], [1], [0, 0, 1, 1], [], []>} : vector<128x128xbf16>, vector<128x32xbf16>, vector<128x32xf32> -> vector<128x32xf32>
    %6 = arith.truncf %5 : vector<128x32xf32> to vector<128x32xbf16>
    %cst_5 = arith.constant dense<0.000000e+00> : vector<128x32xf32>
    %7 = tpu.matmul %3, %4, %cst_5 {dimension_numbers = #tpu.dot_dimension_numbers<[1], [0], [0], [1], [0, 0, 1, 1], [], []>} : vector<128x128xbf16>, vector<128x32xbf16>, vector<128x32xf32> -> vector<128x32xf32>
    %8 = arith.truncf %7 : vector<128x32xf32> to vector<128x32xbf16>
    %9 = tpu.concatenate %4, %6, %8 in 1 : vector<128x32xbf16>, vector<128x32xbf16>, vector<128x32xbf16> -> vector<128x96xbf16>
    %c0_6 = arith.constant 0 : index
    %c0_7 = arith.constant 0 : index
    %10 = vector.load %arg3[%c0_6, %c0_7] : memref<96x64xbf16, #tpu.memory_space<vmem>>, vector<96x64xbf16>
    %cst_8 = arith.constant dense<0.000000e+00> : vector<128x64xf32>
    %11 = tpu.matmul %9, %10, %cst_8 {dimension_numbers = #tpu.dot_dimension_numbers<[1], [0], [0], [1], [0, 0, 1, 1], [], []>} : vector<128x96xbf16>, vector<96x64xbf16>, vector<128x64xf32> -> vector<128x64xf32>
    %c0_9 = arith.constant 0 : index
    %c0_10 = arith.constant 0 : index
    %12 = vector.load %arg4[%c0_9, %c0_10] : memref<1x64xf32, #tpu.memory_space<vmem>>, vector<1x64xf32>
    %13 = vector.broadcast %12 : vector<1x64xf32> to vector<128x64xf32>
    %14 = arith.addf %11, %13 : vector<128x64xf32>
    %cst_11 = arith.constant 0.000000e+00 : f32
    %15 = vector.broadcast %cst_11 : f32 to vector<128x64xf32>
    %16 = arith.maximumf %14, %15 : vector<128x64xf32>
    %17 = arith.truncf %16 : vector<128x64xf32> to vector<128x64xbf16>
    %cst_12 = arith.constant dense<0.000000e+00> : vector<128x64xf32>
    %18 = tpu.matmul %1, %17, %cst_12 {dimension_numbers = #tpu.dot_dimension_numbers<[1], [0], [0], [1], [0, 0, 1, 1], [], []>} : vector<128x128xbf16>, vector<128x64xbf16>, vector<128x64xf32> -> vector<128x64xf32>
    %19 = arith.truncf %18 : vector<128x64xf32> to vector<128x64xbf16>
    %cst_13 = arith.constant dense<0.000000e+00> : vector<128x64xf32>
    %20 = tpu.matmul %3, %17, %cst_13 {dimension_numbers = #tpu.dot_dimension_numbers<[1], [0], [0], [1], [0, 0, 1, 1], [], []>} : vector<128x128xbf16>, vector<128x64xbf16>, vector<128x64xf32> -> vector<128x64xf32>
    %21 = arith.truncf %20 : vector<128x64xf32> to vector<128x64xbf16>
    %22 = tpu.concatenate %17, %19, %21 in 1 : vector<128x64xbf16>, vector<128x64xbf16>, vector<128x64xbf16> -> vector<128x192xbf16>
    %c0_14 = arith.constant 0 : index
    %c0_15 = arith.constant 0 : index
    %23 = vector.load %arg5[%c0_14, %c0_15] : memref<192x64xbf16, #tpu.memory_space<vmem>>, vector<192x64xbf16>
    %cst_16 = arith.constant dense<0.000000e+00> : vector<128x64xf32>
    %24 = tpu.matmul %22, %23, %cst_16 {dimension_numbers = #tpu.dot_dimension_numbers<[1], [0], [0], [1], [0, 0, 1, 1], [], []>} : vector<128x192xbf16>, vector<192x64xbf16>, vector<128x64xf32> -> vector<128x64xf32>
    %c0_17 = arith.constant 0 : index
    %c0_18 = arith.constant 0 : index
    %25 = vector.load %arg6[%c0_17, %c0_18] : memref<1x64xf32, #tpu.memory_space<vmem>>, vector<1x64xf32>
    %26 = vector.broadcast %25 : vector<1x64xf32> to vector<128x64xf32>
    %27 = arith.addf %24, %26 : vector<128x64xf32>
    %cst_19 = arith.constant 0.000000e+00 : f32
    %28 = vector.broadcast %cst_19 : f32 to vector<128x64xf32>
    %29 = arith.maximumf %27, %28 : vector<128x64xf32>
    %30 = arith.truncf %29 : vector<128x64xf32> to vector<128x64xbf16>
    %cst_20 = arith.constant dense<0.000000e+00> : vector<128x64xf32>
    %31 = tpu.matmul %1, %30, %cst_20 {dimension_numbers = #tpu.dot_dimension_numbers<[1], [0], [0], [1], [0, 0, 1, 1], [], []>} : vector<128x128xbf16>, vector<128x64xbf16>, vector<128x64xf32> -> vector<128x64xf32>
    %32 = arith.truncf %31 : vector<128x64xf32> to vector<128x64xbf16>
    %cst_21 = arith.constant dense<0.000000e+00> : vector<128x64xf32>
    %33 = tpu.matmul %3, %30, %cst_21 {dimension_numbers = #tpu.dot_dimension_numbers<[1], [0], [0], [1], [0, 0, 1, 1], [], []>} : vector<128x128xbf16>, vector<128x64xbf16>, vector<128x64xf32> -> vector<128x64xf32>
    %34 = arith.truncf %33 : vector<128x64xf32> to vector<128x64xbf16>
    %35 = tpu.concatenate %30, %32, %34 in 1 : vector<128x64xbf16>, vector<128x64xbf16>, vector<128x64xbf16> -> vector<128x192xbf16>
    %c0_22 = arith.constant 0 : index
    %c0_23 = arith.constant 0 : index
    %36 = vector.load %arg7[%c0_22, %c0_23] : memref<192x64xbf16, #tpu.memory_space<vmem>>, vector<192x64xbf16>
    %cst_24 = arith.constant dense<0.000000e+00> : vector<128x64xf32>
    %37 = tpu.matmul %35, %36, %cst_24 {dimension_numbers = #tpu.dot_dimension_numbers<[1], [0], [0], [1], [0, 0, 1, 1], [], []>} : vector<128x192xbf16>, vector<192x64xbf16>, vector<128x64xf32> -> vector<128x64xf32>
    %c0_25 = arith.constant 0 : index
    %c0_26 = arith.constant 0 : index
    %38 = vector.load %arg8[%c0_25, %c0_26] : memref<1x64xf32, #tpu.memory_space<vmem>>, vector<1x64xf32>
    %39 = vector.broadcast %38 : vector<1x64xf32> to vector<128x64xf32>
    %40 = arith.addf %37, %39 : vector<128x64xf32>
    %cst_27 = arith.constant 0.000000e+00 : f32
    %41 = vector.broadcast %cst_27 : f32 to vector<128x64xf32>
    %42 = arith.maximumf %40, %41 : vector<128x64xf32>
    %43 = arith.truncf %42 : vector<128x64xf32> to vector<128x64xbf16>
    %cst_28 = arith.constant dense<0.000000e+00> : vector<128x64xf32>
    %44 = tpu.matmul %1, %43, %cst_28 {dimension_numbers = #tpu.dot_dimension_numbers<[1], [0], [0], [1], [0, 0, 1, 1], [], []>} : vector<128x128xbf16>, vector<128x64xbf16>, vector<128x64xf32> -> vector<128x64xf32>
    %45 = arith.truncf %44 : vector<128x64xf32> to vector<128x64xbf16>
    %cst_29 = arith.constant dense<0.000000e+00> : vector<128x64xf32>
    %46 = tpu.matmul %3, %43, %cst_29 {dimension_numbers = #tpu.dot_dimension_numbers<[1], [0], [0], [1], [0, 0, 1, 1], [], []>} : vector<128x128xbf16>, vector<128x64xbf16>, vector<128x64xf32> -> vector<128x64xf32>
    %47 = arith.truncf %46 : vector<128x64xf32> to vector<128x64xbf16>
    %48 = tpu.concatenate %43, %45, %47 in 1 : vector<128x64xbf16>, vector<128x64xbf16>, vector<128x64xbf16> -> vector<128x192xbf16>
    %c0_30 = arith.constant 0 : index
    %c0_31 = arith.constant 0 : index
    %49 = vector.load %arg9[%c0_30, %c0_31] : memref<192x64xbf16, #tpu.memory_space<vmem>>, vector<192x64xbf16>
    %cst_32 = arith.constant dense<0.000000e+00> : vector<128x64xf32>
    %50 = tpu.matmul %48, %49, %cst_32 {dimension_numbers = #tpu.dot_dimension_numbers<[1], [0], [0], [1], [0, 0, 1, 1], [], []>} : vector<128x192xbf16>, vector<192x64xbf16>, vector<128x64xf32> -> vector<128x64xf32>
    %c0_33 = arith.constant 0 : index
    %c0_34 = arith.constant 0 : index
    %51 = vector.load %arg10[%c0_33, %c0_34] : memref<1x64xf32, #tpu.memory_space<vmem>>, vector<1x64xf32>
    %52 = vector.broadcast %51 : vector<1x64xf32> to vector<128x64xf32>
    %53 = arith.addf %50, %52 : vector<128x64xf32>
    %cst_35 = arith.constant 0.000000e+00 : f32
    %54 = vector.broadcast %cst_35 : f32 to vector<128x64xf32>
    %55 = arith.maximumf %53, %54 : vector<128x64xf32>
    %56 = vector.shape_cast %55 : vector<128x64xf32> to vector<16x8x64xf32>
    %c0_36 = arith.constant 0 : index
    %c0_37 = arith.constant 0 : index
    %57 = vector.load %arg11[%c0_36, %c0_37] : memref<1x64xf32, #tpu.memory_space<vmem>>, vector<1x64xf32>
    %58 = vector.shape_cast %57 : vector<1x64xf32> to vector<1x1x64xf32>
    %59 = vector.broadcast %58 : vector<1x1x64xf32> to vector<16x8x64xf32>
    %60 = arith.mulf %56, %59 : vector<16x8x64xf32>
    %cst_38 = arith.constant dense<0.000000e+00> : vector<16x8xf32>
    %61 = vector.multi_reduction <add>, %60, %cst_38 [2] : vector<16x8x64xf32> to vector<16x8xf32>
    %62 = vector.shape_cast %61 : vector<16x8xf32> to vector<16x8x1xf32>
    %c0_39 = arith.constant 0 : index
    %c0_40 = arith.constant 0 : index
    %63 = vector.load %arg12[%c0_39, %c0_40] : memref<1x1xf32, #tpu.memory_space<vmem>>, vector<1x1xf32>
    %64 = vector.shape_cast %63 : vector<1x1xf32> to vector<1x1x1xf32>
    %65 = vector.broadcast %64 : vector<1x1x1xf32> to vector<16x8x1xf32>
    %66 = arith.addf %62, %65 : vector<16x8x1xf32>
    %cst_41 = arith.constant dense<0xFF800000> : vector<16x1xf32>
    %67 = vector.multi_reduction <maximumf>, %66, %cst_41 [1] : vector<16x8x1xf32> to vector<16x1xf32>
    %68 = vector.shape_cast %67 : vector<16x1xf32> to vector<16x1x1xf32>
    %69 = vector.broadcast %68 : vector<16x1x1xf32> to vector<16x8x1xf32>
    %70 = arith.subf %66, %69 : vector<16x8x1xf32>
    %71 = math.exp %70 : vector<16x8x1xf32>
    %cst_42 = arith.constant dense<0.000000e+00> : vector<16x1xf32>
    %72 = vector.multi_reduction <add>, %71, %cst_42 [1] : vector<16x8x1xf32> to vector<16x1xf32>
    %73 = vector.shape_cast %72 : vector<16x1xf32> to vector<16x1x1xf32>
    %74 = vector.broadcast %73 : vector<16x1x1xf32> to vector<16x8x1xf32>
    %75 = arith.divf %71, %74 : vector<16x8x1xf32>
    %76 = vector.broadcast %75 : vector<16x8x1xf32> to vector<16x8x64xf32>
    %77 = arith.mulf %76, %56 : vector<16x8x64xf32>
    %cst_43 = arith.constant dense<0.000000e+00> : vector<16x64xf32>
    %78 = vector.multi_reduction <add>, %77, %cst_43 [1] : vector<16x8x64xf32> to vector<16x64xf32>
    %c0_44 = arith.constant 0 : index
    %c0_45 = arith.constant 0 : index
    %79 = vector.load %arg13[%c0_44, %c0_45] : memref<16x64xf32, #tpu.memory_space<vmem>>, vector<16x64xf32>
    tpu.vector_store %arg13[%c0_44, %c0_45], %78 {strides = array<i32>} : memref<16x64xf32, #tpu.memory_space<vmem>>, vector<16x64xf32>,
    return
  }
  func.func @transform_0(%arg0: i32) -> (i32, i32) {
    %c0_i32 = arith.constant 0 : i32
    %c0_i32_0 = arith.constant 0 : i32
    return %arg0, %c0_i32 : i32, i32
  }
  func.func @transform_1(%arg0: i32) -> (i32, i32, i32) {
    %c0_i32 = arith.constant 0 : i32
    %c0_i32_0 = arith.constant 0 : i32
    %c0_i32_1 = arith.constant 0 : i32
    return %arg0, %c0_i32, %c0_i32_0 : i32, i32, i32
  }
  func.func @transform_2(%arg0: i32) -> (i32, i32) {
    %c0_i32 = arith.constant 0 : i32
    %c0_i32_0 = arith.constant 0 : i32
    %c0_i32_1 = arith.constant 0 : i32
    return %c0_i32, %c0_i32_0 : i32, i32
  }
  func.func @transform_3(%arg0: i32) -> (i32, i32) {
    %c0_i32 = arith.constant 0 : i32
    %c0_i32_0 = arith.constant 0 : i32
    %c0_i32_1 = arith.constant 0 : i32
    return %c0_i32, %c0_i32_0 : i32, i32
  }
  func.func @transform_4(%arg0: i32) -> (i32, i32) {
    %c0_i32 = arith.constant 0 : i32
    %c0_i32_0 = arith.constant 0 : i32
    %c0_i32_1 = arith.constant 0 : i32
    return %c0_i32, %c0_i32_0 : i32, i32
  }
  func.func @transform_5(%arg0: i32) -> (i32, i32) {
    %c0_i32 = arith.constant 0 : i32
    %c0_i32_0 = arith.constant 0 : i32
    %c0_i32_1 = arith.constant 0 : i32
    return %c0_i32, %c0_i32_0 : i32, i32
  }
  func.func @transform_6(%arg0: i32) -> (i32, i32) {
    %c0_i32 = arith.constant 0 : i32
    %c0_i32_0 = arith.constant 0 : i32
    %c0_i32_1 = arith.constant 0 : i32
    return %c0_i32, %c0_i32_0 : i32, i32
  }
  func.func @transform_7(%arg0: i32) -> (i32, i32) {
    %c0_i32 = arith.constant 0 : i32
    %c0_i32_0 = arith.constant 0 : i32
    %c0_i32_1 = arith.constant 0 : i32
    return %c0_i32, %c0_i32_0 : i32, i32
  }
  func.func @transform_8(%arg0: i32) -> (i32, i32) {
    %c0_i32 = arith.constant 0 : i32
    %c0_i32_0 = arith.constant 0 : i32
    %c0_i32_1 = arith.constant 0 : i32
    return %c0_i32, %c0_i32_0 : i32, i32
  }
  func.func @transform_9(%arg0: i32) -> (i32, i32) {
    %c0_i32 = arith.constant 0 : i32
    %c0_i32_0 = arith.constant 0 : i32
    %c0_i32_1 = arith.constant 0 : i32
    return %c0_i32, %c0_i32_0 : i32, i32
  }
  func.func @transform_10(%arg0: i32) -> (i32, i32) {
    %c0_i32 = arith.constant 0 : i32
    %c0_i32_0 = arith.constant 0 : i32
    %c0_i32_1 = arith.constant 0 : i32
    return %c0_i32, %c0_i32_0 : i32, i32
  }
  func.func @transform_11(%arg0: i32) -> (i32, i32) {
    %c0_i32 = arith.constant 0 : i32
    %c0_i32_0 = arith.constant 0 : i32
    %c0_i32_1 = arith.constant 0 : i32
    return %c0_i32, %c0_i32_0 : i32, i32
  }
  func.func @transform_12(%arg0: i32) -> (i32, i32) {
    %c0_i32 = arith.constant 0 : i32
    %c0_i32_0 = arith.constant 0 : i32
    return %arg0, %c0_i32 : i32, i32
  }
}

</mosaic_0001>

<bundles_post_ra>
// kernel: dtitag_forward.1
= control target key start
LH: loop header
LB: loop body
LE: loop exit
PB: predicated region body
PF: predicated region fallthrough
CT: control target
= control target key end

     0   :  { %s4148_s23 = smov 0   ;;  %s5291_s0 = inlined_call_operand.vmem [shape: bf16[896,32], index: 0, kind: input, shape index: {}]   ;;  %s5292_s1 = inlined_call_operand.vmem [shape: bf16[7,128,128], index: 1, kind: input, shape index: {}]   ;;  %s5293_s2 = inlined_call_operand.vmem [shape: bf16[96,64], index: 2, kind: input, shape index: {}]   ;;  %s5294_s3 = inlined_call_operand.vmem [shape: f32[1,64], index: 3, kind: input, shape index: {}]   ;;  %s5295_s4 = inlined_call_operand.vmem [shape: bf16[192,64], index: 4, kind: input, shape index: {}]   ;;  %s5296_s5 = inlined_call_operand.vmem [shape: f32[1,64], index: 5, kind: input, shape index: {}]   ;;  %s5297_s6 = inlined_call_operand.vmem [shape: bf16[192,64], index: 6, kind: input, shape index: {}]   ;;  %s5298_s7 = inlined_call_operand.vmem [shape: f32[1,64], index: 7, kind: input, shape index: {}]   ;;  %s5299_s8 = inlined_call_operand.vmem [shape: bf16[192,64], index: 8, kind: input, shape index: {}]   ;;  %s5300_s9 = inlined_call_operand.vmem [shape: f32[1,64], index: 9, kind: input, shape index: {}]   ;;  %s5301_s10 = inlined_call_operand.vmem [shape: f32[1,64], index: 10, kind: input, shape index: {}]   ;;  %s5302_s11 = inlined_call_operand.<no memory space> [shape: f32[1,1], index: 11, kind: input, shape index: {}]   ;;  %s5303_s12 = inlined_call_operand.vmem [shape: f32[112,64], index: 12, kind: output, shape index: {}]  }
   0x1   :  { %v17_v0 = vstv %s5302_s11 }
   0x2   :  { %18 = vst [vmem:[#allocation2] sm:$0x1] %v17_v0 }
   0x3 LB: > { %s4154_s24 = sadd.s32 4294967295, %s4075_s23   ;;  %p3645_p0 = scmp.ge.s32.totalorder %s4075_s23, 1  ;;  %s4075_s23 = sphi %s4148_s23, %s24_s23  }
   0x4   : > { %p375_p1 = scmp.lt.s32.totalorder %s4075_s23, 8 }
   0x6   : > { %p376_p2 = pnand %p3645_p0, %p375_p1 }
   0x7   : > { %p428_p3 = scmp.lt.s32.totalorder (!%p376_p2), %s4154_s24, 6  ;;  %s3646_s29 = sshll.u32 (!%p376_p2), %s4154_s24, 4 }
   0x8   : > { %379 = sbr.rel (%p376_p2) target bundleno = 2666 (0xa6a), region = 68  ;;  %p423_p4 = scmp.lt.s32.totalorder (!%p376_p2), %s3646_s29, 111 }
   0x9   : > { %s4077_s16 = smov (!%p376_p2), 32   ;;  %s4078_s17 = smov (!%p376_p2), 64  }
   0xa   : > { %s3650_s18 = sshll.u32 (!%p376_p2), %s4154_s24, 1 }
   0xb   : > { %p5231_p5 = scmp.lt.s32.totalorder (!%p376_p2), %s3650_s18, 13 }
   0xd   : > { %s429_s11 = scalar_select %p428_p3, %s4154_s24, 6  ;;  %vm867_vm0 = vcmask 261120   ;;  %vm892_vm1 = vcmask 523264   ;;  %vm961_vm2 = vcmask 785408   ;;  %vm2811_vm3 = vcmask 7168  }
   0xe   : > { %s5320_s29 = smov (!%p423_p4, %s3646_s29), 111  ;;  %s5322_s18 = smov (!%p5231_p5, %s3650_s18), 13 }
   0xf   : > { %s3918_s25 = sshll.u32 %s429_s11, 6  ;;  %s3647_s30 = sshll.u32 %s5320_s29, 2 }
  0x10   : > { %s4163_s28 = scalar_lea.vmem %s5292_s1, %s3918_s25  ;;  %s426_s15 = scalar_lea.vmem %s5291_s0, %s3647_s30 }
  0x11   : > { %v4166_v1 = vld [vmem:[%s4163_s28 + $0x38] sm:$0xff]  ;;  %v4170_v2 = vld [vmem:[%s4163_s28 + $0x30] sm:$0xff]  ;;  %v4174_v3 = vld [vmem:[%s4163_s28 + $0x28] sm:$0xff]  ;;  %s3651_s24 = sshll.u32 %s5322_s18, 3 }
  0x12   : > { %504 = vmatpush.bf16.msra.mxu0 %v4166_v1  ;;  %v4178_v4 = vld [vmem:[%s4163_s28 + $0x20] sm:$0xff]  ;;  %v4182_v5 = vld [vmem:[%s4163_s28 + $0x18] sm:$0xff]  ;;  %v4186_v6 = vld [vmem:[%s4163_s28 + $0x10] sm:$0xff]  ;;  %s5260_s21 = scalar_lea.vmem %s5303_s12, %s3651_s24 }
  0x13   : > { %v4190_v7 = vld [vmem:[%s4163_s28 + $0x8] sm:$0xff]  ;;  %v4194_v8 = vld [vmem:[%s4163_s28] sm:$0xff]  ;;  %v4205_v9 = vld [vmem:[%s426_s15 + $0x38] sm:$0xff] }
  0x14   : > { %625 = vmatpush.bf16.msra.mxu1 %v4205_v9  ;;  %v4208_v10 = vld [vmem:[%s426_s15 + $0x30] sm:$0xff]  ;;  %690 = vmatpush.bf16.msra.mxu2 %v4205_v9  ;;  %v4212_v11 = vld [vmem:[%s426_s15 + $0x28] sm:$0xff]  ;;  %v4218_v12 = vld [vmem:[%s426_s15 + $0x20] sm:$0xff] }
  0x15   : > { %v4221_v13 = vld [vmem:[%s426_s15 + $0x18] sm:$0xff]  ;;  %v4225_v14 = vld [vmem:[%s426_s15 + $0x10] sm:$0xff]  ;;  %v4229_v15 = vld [vmem:[%s426_s15 + $0x8] sm:$0xff] }
  0x16   : > { %505 = vmatpush.bf16.msra.mxu0 %v4170_v2  ;;  %v4235_v16 = vld [vmem:[%s426_s15] sm:$0xff] }
  0x18   : > { %626 = vmatpush.bf16.msra.mxu1 %v4208_v10  ;;  %691 = vmatpush.bf16.msra.mxu2 %v4208_v10 }
  0x1a   : > { %506 = vmatpush.bf16.msra.mxu0 %v4174_v3 }
  0x1c   : > { %627 = vmatpush.bf16.msra.mxu1 %v4212_v11  ;;  %692 = vmatpush.bf16.msra.mxu2 %v4212_v11 }
  0x1e   : > { %507 = vmatpush.bf16.msra.mxu0 %v4178_v4 }
  0x20   : > { %628 = vmatpush.bf16.msra.mxu1 %v4218_v12  ;;  %693 = vmatpush.bf16.msra.mxu2 %v4218_v12 }
  0x22   : > { %508 = vmatpush.bf16.msra.mxu0 %v4182_v5 }
  0x24   : > { %629 = vmatpush.bf16.msra.mxu1 %v4221_v13  ;;  %694 = vmatpush.bf16.msra.mxu2 %v4221_v13 }
  0x26   : > { %509 = vmatpush.bf16.msra.mxu0 %v4186_v6 }
  0x28   : > { %630 = vmatpush.bf16.msra.mxu1 %v4225_v14  ;;  %695 = vmatpush.bf16.msra.mxu2 %v4225_v14 }
  0x2a   : > { %510 = vmatpush.bf16.msra.mxu0 %v4190_v7 }
  0x2c   : > { %631 = vmatpush.bf16.msra.mxu1 %v4229_v15  ;;  %696 = vmatpush.bf16.msra.mxu2 %v4229_v15 }
  0x2e   : > { %511 = vmatpush.bf16.msra.mxu0 %v4194_v8 }
  0x30   : > { %632 = vmatpush.bf16.msra.mxu1 %v4235_v16  ;;  %697 = vmatpush.bf16.msra.mxu2 %v4235_v16 }
  0x31   : > { %512 = vmatmul.bf16.vlgmr.msra.gmra.mxu0 %v4194_v8 }
  0x33   : > { %633 = vmatmul.bf16.vlgmr.msra.gmra.mxu1 %v4194_v8 }
  0x41   : > { %517 = vmatmul.bf16.gmra.mxu0 %v4190_v7 }
  0x43   : > { %638 = vmatmul.bf16.gmra.mxu1 %v4190_v7 }
  0x51   : > { %522 = vmatmul.bf16.gmra.mxu0 %v4186_v6 }
  0x53   : > { %643 = vmatmul.bf16.gmra.mxu1 %v4186_v6 }
  0x61   : > { %527 = vmatmul.bf16.gmra.mxu0 %v4182_v5 }
  0x63   : > { %648 = vmatmul.bf16.gmra.mxu1 %v4182_v5 }
  0x71   : > { %532 = vmatmul.bf16.gmra.mxu0 %v4178_v4 }
  0x73   : > { %653 = vmatmul.bf16.gmra.mxu1 %v4178_v4 }
  0x81   : > { %537 = vmatmul.bf16.gmra.mxu0 %v4174_v3 }
  0x83   : > { %658 = vmatmul.bf16.gmra.mxu1 %v4174_v3 }
  0x91   : > { %542 = vmatmul.bf16.gmra.mxu0 %v4170_v2 }
  0x93   : > { %663 = vmatmul.bf16.gmra.mxu1 %v4170_v2 }
  0xa1   : > { %547 = vmatmul.bf16.gmra.mxu0 %v4166_v1 }
  0xa3   : > { %668 = vmatmul.bf16.gmra.mxu1 %v4166_v1 }
  0xae   : > { %v513_v17 = vpop.f32.mrf.mxu0 }
  0xb0   : > { %v634_v33 = vpop.f32.mrf.mxu1 }
  0xb1   : > { %v674_v36 = vpack.c.bf16 %v634_v33, %v634_v33 }
  0xb3   : > { %v771_v38 = vunpack.c.l.b16 %v674_v36 }
  0xb6   : > { %v515_v18 = vpop.f32.mrf.mxu0 }
  0xb7   : > { %v4245_v19 = vpack.c.bf16 %v515_v18, %v513_v17 }
  0xb8   : > { %v636_v37 = vpop.f32.mrf.mxu1 }
  0xb9   : > { %698 = vmatmul.bf16.vlgmr.msra.gmra.mxu2 %v4245_v19  ;;  %v675_v39 = vpack.c.bf16 %v636_v37, %v636_v37 }
  0xbb   : > { %v772_v41 = vunpack.c.l.b16 %v675_v39 }
  0xbd   : > { %v787_v42 = vpack.c.b16 %v772_v41, %v771_v38 }
  0xbe   : > { %v518_v20 = vpop.f32.mrf.mxu0 }
  0xbf   : > { %795 = vrot.lane.b32.xlu0 %v787_v42, %s4077_s16 }
  0xc0   : > { %v639_v43 = vpop.f32.mrf.mxu1 }
  0xc1   : > { %v676_v48 = vpack.c.bf16 %v639_v43, %v639_v43 }
  0xc3   : > { %v773_v50 = vunpack.c.l.b16 %v676_v48 }
  0xc6   : > { %v520_v21 = vpop.f32.mrf.mxu0 }
  0xc7   : > { %v4249_v22 = vpack.c.bf16 %v520_v21, %v518_v20 }
  0xc8   : > { %v641_v47 = vpop.f32.mrf.mxu1 }
  0xc9   : > { %703 = vmatmul.bf16.gmra.mxu2 %v4249_v22  ;;  %v677_v49 = vpack.c.bf16 %v641_v47, %v641_v47 }
  0xcb   : > { %v774_v51 = vunpack.c.l.b16 %v677_v49 }
  0xcd   : > { %v788_v55 = vpack.c.b16 %v774_v51, %v773_v50 }
  0xce   : > { %v523_v23 = vpop.f32.mrf.mxu0 }
  0xcf   : > { %797 = vrot.lane.b32.xlu1 %v788_v55, %s4077_s16 }
  0xd0   : > { %v644_v54 = vpop.f32.mrf.mxu1 }
  0xd1   : > { %v678_v57 = vpack.c.bf16 %v644_v54, %v644_v54 }
  0xd3   : > { %v775_v59 = vunpack.c.l.b16 %v678_v57 }
  0xd6   : > { %v525_v24 = vpop.f32.mrf.mxu0 }
  0xd7   : > { %v4253_v25 = vpack.c.bf16 %v525_v24, %v523_v23 }
  0xd8   : > { %v646_v56 = vpop.f32.mrf.mxu1 }
  0xd9   : > { %708 = vmatmul.bf16.gmra.mxu2 %v4253_v25  ;;  %v679_v58 = vpack.c.bf16 %v646_v56, %v646_v56 }
  0xdb   : > { %v776_v60 = vunpack.c.l.b16 %v679_v58 }
  0xdd   : > { %v789_v63 = vpack.c.b16 %v776_v60, %v775_v59 }
  0xde   : > { %v528_v26 = vpop.f32.mrf.mxu0 }
  0xdf   : > { %799 = vrot.lane.b32.xlu2 %v789_v63, %s4077_s16 }
  0xe0   : > { %v649_v62 = vpop.f32.mrf.mxu1 }
  0xe1   : > { %v680_v24 = vpack.c.bf16 %v649_v62, %v649_v62 }
  0xe6   : > { %v530_v27 = vpop.f32.mrf.mxu0 }
  0xe7   : > { %v4257_v28 = vpack.c.bf16 %v530_v27, %v528_v26 }
  0xe8   : > { %v651_v20 = vpop.f32.mrf.mxu1 }
  0xe9   : > { %713 = vmatmul.bf16.gmra.mxu2 %v4257_v28  ;;  %v681_v26 = vpack.c.bf16 %v651_v20, %v651_v20 }
  0xee   : > { %v533_v29 = vpop.f32.mrf.mxu0 }
  0xf0   : > { %v654_v37 = vpop.f32.mrf.mxu1 }
  0xf1   : > { %v682_v49 = vpack.c.bf16 %v654_v37, %v654_v37 }
  0xf3   : > { %v779_v55 = vunpack.c.l.b16 %v682_v49 }
  0xf6   : > { %v535_v30 = vpop.f32.mrf.mxu0 }
  0xf7   : > { %v4261_v31 = vpack.c.bf16 %v535_v30, %v533_v29  ;;  %v777_v29 = vunpack.c.l.b16 %v680_v24  ;;  %v778_v30 = vunpack.c.l.b16 %v681_v26 }
  0xf8   : > { %v656_v43 = vpop.f32.mrf.mxu1 }
  0xf9   : > { %718 = vmatmul.bf16.gmra.mxu2 %v4261_v31  ;;  %v790_v33 = vpack.c.b16 %v778_v30, %v777_v29  ;;  %v683_v51 = vpack.c.bf16 %v656_v43, %v656_v43 }
  0xfb   : > { %v780_v56 = vunpack.c.l.b16 %v683_v51 }
  0xfd   : > { %v791_v58 = vpack.c.b16 %v780_v56, %v779_v55 }
  0xfe   : > { %v538_v32 = vpop.f32.mrf.mxu0 }
 0x106   : > { %v540_v34 = vpop.f32.mrf.mxu0 }
 0x107   : > { %v4264_v35 = vpack.c.bf16 %v540_v34, %v538_v32 }
 0x109   : > { %723 = vmatmul.bf16.gmra.mxu2 %v4264_v35 }
 0x10e   : > { %v543_v40 = vpop.f32.mrf.mxu0 }
 0x116   : > { %v545_v44 = vpop.f32.mrf.mxu0 }
 0x117   : > { %v4268_v45 = vpack.c.bf16 %v545_v44, %v543_v40 }
 0x119   : > { %728 = vmatmul.bf16.gmra.mxu2 %v4268_v45 }
 0x11e   : > { %v548_v46 = vpop.f32.mrf.mxu0 }
 0x126   : > { %v550_v52 = vpop.f32.mrf.mxu0 }
 0x127   : > { %v4271_v53 = vpack.c.bf16 %v550_v52, %v548_v46  ;;  %v659_v52 = vpop.f32.mrf.mxu1 }
 0x129   : > { %733 = vmatmul.bf16.gmra.mxu2 %v4271_v53 }
 0x12f   : > { %v661_v59 = vpop.f32.mrf.mxu1 }
 0x13c   : > { %v699_v61 = vpop.f32.mrf.mxu2 }
 0x13d   : > { %v739_v0 = vpack.c.bf16 %v699_v61, %v699_v61 }
 0x13f   : > { %v827_v21 = vunpack.c.l.b16 %v739_v0  ;;  %v684_v0 = vpack.c.bf16 %v659_v52, %v659_v52  ;;  %v3936_v52 = vld [vmem:[%s5293_s2 + $0x8] sm:$0xff] }
 0x144   : > { %v701_v17 = vpop.f32.mrf.mxu2 }
 0x145   : > { %v740_v18 = vpack.c.bf16 %v701_v17, %v701_v17 }
 0x147   : > { %v828_v23 = vunpack.c.l.b16 %v740_v18  ;;  %v685_v18 = vpack.c.bf16 %v661_v59, %v661_v59 }
 0x149   : > { %v843_v27 = vpack.c.b16 %v828_v23, %v827_v21  ;;  %v664_v21 = vpop.f32.mrf.mxu1  ;;  %v781_v23 = vunpack.c.l.b16 %v684_v0  ;;  %v782_v24 = vunpack.c.l.b16 %v685_v18 }
 0x14b   : > { %851 = vrot.lane.b32.xlu0 %v843_v27, %s4078_s17  ;;  %v792_v27 = vpack.c.b16 %v782_v24, %v781_v23 }
 0x14c   : > { %v704_v32 = vpop.f32.mrf.mxu2 }
 0x14d   : > { %v741_v34 = vpack.c.bf16 %v704_v32, %v704_v32 }
 0x14f   : > { %v829_v39 = vunpack.c.l.b16 %v741_v34  ;;  %v3940_v34 = vld [vmem:[%s5293_s2 + $0x28] sm:$0xff] }
 0x150   : > { %980 = vmatpush.bf16.msra.mxu3 %v3940_v34 }
 0x151   : > { %v666_v32 = vpop.f32.mrf.mxu1 }
 0x153   : > { %801 = vrot.lane.b32.xlu0 %v790_v33, %s4077_s16 }
 0x154   : > { %v706_v36 = vpop.f32.mrf.mxu2 }
 0x155   : > { %v742_v38 = vpack.c.bf16 %v706_v36, %v706_v36 }
 0x157   : > { %v830_v40 = vunpack.c.l.b16 %v742_v38  ;;  %v686_v38 = vpack.c.bf16 %v664_v21, %v664_v21 }
 0x159   : > { %v844_v41 = vpack.c.b16 %v830_v40, %v829_v39  ;;  %v687_v39 = vpack.c.bf16 %v666_v32, %v666_v32  ;;  %v796_v32 = vpop.permute.xlu0 %795 }
 0x15b   : > { %853 = vrot.lane.b32.xlu1 %v844_v41, %s4078_s17  ;;  %v3939_v41 = vld [vmem:[%s5293_s2 + $0x20] sm:$0xff]  ;;  %v784_v43 = vunpack.c.l.b16 %v687_v39 }
 0x15c   : > { %v709_v42 = vpop.f32.mrf.mxu2  ;;  %981 = vmatpush.bf16.msra.mxu3 %v3939_v41  ;;  %v798_v41 = vpop.permute.xlu1 %797 }
 0x15d   : > { %v743_v44 = vpack.c.bf16 %v709_v42, %v709_v42  ;;  %v783_v42 = vunpack.c.l.b16 %v686_v38  ;;  %v870_v38 = vsel %vm867_vm0, %v4235_v16, %v796_v32 }
 0x15f   : > { %v831_v48 = vunpack.c.l.b16 %v743_v44 }
 0x164   : > { %v711_v46 = vpop.f32.mrf.mxu2 }
 0x165   : > { %v744_v47 = vpack.c.bf16 %v711_v46, %v711_v46  ;;  %v3938_v46 = vld [vmem:[%s5293_s2 + $0x18] sm:$0xff] }
 0x166   : > { %982 = vmatpush.bf16.msra.mxu3 %v3938_v46  ;;  %v800_v46 = vpop.permute.xlu2 %799 }
 0x167   : > { %v832_v50 = vunpack.c.l.b16 %v744_v47  ;;  %v793_v47 = vpack.c.b16 %v784_v43, %v783_v42  ;;  %v873_v42 = vsel %vm867_vm0, %v4229_v15, %v798_v41 }
 0x169   : > { %v845_v54 = vpack.c.b16 %v832_v50, %v831_v48  ;;  %v3937_v48 = vld [vmem:[%s5293_s2 + $0x10] sm:$0xff] }
 0x16a   : > { %983 = vmatpush.bf16.msra.mxu3 %v3937_v48  ;;  %v876_v48 = vsel %vm867_vm0, %v4225_v14, %v800_v46 }
 0x16b   : > { %855 = vrot.lane.b32.xlu2 %v845_v54, %s4078_s17 }
 0x16c   : > { %v714_v57 = vpop.f32.mrf.mxu2 }
 0x16d   : > { %v745_v60 = vpack.c.bf16 %v714_v57, %v714_v57  ;;  %v3935_v57 = vld [vmem:[%s5293_s2] sm:$0xff] }
 0x16e   : > { %984 = vmatpush.bf16.msra.mxu3 %v3936_v52 }
 0x16f   : > { %v833_v63 = vunpack.c.l.b16 %v745_v60 }
 0x172   : > { %985 = vmatpush.bf16.msra.mxu3 %v3935_v57 }
 0x173   : > { %803 = vrot.lane.b32.xlu2 %v791_v58, %s4077_s16  ;;  %v669_v58 = vpop.f32.mrf.mxu1 }
 0x174   : > { %v716_v61 = vpop.f32.mrf.mxu2  ;;  %v688_v60 = vpack.c.bf16 %v669_v58, %v669_v58 }
 0x175   : > { %v746_v62 = vpack.c.bf16 %v716_v61, %v716_v61 }
 0x176   : > { %v785_v0 = vunpack.c.l.b16 %v688_v60 }
 0x177   : > { %v834_v17 = vunpack.c.l.b16 %v746_v62 }
 0x179   : > { %v846_v20 = vpack.c.b16 %v834_v17, %v833_v63 }
 0x17b   : > { %857 = vrot.lane.b32.xlu1 %v846_v20, %s4078_s17  ;;  %v671_v62 = vpop.f32.mrf.mxu1 }
 0x17c   : > { %v719_v26 = vpop.f32.mrf.mxu2  ;;  %v689_v17 = vpack.c.bf16 %v671_v62, %v671_v62 }
 0x17d   : > { %v747_v29 = vpack.c.bf16 %v719_v26, %v719_v26 }
 0x17e   : > { %v786_v20 = vunpack.c.l.b16 %v689_v17 }
 0x17f   : > { %v835_v36 = vunpack.c.l.b16 %v747_v29 }
 0x180   : > { %v794_v24 = vpack.c.b16 %v786_v20, %v785_v0 }
 0x183   : > { %805 = vrot.lane.b32.xlu1 %v792_v27, %s4077_s16 }
 0x184   : > { %v721_v30 = vpop.f32.mrf.mxu2 }
 0x185   : > { %v748_v33 = vpack.c.bf16 %v721_v30, %v721_v30 }
 0x187   : > { %v836_v37 = vunpack.c.l.b16 %v748_v33 }
 0x189   : > { %v847_v40 = vpack.c.b16 %v836_v37, %v835_v36 }
 0x18b   : > { %859 = vrot.lane.b32.xlu0 %v847_v40, %s4078_s17 }
 0x18c   : > { %v724_v44 = vpop.f32.mrf.mxu2 }
 0x18d   : > { %v749_v49 = vpack.c.bf16 %v724_v44, %v724_v44 }
 0x18f   : > { %v837_v54 = vunpack.c.l.b16 %v749_v49 }
 0x193   : > { %807 = vrot.lane.b32.xlu0 %v793_v47, %s4077_s16 }
 0x194   : > { %v726_v50 = vpop.f32.mrf.mxu2 }
 0x195   : > { %v750_v51 = vpack.c.bf16 %v726_v50, %v726_v50 }
 0x197   : > { %v838_v55 = vunpack.c.l.b16 %v750_v51 }
 0x199   : > { %v848_v56 = vpack.c.b16 %v838_v55, %v837_v54 }
 0x19b   : > { %861 = vrot.lane.b32.xlu2 %v848_v56, %s4078_s17 }
 0x19c   : > { %v729_v59 = vpop.f32.mrf.mxu2 }
 0x19d   : > { %v751_v61 = vpack.c.bf16 %v729_v59, %v729_v59 }
 0x19f   : > { %v839_v21 = vunpack.c.l.b16 %v751_v61 }
 0x1a3   : > { %809 = vrot.lane.b32.xlu2 %v794_v24, %s4077_s16 }
 0x1a4   : > { %v731_v63 = vpop.f32.mrf.mxu2 }
 0x1a5   : > { %v752_v18 = vpack.c.bf16 %v731_v63, %v731_v63 }
 0x1a7   : > { %v840_v23 = vunpack.c.l.b16 %v752_v18 }
 0x1a9   : > { %v849_v26 = vpack.c.b16 %v840_v23, %v839_v21 }
 0x1ab   : > { %863 = vrot.lane.b32.xlu1 %v849_v26, %s4078_s17 }
 0x1ac   : > { %v734_v27 = vpop.f32.mrf.mxu2 }
 0x1ad   : > { %v753_v29 = vpack.c.bf16 %v734_v27, %v734_v27 }
 0x1af   : > { %v841_v34 = vunpack.c.l.b16 %v753_v29 }
 0x1b4   : > { %v736_v30 = vpop.f32.mrf.mxu2 }
 0x1b5   : > { %v754_v33 = vpack.c.bf16 %v736_v30, %v736_v30 }
 0x1b7   : > { %v842_v36 = vunpack.c.l.b16 %v754_v33 }
 0x1b9   : > { %v850_v37 = vpack.c.b16 %v842_v36, %v841_v34  ;;  %v3991_v36 = vld [vmem:[%s5294_s3] ss:$0 sm:$0xff] }
 0x1bb   : > { %865 = vrot.lane.b32.xlu0 %v850_v37, %s4078_s17 }
 0x1bd   : > { %v852_v39 = vpop.permute.xlu0 %851 }
 0x1be   : > { %v894_v40 = vsel %vm892_vm1, %v870_v38, %v852_v39 }
 0x1bf   : > { %3740 = vmatmul.msk.bf16.vlgmr.msra.gmra.mxu3 %vm961_vm2, %v894_v40 }
 0x1c5   : > { %v856_v47 = vpop.permute.xlu2 %855  ;;  %v802_v49 = vpop.permute.xlu0 %801 }
 0x1c6   : > { %v898_v16 = vsel %vm892_vm1, %v876_v48, %v856_v47  ;;  %v879_v50 = vsel %vm867_vm0, %v4221_v13, %v802_v49 }
 0x1cd   : > { %v854_v43 = vpop.permute.xlu1 %853  ;;  %v804_v52 = vpop.permute.xlu2 %803 }
 0x1ce   : > { %v896_v44 = vsel %vm892_vm1, %v873_v42, %v854_v43  ;;  %v882_v54 = vsel %vm867_vm0, %v4218_v12, %v804_v52 }
 0x1cf   : > { %3741 = vmatmul.msk.bf16.gmra.mxu3 %vm961_vm2, %v896_v44 }
 0x1df   : > { %3742 = vmatmul.msk.bf16.gmra.mxu3 %vm961_vm2, %v898_v16 }
 0x1ed   : > { %v858_v51 = vpop.permute.xlu1 %857 }
 0x1ee   : > { %v900_v15 = vsel %vm892_vm1, %v879_v50, %v858_v51 }
 0x1ef   : > { %3743 = vmatmul.msk.bf16.gmra.mxu3 %vm961_vm2, %v900_v15 }
 0x1f5   : > { %v806_v56 = vpop.permute.xlu1 %805  ;;  %v862_v57 = vpop.permute.xlu2 %861 }
 0x1f6   : > { %v885_v58 = vsel %vm867_vm0, %v4212_v11, %v806_v56 }
 0x1f7   : > { %v904_v13 = vsel %vm892_vm1, %v885_v58, %v862_v57 }
 0x1fd   : > { %v860_v55 = vpop.permute.xlu0 %859  ;;  %v810_v62 = vpop.permute.xlu2 %809 }
 0x1fe   : > { %v902_v14 = vsel %vm892_vm1, %v882_v54, %v860_v55  ;;  %v891_v63 = vsel %vm867_vm0, %v4205_v9, %v810_v62 }
 0x1ff   : > { %3744 = vmatmul.msk.bf16.gmra.mxu3 %vm961_vm2, %v902_v14 }
 0x205   : > { %v808_v59 = vpop.permute.xlu0 %807 }
 0x206   : > { %v888_v60 = vsel %vm867_vm0, %v4208_v10, %v808_v59 }
 0x20f   : > { %3745 = vmatmul.msk.bf16.gmra.mxu3 %vm961_vm2, %v904_v13 }
 0x21d   : > { %v864_v61 = vpop.permute.xlu1 %863 }
 0x21e   : > { %v906_v12 = vsel %vm892_vm1, %v888_v60, %v864_v61 }
 0x21f   : > { %3746 = vmatmul.msk.bf16.gmra.mxu3 %vm961_vm2, %v906_v12 }
 0x22d   : > { %v866_v0 = vpop.permute.xlu0 %865 }
 0x22e   : > { %v908_v11 = vsel %vm892_vm1, %v891_v63, %v866_v0 }
 0x22f   : > { %3747 = vmatmul.msk.bf16.gmra.mxu3 %vm961_vm2, %v908_v11 }
 0x242   : > { %v4339_v17 = vpop.f32.mrf.mxu3 }
 0x24a   : > { %v4341_v18 = vpop.f32.mrf.mxu3 }
 0x252   : > { %v992_v20 = vpop.f32.mrf.mxu3 }
 0x25a   : > { %v994_v10 = vpop.f32.mrf.mxu3 }
 0x262   : > { %v997_v21 = vpop.f32.mrf.mxu3 }
 0x26a   : > { %v999_v23 = vpop.f32.mrf.mxu3 }
 0x26b   : > { %v1000_v0 = vadd.f32 %v3991_v36, %v999_v23  ;;  %v993_v23 = vadd.f32 %v3991_v36, %v992_v20 }
 0x272   : > { %v1002_v24 = vpop.f32.mrf.mxu3 }
 0x273   : > { %v1003_v61 = vadd.f32 %v3991_v36, %v1002_v24  ;;  %v995_v24 = vadd.f32 %v3991_v36, %v994_v10  ;;  %v988_v10 = vadd.f32 %v3991_v36, %v4339_v17 }
 0x27a   : > { %v1004_v26 = vpop.f32.mrf.mxu3 }
 0x27b   : > { %v1005_v57 = vadd.f32 %v3991_v36, %v1004_v26  ;;  %v998_v26 = vadd.f32 %v3991_v36, %v997_v21  ;;  %v990_v21 = vadd.f32 %v3991_v36, %v4341_v18  ;;  %v1027_v18 = vmax.f32 %v988_v10, 0.0 }
 0x27d   : > { %v1034_v11 = vmax.f32 %v1005_v57, 0.0  ;;  %v1028_v20 = vmax.f32 %v990_v21, 0.0 }
 0x27f   : > { %v1044_v17 = vpack.c.bf16 %v1028_v20, %v1028_v20 }
 0x281   : > { %v1076_v57 = vunpack.c.l.b16 %v1044_v17 }
 0x282   : > { %v1007_v27 = vpop.f32.mrf.mxu3 }
 0x283   : > { %v1008_v52 = vadd.f32 %v3991_v36, %v1007_v27 }
 0x285   : > { %v1035_v12 = vmax.f32 %v1008_v52, 0.0 }
 0x28a   : > { %v1009_v29 = vpop.f32.mrf.mxu3 }
 0x28b   : > { %v1010_v49 = vadd.f32 %v3991_v36, %v1009_v29 }
 0x28d   : > { %v1036_v58 = vmax.f32 %v1010_v49, 0.0 }
 0x28f   : > { %v1052_v27 = vpack.c.bf16 %v1036_v58, %v1036_v58 }
 0x292   : > { %v1012_v30 = vpop.f32.mrf.mxu3 }
 0x293   : > { %v1013_v46 = vadd.f32 %v3991_v36, %v1012_v30 }
 0x295   : > { %v1037_v54 = vmax.f32 %v1013_v46, 0.0 }
 0x297   : > { %v1053_v62 = vpack.c.bf16 %v1037_v54, %v1037_v54 }
 0x29a   : > { %v1014_v32 = vpop.f32.mrf.mxu3 }
 0x29b   : > { %v1015_v42 = vadd.f32 %v3991_v36, %v1014_v32  ;;  %v1033_v32 = vmax.f32 %v1003_v61, 0.0 }
 0x29d   : > { %v1038_v50 = vmax.f32 %v1015_v42, 0.0 }
 0x29f   : > { %v1054_v13 = vpack.c.bf16 %v1038_v50, %v1038_v50 }
 0x2a1   : > { %v1086_v29 = vunpack.c.l.b16 %v1054_v13 }
 0x2a2   : > { %v1017_v9 = vpop.f32.mrf.mxu3 }
 0x2a3   : > { %v1018_v39 = vadd.f32 %v3991_v36, %v1017_v9  ;;  %v1051_v9 = vpack.c.bf16 %v1035_v12, %v1035_v12 }
 0x2a5   : > { %v1039_v47 = vmax.f32 %v1018_v39, 0.0  ;;  %v1083_v42 = vunpack.c.l.b16 %v1051_v9 }
 0x2a7   : > { %v1055_v55 = vpack.c.bf16 %v1039_v47, %v1039_v47 }
 0x2a9   : > { %v1087_v63 = vunpack.c.l.b16 %v1055_v55 }
 0x2aa   : > { %v1019_v33 = vpop.f32.mrf.mxu3 }
 0x2ab   : > { %v1020_v38 = vadd.f32 %v3991_v36, %v1019_v33  ;;  %v1085_v33 = vunpack.c.l.b16 %v1053_v62 }
 0x2ad   : > { %v1040_v43 = vmax.f32 %v1020_v38, 0.0  ;;  %v1084_v38 = vunpack.c.l.b16 %v1052_v27  ;;  %v4354_v39 = vpack.c.b16 %v1086_v29, %v1085_v33 }
 0x2af   : > { %v1056_v51 = vpack.c.bf16 %v1040_v43, %v1040_v43  ;;  %v1030_v43 = vmax.f32 %v995_v24, 0.0  ;;  %v4359_v47 = vpack.c.b16 %v1084_v38, %v1083_v42 }
 0x2b1   : > { %v1088_v59 = vunpack.c.l.b16 %v1056_v51  ;;  %v1046_v50 = vpack.c.bf16 %v1030_v43, %v1030_v43 }
 0x2b2   : > { %v1022_v34 = vpop.f32.mrf.mxu3 }
 0x2b3   : > { %v1023_v37 = vadd.f32 %v3991_v36, %v1022_v34  ;;  %v4350_v30 = vpack.c.b16 %v1088_v59, %v1087_v63  ;;  %v1032_v34 = vmax.f32 %v1000_v0, 0.0 }
 0x2b5   : > { %v1041_v40 = vmax.f32 %v1023_v37, 0.0  ;;  %v1050_v37 = vpack.c.bf16 %v1034_v11, %v1034_v11 }
 0x2b7   : > { %v1057_v48 = vpack.c.bf16 %v1041_v40, %v1041_v40  ;;  %v1031_v40 = vmax.f32 %v998_v26, 0.0  ;;  %v1082_v46 = vunpack.c.l.b16 %v1050_v37 }
 0x2b9   : > { %v1089_v14 = vunpack.c.l.b16 %v1057_v48  ;;  %v1029_v48 = vmax.f32 %v993_v23, 0.0 }
 0x2ba   : > { %v1024_v41 = vpop.f32.mrf.mxu3 }
 0x2bb   : > { %v1025_v44 = vadd.f32 %v3991_v36, %v1024_v41  ;;  %v1049_v41 = vpack.c.bf16 %v1033_v32, %v1033_v32  ;;  %v1045_v52 = vpack.c.bf16 %v1029_v48, %v1029_v48  ;;  %v1078_v36 = vunpack.c.l.b16 %v1046_v50 }
 0x2bd   : > { %v1042_v16 = vmax.f32 %v1025_v44, 0.0  ;;  %v1048_v44 = vpack.c.bf16 %v1032_v34, %v1032_v34  ;;  %v1081_v49 = vunpack.c.l.b16 %v1049_v41 }
 0x2bf   : > { %v1058_v15 = vpack.c.bf16 %v1042_v16, %v1042_v16  ;;  %v1047_v16 = vpack.c.bf16 %v1031_v40, %v1031_v40  ;;  %v1080_v51 = vunpack.c.l.b16 %v1048_v44 }
 0x2c1   : > { %v1090_v56 = vunpack.c.l.b16 %v1058_v15  ;;  %v4364_v15 = vpack.c.b16 %v1082_v46, %v1081_v49  ;;  %v1079_v54 = vunpack.c.l.b16 %v1047_v16 }
 0x2c3   : > { %v4346_v60 = vpack.c.b16 %v1090_v56, %v1089_v14  ;;  %v4368_v55 = vpack.c.b16 %v1080_v51, %v1079_v54  ;;  %v1043_v14 = vpack.c.bf16 %v1027_v18, %v1027_v18  ;;  %v1077_v56 = vunpack.c.l.b16 %v1045_v52 }
 0x2c5   : > { %1107 = vmatpush.bf16.msrb.mxu3 %v4346_v60  ;;  %1172 = vmatpush.bf16.msrb.mxu0 %v4346_v60  ;;  %v4372_v58 = vpack.c.b16 %v1078_v36, %v1077_v56  ;;  %v1075_v13 = vunpack.c.l.b16 %v1043_v14 }
 0x2c7   : > { %v4376_v59 = vpack.c.b16 %v1076_v57, %v1075_v13 }
 0x2c9   : > { %1108 = vmatpush.bf16.msrb.mxu3 %v4350_v30  ;;  %1173 = vmatpush.bf16.msrb.mxu0 %v4350_v30 }
 0x2cd   : > { %1109 = vmatpush.bf16.msrb.mxu3 %v4354_v39  ;;  %1174 = vmatpush.bf16.msrb.mxu0 %v4354_v39 }
 0x2d1   : > { %1110 = vmatpush.bf16.msrb.mxu3 %v4359_v47  ;;  %1175 = vmatpush.bf16.msrb.mxu0 %v4359_v47 }
 0x2d5   : > { %1111 = vmatpush.bf16.msrb.mxu3 %v4364_v15  ;;  %1176 = vmatpush.bf16.msrb.mxu0 %v4364_v15 }
 0x2d9   : > { %1112 = vmatpush.bf16.msrb.mxu3 %v4368_v55  ;;  %1177 = vmatpush.bf16.msrb.mxu0 %v4368_v55 }
 0x2dd   : > { %1113 = vmatpush.bf16.msrb.mxu3 %v4372_v58  ;;  %1178 = vmatpush.bf16.msrb.mxu0 %v4372_v58 }
 0x2e1   : > { %1114 = vmatpush.bf16.msrb.mxu3 %v4376_v59  ;;  %1179 = vmatpush.bf16.msrb.mxu0 %v4376_v59 }
 0x2e4   : > { %1115 = vmatmul.bf16.vlgmr.msrb.gmra.mxu3 %v4194_v8  ;;  %1180 = vmatmul.bf16.vlgmr.msrb.gmra.mxu0 %v4245_v19 }
 0x2f4   : > { %1120 = vmatmul.bf16.gmra.mxu3 %v4190_v7  ;;  %1185 = vmatmul.bf16.gmra.mxu0 %v4249_v22  ;;  %v3952_v7 = vld [vmem:[%s5295_s4 + $0x58] sm:$0xff] }
 0x2f5   : > { %1542 = vmatpush.bf16.msrb.mxu2 %v3952_v7 }
 0x304   : > { %1125 = vmatmul.bf16.gmra.mxu3 %v4186_v6  ;;  %1190 = vmatmul.bf16.gmra.mxu0 %v4253_v25  ;;  %v3951_v6 = vld [vmem:[%s5295_s4 + $0x50] sm:$0xff] }
 0x305   : > { %1543 = vmatpush.bf16.msrb.mxu2 %v3951_v6 }
 0x314   : > { %1130 = vmatmul.bf16.gmra.mxu3 %v4182_v5  ;;  %1195 = vmatmul.bf16.gmra.mxu0 %v4257_v28 }
 0x324   : > { %1135 = vmatmul.bf16.gmra.mxu3 %v4178_v4  ;;  %1200 = vmatmul.bf16.gmra.mxu0 %v4261_v31  ;;  %v3949_v4 = vld [vmem:[%s5295_s4 + $0x40] sm:$0xff] }
 0x334   : > { %1140 = vmatmul.bf16.gmra.mxu3 %v4174_v3  ;;  %1205 = vmatmul.bf16.gmra.mxu0 %v4264_v35  ;;  %v3950_v3 = vld [vmem:[%s5295_s4 + $0x48] sm:$0xff] }
 0x335   : > { %1544 = vmatpush.bf16.msrb.mxu2 %v3950_v3 }
 0x339   : > { %1545 = vmatpush.bf16.msrb.mxu2 %v3949_v4 }
 0x344   : > { %1145 = vmatmul.bf16.gmra.mxu3 %v4170_v2  ;;  %1210 = vmatmul.bf16.gmra.mxu0 %v4268_v45 }
 0x354   : > { %1150 = vmatmul.bf16.gmra.mxu3 %v4166_v1  ;;  %1215 = vmatmul.bf16.gmra.mxu0 %v4271_v53 }
 0x361   : > { %v1181_v5 = vpop.f32.mrf.mxu0 }
 0x362   : > { %v1221_v2 = vpack.c.bf16 %v1181_v5, %v1181_v5 }
 0x364   : > { %v1309_v62 = vunpack.c.l.b16 %v1221_v2 }
 0x367   : > { %v1116_v8 = vpop.f32.mrf.mxu3 }
 0x368   : > { %v1156_v0 = vpack.c.bf16 %v1116_v8, %v1116_v8 }
 0x369   : > { %v1183_v61 = vpop.f32.mrf.mxu0 }
 0x36a   : > { %v1222_v12 = vpack.c.bf16 %v1183_v61, %v1183_v61  ;;  %v1253_v32 = vunpack.c.l.b16 %v1156_v0 }
 0x36c   : > { %v1310_v63 = vunpack.c.l.b16 %v1222_v12 }
 0x36e   : > { %v1325_v11 = vpack.c.b16 %v1310_v63, %v1309_v62 }
 0x36f   : > { %v1118_v27 = vpop.f32.mrf.mxu3 }
 0x370   : > { %v1157_v29 = vpack.c.bf16 %v1118_v27, %v1118_v27  ;;  %3796 = vmatmul.msk.bf16.vlgmr.msrb.gmra.mxu2 %vm892_vm1, %v1325_v11 }
 0x371   : > { %v1186_v26 = vpop.f32.mrf.mxu0 }
 0x372   : > { %v1254_v9 = vunpack.c.l.b16 %v1157_v29  ;;  %v1223_v24 = vpack.c.bf16 %v1186_v26, %v1186_v26 }
 0x374   : > { %v1269_v33 = vpack.c.b16 %v1254_v9, %v1253_v32  ;;  %v1311_v38 = vunpack.c.l.b16 %v1223_v24  ;;  %v3948_v32 = vld [vmem:[%s5295_s4 + $0x38] sm:$0xff]  ;;  %v3947_v24 = vld [vmem:[%s5295_s4 + $0x30] sm:$0xff] }
 0x375   : > { %1489 = vmatpush.bf16.msrb.mxu1 %v3948_v32 }
 0x376   : > { %1277 = vrot.lane.b32.xlu1 %v1269_v33, %s4078_s17 }
 0x377   : > { %v1121_v1 = vpop.f32.mrf.mxu3 }
 0x378   : > { %v1158_v40 = vpack.c.bf16 %v1121_v1, %v1121_v1 }
 0x379   : > { %v1188_v34 = vpop.f32.mrf.mxu0  ;;  %1490 = vmatpush.bf16.msrb.mxu1 %v3947_v24 }
 0x37a   : > { %v1224_v37 = vpack.c.bf16 %v1188_v34, %v1188_v34  ;;  %v1255_v44 = vunpack.c.l.b16 %v1158_v40 }
 0x37c   : > { %v1312_v23 = vunpack.c.l.b16 %v1224_v37 }
 0x37e   : > { %v1326_v41 = vpack.c.b16 %v1312_v23, %v1311_v38 }
 0x37f   : > { %v1123_v42 = vpop.f32.mrf.mxu3 }
 0x380   : > { %v1159_v21 = vpack.c.bf16 %v1123_v42, %v1123_v42  ;;  %3797 = vmatmul.msk.bf16.gmra.mxu2 %vm892_vm1, %v1326_v41  ;;  %v3946_v41 = vld [vmem:[%s5295_s4 + $0x28] sm:$0xff] }
 0x381   : > { %v1191_v43 = vpop.f32.mrf.mxu0  ;;  %1491 = vmatpush.bf16.msrb.mxu1 %v3946_v41 }
 0x382   : > { %v1256_v46 = vunpack.c.l.b16 %v1159_v21  ;;  %v1225_v16 = vpack.c.bf16 %v1191_v43, %v1191_v43 }
 0x384   : > { %v1270_v10 = vpack.c.b16 %v1256_v46, %v1255_v44  ;;  %v1313_v50 = vunpack.c.l.b16 %v1225_v16  ;;  %v3945_v44 = vld [vmem:[%s5295_s4 + $0x20] sm:$0xff]  ;;  %v3944_v16 = vld [vmem:[%s5295_s4 + $0x18] sm:$0xff] }
 0x385   : > { %1492 = vmatpush.bf16.msrb.mxu1 %v3945_v44 }
 0x386   : > { %1279 = vrot.lane.b32.xlu2 %v1270_v10, %s4078_s17 }
 0x387   : > { %v1126_v48 = vpop.f32.mrf.mxu3 }
 0x388   : > { %v1160_v18 = vpack.c.bf16 %v1126_v48, %v1126_v48 }
 0x389   : > { %v1193_v49 = vpop.f32.mrf.mxu0  ;;  %1493 = vmatpush.bf16.msrb.mxu1 %v3944_v16 }
 0x38a   : > { %v1226_v20 = vpack.c.bf16 %v1193_v49, %v1193_v49  ;;  %v1257_v14 = vunpack.c.l.b16 %v1160_v18 }
 0x38c   : > { %v1314_v51 = vunpack.c.l.b16 %v1226_v20 }
 0x38e   : > { %v1327_v52 = vpack.c.b16 %v1314_v51, %v1313_v50  ;;  %v3943_v51 = vld [vmem:[%s5295_s4 + $0x10] sm:$0xff] }
 0x38f   : > { %v1128_v54 = vpop.f32.mrf.mxu3  ;;  %1494 = vmatpush.bf16.msrb.mxu1 %v3943_v51 }
 0x390   : > { %v1161_v17 = vpack.c.bf16 %v1128_v54, %v1128_v54  ;;  %3798 = vmatmul.msk.bf16.gmra.mxu2 %vm892_vm1, %v1327_v52 }
 0x391   : > { %v1196_v36 = vpop.f32.mrf.mxu0 }
 0x392   : > { %v1258_v56 = vunpack.c.l.b16 %v1161_v17  ;;  %v1227_v7 = vpack.c.bf16 %v1196_v36, %v1196_v36 }
 0x394   : > { %v1271_v57 = vpack.c.b16 %v1258_v56, %v1257_v14  ;;  %v1315_v4 = vunpack.c.l.b16 %v1227_v7  ;;  %v3942_v14 = vld [vmem:[%s5295_s4 + $0x8] sm:$0xff]  ;;  %v3941_v7 = vld [vmem:[%s5295_s4] sm:$0xff] }
 0x395   : > { %1495 = vmatpush.bf16.msrb.mxu1 %v3942_v14 }
 0x396   : > { %1281 = vrot.lane.b32.xlu0 %v1271_v57, %s4078_s17 }
 0x397   : > { %v1131_v13 = vpop.f32.mrf.mxu3 }
 0x398   : > { %v1162_v8 = vpack.c.bf16 %v1131_v13, %v1131_v13 }
 0x399   : > { %v1198_v6 = vpop.f32.mrf.mxu0  ;;  %1496 = vmatpush.bf16.msrb.mxu1 %v3941_v7 }
 0x39a   : > { %v1228_v3 = vpack.c.bf16 %v1198_v6, %v1198_v6  ;;  %v1259_v63 = vunpack.c.l.b16 %v1162_v8 }
 0x39c   : > { %v1316_v5 = vunpack.c.l.b16 %v1228_v3 }
 0x39e   : > { %v1328_v2 = vpack.c.b16 %v1316_v5, %v1315_v4 }
 0x39f   : > { %v1133_v61 = vpop.f32.mrf.mxu3 }
 0x3a0   : > { %v1163_v12 = vpack.c.bf16 %v1133_v61, %v1133_v61  ;;  %3799 = vmatmul.msk.bf16.gmra.mxu2 %vm892_vm1, %v1328_v2 }
 0x3a1   : > { %v1201_v62 = vpop.f32.mrf.mxu0 }
 0x3a2   : > { %v1260_v0 = vunpack.c.l.b16 %v1163_v12  ;;  %v1229_v29 = vpack.c.bf16 %v1201_v62, %v1201_v62 }
 0x3a4   : > { %v1272_v11 = vpack.c.b16 %v1260_v0, %v1259_v63  ;;  %v1317_v33 = vunpack.c.l.b16 %v1229_v29 }
 0x3a6   : > { %1283 = vrot.lane.b32.xlu1 %v1272_v11, %s4078_s17 }
 0x3a7   : > { %v1136_v27 = vpop.f32.mrf.mxu3 }
 0x3a8   : > { %v1164_v34 = vpack.c.bf16 %v1136_v27, %v1136_v27 }
 0x3a9   : > { %v1203_v26 = vpop.f32.mrf.mxu0 }
 0x3aa   : > { %v1230_v9 = vpack.c.bf16 %v1203_v26, %v1203_v26  ;;  %v1261_v42 = vunpack.c.l.b16 %v1164_v34 }
 0x3ac   : > { %v1318_v1 = vunpack.c.l.b16 %v1230_v9 }
 0x3ae   : > { %v1329_v37 = vpack.c.b16 %v1318_v1, %v1317_v33 }
 0x3af   : > { %v1138_v38 = vpop.f32.mrf.mxu3 }
 0x3b0   : > { %v1165_v23 = vpack.c.bf16 %v1138_v38, %v1138_v38  ;;  %3800 = vmatmul.msk.bf16.gmra.mxu2 %vm892_vm1, %v1329_v37 }
 0x3b1   : > { %v1206_v40 = vpop.f32.mrf.mxu0 }
 0x3b2   : > { %v1262_v21 = vunpack.c.l.b16 %v1165_v23  ;;  %v1231_v10 = vpack.c.bf16 %v1206_v40, %v1206_v40 }
 0x3b4   : > { %v1273_v43 = vpack.c.b16 %v1262_v21, %v1261_v42  ;;  %v1319_v20 = vunpack.c.l.b16 %v1231_v10 }
 0x3b6   : > { %1285 = vrot.lane.b32.xlu2 %v1273_v43, %s4078_s17 }
 0x3b7   : > { %v1141_v46 = vpop.f32.mrf.mxu3 }
 0x3b8   : > { %v1166_v18 = vpack.c.bf16 %v1141_v46, %v1141_v46 }
 0x3b9   : > { %v1208_v48 = vpop.f32.mrf.mxu0 }
 0x3ba   : > { %v1232_v49 = vpack.c.bf16 %v1208_v48, %v1208_v48  ;;  %v1263_v56 = vunpack.c.l.b16 %v1166_v18 }
 0x3bc   : > { %v1320_v50 = vunpack.c.l.b16 %v1232_v49 }
 0x3be   : > { %v1330_v52 = vpack.c.b16 %v1320_v50, %v1319_v20 }
 0x3bf   : > { %v1143_v54 = vpop.f32.mrf.mxu3 }
 0x3c0   : > { %v1167_v17 = vpack.c.bf16 %v1143_v54, %v1143_v54  ;;  %3801 = vmatmul.msk.bf16.gmra.mxu2 %vm892_vm1, %v1330_v52 }
 0x3c1   : > { %v1211_v36 = vpop.f32.mrf.mxu0 }
 0x3c2   : > { %v1264_v57 = vunpack.c.l.b16 %v1167_v17  ;;  %v1233_v3 = vpack.c.bf16 %v1211_v36, %v1211_v36 }
 0x3c4   : > { %v1274_v13 = vpack.c.b16 %v1264_v57, %v1263_v56  ;;  %v1321_v8 = vunpack.c.l.b16 %v1233_v3 }
 0x3c6   : > { %1287 = vrot.lane.b32.xlu0 %v1274_v13, %s4078_s17 }
 0x3c7   : > { %v1146_v6 = vpop.f32.mrf.mxu3 }
 0x3c8   : > { %v1168_v61 = vpack.c.bf16 %v1146_v6, %v1146_v6 }
 0x3c9   : > { %v1213_v4 = vpop.f32.mrf.mxu0 }
 0x3ca   : > { %v1234_v5 = vpack.c.bf16 %v1213_v4, %v1213_v4  ;;  %v1265_v11 = vunpack.c.l.b16 %v1168_v61 }
 0x3cc   : > { %v1322_v2 = vunpack.c.l.b16 %v1234_v5 }
 0x3ce   : > { %v1331_v12 = vpack.c.b16 %v1322_v2, %v1321_v8  ;;  %v4487_v2 = vld [vmem:[%s5296_s5] ss:$0 sm:$0xff] }
 0x3cf   : > { %v1148_v62 = vpop.f32.mrf.mxu3 }
 0x3d0   : > { %v1169_v63 = vpack.c.bf16 %v1148_v62, %v1148_v62  ;;  %3802 = vmatmul.msk.bf16.gmra.mxu2 %vm892_vm1, %v1331_v12 }
 0x3d1   : > { %v1216_v0 = vpop.f32.mrf.mxu0 }
 0x3d2   : > { %v1266_v27 = vunpack.c.l.b16 %v1169_v63  ;;  %v1235_v32 = vpack.c.bf16 %v1216_v0, %v1216_v0 }
 0x3d4   : > { %v1275_v29 = vpack.c.b16 %v1266_v27, %v1265_v11  ;;  %v1323_v1 = vunpack.c.l.b16 %v1235_v32 }
 0x3d6   : > { %1289 = vrot.lane.b32.xlu1 %v1275_v29, %s4078_s17 }
 0x3d7   : > { %v1151_v26 = vpop.f32.mrf.mxu3 }
 0x3d8   : > { %v1170_v24 = vpack.c.bf16 %v1151_v26, %v1151_v26 }
 0x3d9   : > { %v1218_v9 = vpop.f32.mrf.mxu0 }
 0x3da   : > { %v1236_v33 = vpack.c.bf16 %v1218_v9, %v1218_v9  ;;  %v1267_v23 = vunpack.c.l.b16 %v1170_v24 }
 0x3dc   : > { %v1324_v34 = vunpack.c.l.b16 %v1236_v33 }
 0x3de   : > { %v1332_v37 = vpack.c.b16 %v1324_v34, %v1323_v1 }
 0x3df   : > { %v1153_v38 = vpop.f32.mrf.mxu3 }
 0x3e0   : > { %v1171_v40 = vpack.c.bf16 %v1153_v38, %v1153_v38  ;;  %3803 = vmatmul.msk.bf16.gmra.mxu2 %vm892_vm1, %v1332_v37  ;;  %v1280_v44 = vpop.permute.xlu2 %1279 }
 0x3e1   : > { %v1339_v46 = vsel %vm892_vm1, %v4372_v58, %v1280_v44 }
 0x3e2   : > { %v1268_v41 = vunpack.c.l.b16 %v1171_v40 }
 0x3e4   : > { %v1276_v42 = vpack.c.b16 %v1268_v41, %v1267_v23 }
 0x3e6   : > { %1291 = vrot.lane.b32.xlu2 %v1276_v42, %s4078_s17 }
 0x3e8   : > { %v1278_v21 = vpop.permute.xlu1 %1277 }
 0x3e9   : > { %v1335_v43 = vsel %vm892_vm1, %v4376_v59, %v1278_v21 }
 0x3ea   : > { %1497 = vmatmul.bf16.vlgmr.msrb.gmra.mxu1 %v1335_v43 }
 0x3f3   : > { %v4462_v18 = vpop.f32.mrf.mxu2 }
 0x3fa   : > { %1502 = vmatmul.bf16.gmra.mxu1 %v1339_v46 }
 0x3fb   : > { %v4464_v52 = vpop.f32.mrf.mxu2 }
 0x408   : > { %v1282_v10 = vpop.permute.xlu0 %1281 }
 0x409   : > { %v1343_v48 = vsel %vm892_vm1, %v4368_v55, %v1282_v10 }
 0x40a   : > { %1507 = vmatmul.bf16.gmra.mxu1 %v1343_v48 }
 0x410   : > { %v1286_v20 = vpop.permute.xlu2 %1285 }
 0x411   : > { %v1351_v59 = vsel %vm892_vm1, %v4359_v47, %v1286_v20  ;;  %v4468_v47 = vpop.f32.mrf.mxu2 }
 0x418   : > { %v1284_v16 = vpop.permute.xlu1 %1283 }
 0x419   : > { %v1347_v49 = vsel %vm892_vm1, %v4364_v15, %v1284_v16 }
 0x41a   : > { %1512 = vmatmul.bf16.gmra.mxu1 %v1347_v49 }
 0x42a   : > { %1517 = vmatmul.bf16.gmra.mxu1 %v1351_v59 }
 0x438   : > { %v1288_v50 = vpop.permute.xlu0 %1287 }
 0x439   : > { %v1355_v58 = vsel %vm892_vm1, %v4354_v39, %v1288_v50  ;;  %v4472_v39 = vpop.f32.mrf.mxu2 }
 0x43a   : > { %1522 = vmatmul.bf16.gmra.mxu1 %v1355_v58 }
 0x440   : > { %v1292_v15 = vpop.permute.xlu2 %1291 }
 0x441   : > { %v1363_v54 = vsel %vm892_vm1, %v4346_v60, %v1292_v15  ;;  %v4476_v14 = vpop.f32.mrf.mxu2 }
 0x448   : > { %v1290_v51 = vpop.permute.xlu1 %1289 }
 0x449   : > { %v1359_v55 = vsel %vm892_vm1, %v4350_v30, %v1290_v51  ;;  %v4480_v56 = vpop.f32.mrf.mxu2 }
 0x44a   : > { %1527 = vmatmul.bf16.gmra.mxu1 %v1359_v55 }
 0x451   : > { %v1562_v13 = vpop.f32.mrf.mxu2 }
 0x459   : > { %v1564_v6 = vpop.f32.mrf.mxu2 }
 0x45a   : > { %1532 = vmatmul.bf16.gmra.mxu1 %v1363_v54 }
 0x461   : > { %v1567_v4 = vpop.f32.mrf.mxu2 }
 0x467   : > { %v4470_v17 = vpop.f32.mrf.mxu1 }
 0x469   : > { %v1569_v8 = vpop.f32.mrf.mxu2 }
 0x46f   : > { %v4474_v36 = vpop.f32.mrf.mxu1 }
 0x471   : > { %v1572_v63 = vpop.f32.mrf.mxu2 }
 0x477   : > { %v4478_v30 = vpop.f32.mrf.mxu1 }
 0x479   : > { %v1574_v27 = vpop.f32.mrf.mxu2 }
 0x47f   : > { %v4482_v57 = vpop.f32.mrf.mxu1 }
 0x481   : > { %v1577_v26 = vpop.f32.mrf.mxu2 }
 0x487   : > { %v1508_v7 = vpop.f32.mrf.mxu1 }
 0x489   : > { %v1579_v9 = vpop.f32.mrf.mxu2 }
 0x48f   : > { %v1510_v60 = vpop.f32.mrf.mxu1 }
 0x491   : > { %v1582_v1 = vpop.f32.mrf.mxu2 }
 0x497   : > { %v1513_v3 = vpop.f32.mrf.mxu1 }
 0x499   : > { %v1584_v10 = vpop.f32.mrf.mxu2 }
 0x49f   : > { %v1515_v5 = vpop.f32.mrf.mxu1 }
 0x4a0   : > { %v1516_v55 = vadd.f32 %v4487_v2, %v1515_v5  ;;  %v1509_v5 = vadd.f32 %v4487_v2, %v1508_v7 }
 0x4a2   : > { %v1558_v7 = vadd.f32 %v4476_v14, %v1509_v5  ;;  %v1499_v14 = vadd.f32 %v4487_v2, %v4470_v17  ;;  %v4566_v5 = vld [vmem:[%s4163_s28 + $0x18] sm:$0xff] }
 0x4a7   : > { %v1518_v61 = vpop.f32.mrf.mxu1 }
 0x4a8   : > { %v1519_v12 = vadd.f32 %v4487_v2, %v1518_v61 }
 0x4aa   : > { %v4490_v62 = vadd.f32 %v1567_v4, %v1519_v12  ;;  %v1514_v12 = vadd.f32 %v4487_v2, %v1513_v3 }
 0x4af   : > { %v1520_v0 = vpop.f32.mrf.mxu1 }
 0x4b0   : > { %v1521_v48 = vadd.f32 %v4487_v2, %v1520_v0  ;;  %v1511_v0 = vadd.f32 %v4487_v2, %v1510_v60  ;;  %v1506_v60 = vadd.f32 %v4487_v2, %v4482_v57 }
 0x4b2   : > { %v1570_v15 = vadd.f32 %v1569_v8, %v1521_v48  ;;  %v1563_v8 = vadd.f32 %v1562_v13, %v1514_v12  ;;  %v1504_v13 = vadd.f32 %v4487_v2, %v4478_v30  ;;  %v1555_v57 = vadd.f32 %v4472_v39, %v1506_v60  ;;  %v4587_v60 = vld [vmem:[%s4163_s28 + $0x30] sm:$0xff] }
 0x4b4   : > { %v1553_v30 = vadd.f32 %v4468_v47, %v1504_v13  ;;  %v1590_v39 = vmax.f32 %v1555_v57, 0.0 }
 0x4b7   : > { %v1523_v11 = vpop.f32.mrf.mxu1 }
 0x4b8   : > { %v1524_v21 = vadd.f32 %v4487_v2, %v1523_v11 }
 0x4ba   : > { %v1573_v59 = vadd.f32 %v1572_v63, %v1524_v21 }
 0x4bc   : > { %v1597_v11 = vmax.f32 %v1573_v59, 0.0 }
 0x4bf   : > { %v1525_v29 = vpop.f32.mrf.mxu1 }
 0x4c0   : > { %v1526_v40 = vadd.f32 %v4487_v2, %v1525_v29 }
 0x4c2   : > { %v1575_v16 = vadd.f32 %v1574_v27, %v1526_v40  ;;  %v1565_v27 = vadd.f32 %v1564_v6, %v1516_v55  ;;  %v1560_v6 = vadd.f32 %v4480_v56, %v1511_v0  ;;  %v1501_v56 = vadd.f32 %v4487_v2, %v4474_v36 }
 0x4c4   : > { %v1598_v54 = vmax.f32 %v1575_v16, 0.0  ;;  %v1594_v3 = vmax.f32 %v1565_v27, 0.0  ;;  %v1592_v21 = vmax.f32 %v1560_v6, 0.0  ;;  %v1550_v36 = vadd.f32 %v4464_v52, %v1501_v56  ;;  %v3962_v6 = vld [vmem:[%s5297_s6 + $0x48] sm:$0xff] }
 0x4c6   : > { %v1614_v63 = vpack.c.bf16 %v1598_v54, %v1598_v54  ;;  %v1588_v47 = vmax.f32 %v1550_v36, 0.0 }
 0x4c7   : > { %v1528_v32 = vpop.f32.mrf.mxu1 }
 0x4c8   : > { %v1529_v38 = vadd.f32 %v4487_v2, %v1528_v32 }
 0x4ca   : > { %v1578_v43 = vadd.f32 %v1577_v26, %v1529_v38 }
 0x4cc   : > { %v1599_v50 = vmax.f32 %v1578_v43, 0.0  ;;  %v1610_v43 = vpack.c.bf16 %v1594_v3, %v1594_v3  ;;  %v3961_v3 = vld [vmem:[%s5297_s6 + $0x40] sm:$0xff] }
 0x4ce   : > { %v1615_v29 = vpack.c.bf16 %v1599_v50, %v1599_v50  ;;  %v1548_v50 = vadd.f32 %v4462_v18, %v1499_v14  ;;  %v1604_v18 = vpack.c.bf16 %v1588_v47, %v1588_v47 }
 0x4cf   : > { %v1530_v33 = vpop.f32.mrf.mxu1 }
 0x4d0   : > { %v1531_v37 = vadd.f32 %v4487_v2, %v1530_v33  ;;  %v1587_v52 = vmax.f32 %v1548_v50, 0.0 }
 0x4d2   : > { %v1580_v41 = vadd.f32 %v1579_v9, %v1531_v37  ;;  %v1596_v9 = vmax.f32 %v1570_v15, 0.0  ;;  %v1647_v37 = vunpack.c.l.b16 %v1615_v29 }
 0x4d4   : > { %v1600_v49 = vmax.f32 %v1580_v41, 0.0  ;;  %v1612_v38 = vpack.c.bf16 %v1596_v9, %v1596_v9  ;;  %v4551_v9 = vld [vmem:[%s4163_s28] sm:$0xff] }
 0x4d6   : > { %v1616_v4 = vpack.c.bf16 %v1600_v49, %v1600_v49  ;;  %v1608_v49 = vpack.c.bf16 %v1592_v21, %v1592_v21 }
 0x4d7   : > { %v1533_v24 = vpop.f32.mrf.mxu1 }
 0x4d8   : > { %v1534_v34 = vadd.f32 %v4487_v2, %v1533_v24  ;;  %v1648_v33 = vunpack.c.l.b16 %v1616_v4  ;;  %v1595_v24 = vmax.f32 %v4490_v62, 0.0  ;;  %v1593_v62 = vmax.f32 %v1563_v8, 0.0  ;;  %v4571_v8 = vld [vmem:[%s4163_s28 + $0x20] sm:$0xff] }
 0x4d9   : > { %v1640_v55 = vunpack.c.l.b16 %v1608_v49 }
 0x4da   : > { %v1583_v23 = vadd.f32 %v1582_v1, %v1534_v34  ;;  %v1613_v34 = vpack.c.bf16 %v1597_v11, %v1597_v11  ;;  %v4511_v40 = vpack.c.b16 %v1648_v33, %v1647_v37  ;;  %v1611_v41 = vpack.c.bf16 %v1595_v24, %v1595_v24  ;;  %v4561_v33 = vld [vmem:[%s4163_s28 + $0x10] sm:$0xff]  ;;  %v4576_v24 = vld [vmem:[%s4163_s28 + $0x28] sm:$0xff] }
 0x4db   : > { %v1609_v48 = vpack.c.bf16 %v1593_v62, %v1593_v62  ;;  %v1603_v11 = vpack.c.bf16 %v1587_v52, %v1587_v52  ;;  %v3963_v37 = vld [vmem:[%s5297_s6 + $0x50] sm:$0xff] }
 0x4dc   : > { %v1601_v44 = vmax.f32 %v1583_v23, 0.0  ;;  %v1646_v23 = vunpack.c.l.b16 %v1614_v63  ;;  %v1643_v16 = vunpack.c.l.b16 %v1611_v41  ;;  %v4556_v63 = vld [vmem:[%s4163_s28 + $0x8] sm:$0xff] }
 0x4dd   : > { %v1635_v0 = vunpack.c.l.b16 %v1603_v11 }
 0x4de   : > { %v1617_v58 = vpack.c.bf16 %v1601_v44, %v1601_v44  ;;  %v1644_v44 = vunpack.c.l.b16 %v1612_v38  ;;  %v4598_v38 = vld [vmem:[%s4163_s28 + $0x38] sm:$0xff] }
 0x4df   : > { %v1535_v42 = vpop.f32.mrf.mxu1 }
 0x4e0   : > { %v1536_v46 = vadd.f32 %v4487_v2, %v1535_v42  ;;  %v1649_v26 = vunpack.c.l.b16 %v1617_v58  ;;  %v1645_v42 = vunpack.c.l.b16 %v1613_v34  ;;  %v4529_v59 = vpack.c.b16 %v1644_v44, %v1643_v16  ;;  %v3964_v34 = vld [vmem:[%s5297_s6 + $0x58] sm:$0xff] }
 0x4e1   : > { %v1589_v58 = vmax.f32 %v1553_v30, 0.0  ;;  %v1641_v2 = vunpack.c.l.b16 %v1609_v48  ;;  %2102 = vmatpush.bf16.msra.mxu2 %v3964_v34 }
 0x4e2   : > { %v1585_v20 = vadd.f32 %v1584_v10, %v1536_v46  ;;  %v4521_v46 = vpack.c.b16 %v1646_v23, %v1645_v42  ;;  %v1591_v10 = vmax.f32 %v1558_v7, 0.0 }
 0x4e3   : > { %v1605_v54 = vpack.c.bf16 %v1589_v58, %v1589_v58 }
 0x4e4   : > { %v1602_v51 = vmax.f32 %v1585_v20, 0.0  ;;  %v1642_v20 = vunpack.c.l.b16 %v1610_v43  ;;  %v1607_v17 = vpack.c.bf16 %v1591_v10, %v1591_v10 }
 0x4e5   : > { %v1637_v29 = vunpack.c.l.b16 %v1605_v54  ;;  %2103 = vmatpush.bf16.msra.mxu2 %v3963_v37 }
 0x4e6   : > { %v1618_v61 = vpack.c.bf16 %v1602_v51, %v1602_v51  ;;  %v1606_v51 = vpack.c.bf16 %v1590_v39, %v1590_v39  ;;  %v4534_v15 = vpack.c.b16 %v1642_v20, %v1641_v2  ;;  %v1639_v4 = vunpack.c.l.b16 %v1607_v17 }
 0x4e8   : > { %v1650_v32 = vunpack.c.l.b16 %v1618_v61  ;;  %v1638_v61 = vunpack.c.l.b16 %v1606_v51  ;;  %v4538_v12 = vpack.c.b16 %v1640_v55, %v1639_v4 }
 0x4e9   : > { %2104 = vmatpush.bf16.msra.mxu2 %v3962_v6 }
 0x4ea   : > { %v4502_v1 = vpack.c.b16 %v1650_v32, %v1649_v26  ;;  %v1636_v26 = vunpack.c.l.b16 %v1604_v18  ;;  %v4542_v32 = vpack.c.b16 %v1638_v61, %v1637_v29 }
 0x4ec   : > { %1667 = vmatpush.bf16.msra.mxu3 %v4502_v1  ;;  %1732 = vmatpush.bf16.msra.mxu0 %v4502_v1  ;;  %v4546_v27 = vpack.c.b16 %v1636_v26, %v1635_v0 }
 0x4ed   : > { %2105 = vmatpush.bf16.msra.mxu2 %v3961_v3 }
 0x4f0   : > { %1668 = vmatpush.bf16.msra.mxu3 %v4511_v40  ;;  %1733 = vmatpush.bf16.msra.mxu0 %v4511_v40 }
 0x4f4   : > { %1669 = vmatpush.bf16.msra.mxu3 %v4521_v46  ;;  %1734 = vmatpush.bf16.msra.mxu0 %v4521_v46 }
 0x4f8   : > { %1670 = vmatpush.bf16.msra.mxu3 %v4529_v59  ;;  %1735 = vmatpush.bf16.msra.mxu0 %v4529_v59 }
 0x4fc   : > { %1671 = vmatpush.bf16.msra.mxu3 %v4534_v15  ;;  %1736 = vmatpush.bf16.msra.mxu0 %v4534_v15 }
 0x500   : > { %1672 = vmatpush.bf16.msra.mxu3 %v4538_v12  ;;  %1737 = vmatpush.bf16.msra.mxu0 %v4538_v12 }
 0x504   : > { %1673 = vmatpush.bf16.msra.mxu3 %v4542_v32  ;;  %1738 = vmatpush.bf16.msra.mxu0 %v4542_v32 }
 0x508   : > { %1674 = vmatpush.bf16.msra.mxu3 %v4546_v27  ;;  %1739 = vmatpush.bf16.msra.mxu0 %v4546_v27 }
 0x50b   : > { %1675 = vmatmul.bf16.vlgmr.msra.gmra.mxu3 %v4551_v9  ;;  %1740 = vmatmul.bf16.vlgmr.msra.gmra.mxu0 %v4245_v19 }
 0x51b   : > { %1680 = vmatmul.bf16.gmra.mxu3 %v4556_v63  ;;  %1745 = vmatmul.bf16.gmra.mxu0 %v4249_v22 }
 0x52b   : > { %1685 = vmatmul.bf16.gmra.mxu3 %v4561_v33  ;;  %1750 = vmatmul.bf16.gmra.mxu0 %v4253_v25 }
 0x53b   : > { %1690 = vmatmul.bf16.gmra.mxu3 %v4566_v5  ;;  %1755 = vmatmul.bf16.gmra.mxu0 %v4257_v28 }
 0x54b   : > { %1695 = vmatmul.bf16.gmra.mxu3 %v4571_v8  ;;  %1760 = vmatmul.bf16.gmra.mxu0 %v4261_v31 }
 0x55b   : > { %1700 = vmatmul.bf16.gmra.mxu3 %v4576_v24  ;;  %1765 = vmatmul.bf16.gmra.mxu0 %v4264_v35 }
 0x56b   : > { %1705 = vmatmul.bf16.gmra.mxu3 %v4587_v60  ;;  %1770 = vmatmul.bf16.gmra.mxu0 %v4268_v45 }
 0x57b   : > { %1710 = vmatmul.bf16.gmra.mxu3 %v4598_v38  ;;  %1775 = vmatmul.bf16.gmra.mxu0 %v4271_v53 }
 0x588   : > { %v1741_v23 = vpop.f32.mrf.mxu0 }
 0x589   : > { %v1781_v7 = vpack.c.bf16 %v1741_v23, %v1741_v23 }
 0x58b   : > { %v1869_v42 = vunpack.c.l.b16 %v1781_v7 }
 0x58e   : > { %v1676_v13 = vpop.f32.mrf.mxu3 }
 0x58f   : > { %v1716_v57 = vpack.c.bf16 %v1676_v13, %v1676_v13 }
 0x590   : > { %v1743_v62 = vpop.f32.mrf.mxu0 }
 0x591   : > { %v1782_v41 = vpack.c.bf16 %v1743_v62, %v1743_v62  ;;  %v1813_v30 = vunpack.c.l.b16 %v1716_v57 }
 0x593   : > { %v1870_v56 = vunpack.c.l.b16 %v1782_v41 }
 0x595   : > { %v1885_v21 = vpack.c.b16 %v1870_v56, %v1869_v42 }
 0x596   : > { %v1678_v43 = vpop.f32.mrf.mxu3 }
 0x597   : > { %v1717_v44 = vpack.c.bf16 %v1678_v43, %v1678_v43  ;;  %3852 = vmatmul.msk.bf16.vlgmr.msra.gmra.mxu2 %vm892_vm1, %v1885_v21 }
 0x598   : > { %v1746_v14 = vpop.f32.mrf.mxu0 }
 0x599   : > { %v1814_v10 = vunpack.c.l.b16 %v1717_v44  ;;  %v1783_v36 = vpack.c.bf16 %v1746_v14, %v1746_v14 }
 0x59b   : > { %v1829_v48 = vpack.c.b16 %v1814_v10, %v1813_v30  ;;  %v1871_v20 = vunpack.c.l.b16 %v1783_v36 }
 0x59d   : > { %1837 = vrot.lane.b32.xlu0 %v1829_v48, %s4078_s17 }
 0x59e   : > { %v1681_v16 = vpop.f32.mrf.mxu3 }
 0x59f   : > { %v1718_v58 = vpack.c.bf16 %v1681_v16, %v1681_v16 }
 0x5a0   : > { %v1748_v39 = vpop.f32.mrf.mxu0 }
 0x5a1   : > { %v1784_v49 = vpack.c.bf16 %v1748_v39, %v1748_v39  ;;  %v1815_v55 = vunpack.c.l.b16 %v1718_v58 }
 0x5a3   : > { %v1872_v50 = vunpack.c.l.b16 %v1784_v49 }
 0x5a5   : > { %v1886_v17 = vpack.c.b16 %v1872_v50, %v1871_v20  ;;  %v3960_v50 = vld [vmem:[%s5297_s6 + $0x38] sm:$0xff] }
 0x5a6   : > { %v1683_v2 = vpop.f32.mrf.mxu3  ;;  %2049 = vmatpush.bf16.msra.mxu1 %v3960_v50 }
 0x5a7   : > { %v1719_v47 = vpack.c.bf16 %v1683_v2, %v1683_v2  ;;  %3853 = vmatmul.msk.bf16.gmra.mxu2 %vm892_vm1, %v1886_v17 }
 0x5a8   : > { %v1751_v51 = vpop.f32.mrf.mxu0 }
 0x5a9   : > { %v1816_v52 = vunpack.c.l.b16 %v1719_v47  ;;  %v1785_v18 = vpack.c.bf16 %v1751_v51, %v1751_v51  ;;  %v3959_v47 = vld [vmem:[%s5297_s6 + $0x30] sm:$0xff] }
 0x5aa   : > { %2050 = vmatpush.bf16.msra.mxu1 %v3959_v47 }
 0x5ab   : > { %v1830_v54 = vpack.c.b16 %v1816_v52, %v1815_v55  ;;  %v1873_v29 = vunpack.c.l.b16 %v1785_v18  ;;  %v3958_v18 = vld [vmem:[%s5297_s6 + $0x28] sm:$0xff] }
 0x5ad   : > { %1839 = vrot.lane.b32.xlu1 %v1830_v54, %s4078_s17 }
 0x5ae   : > { %v1686_v4 = vpop.f32.mrf.mxu3  ;;  %2051 = vmatpush.bf16.msra.mxu1 %v3958_v18 }
 0x5af   : > { %v1720_v0 = vpack.c.bf16 %v1686_v4, %v1686_v4 }
 0x5b0   : > { %v1753_v61 = vpop.f32.mrf.mxu0 }
 0x5b1   : > { %v1786_v11 = vpack.c.bf16 %v1753_v61, %v1753_v61  ;;  %v1817_v23 = vunpack.c.l.b16 %v1720_v0 }
 0x5b3   : > { %v1874_v26 = vunpack.c.l.b16 %v1786_v11 }
 0x5b5   : > { %v1887_v34 = vpack.c.b16 %v1874_v26, %v1873_v29  ;;  %v3957_v26 = vld [vmem:[%s5297_s6 + $0x20] sm:$0xff] }
 0x5b6   : > { %v1688_v37 = vpop.f32.mrf.mxu3  ;;  %2052 = vmatpush.bf16.msra.mxu1 %v3957_v26 }
 0x5b7   : > { %v1721_v6 = vpack.c.bf16 %v1688_v37, %v1688_v37  ;;  %3854 = vmatmul.msk.bf16.gmra.mxu2 %vm892_vm1, %v1887_v34 }
 0x5b8   : > { %v1756_v3 = vpop.f32.mrf.mxu0 }
 0x5b9   : > { %v1818_v13 = vunpack.c.l.b16 %v1721_v6  ;;  %v1787_v41 = vpack.c.bf16 %v1756_v3, %v1756_v3  ;;  %v3956_v6 = vld [vmem:[%s5297_s6 + $0x18] sm:$0xff] }
 0x5ba   : > { %2053 = vmatpush.bf16.msra.mxu1 %v3956_v6 }
 0x5bb   : > { %v1831_v7 = vpack.c.b16 %v1818_v13, %v1817_v23  ;;  %v1875_v57 = vunpack.c.l.b16 %v1787_v41 }
 0x5bd   : > { %1841 = vrot.lane.b32.xlu2 %v1831_v7, %s4078_s17  ;;  %v3955_v7 = vld [vmem:[%s5297_s6 + $0x10] sm:$0xff] }
 0x5be   : > { %v1691_v62 = vpop.f32.mrf.mxu3  ;;  %2054 = vmatpush.bf16.msra.mxu1 %v3955_v7 }
 0x5bf   : > { %v1722_v43 = vpack.c.bf16 %v1691_v62, %v1691_v62 }
 0x5c0   : > { %v1758_v42 = vpop.f32.mrf.mxu0 }
 0x5c1   : > { %v1788_v56 = vpack.c.bf16 %v1758_v42, %v1758_v42  ;;  %v1819_v48 = vunpack.c.l.b16 %v1722_v43 }
 0x5c3   : > { %v1876_v21 = vunpack.c.l.b16 %v1788_v56 }
 0x5c5   : > { %v1888_v44 = vpack.c.b16 %v1876_v21, %v1875_v57  ;;  %v3954_v21 = vld [vmem:[%s5297_s6 + $0x8] sm:$0xff] }
 0x5c6   : > { %v1693_v14 = vpop.f32.mrf.mxu3  ;;  %2055 = vmatpush.bf16.msra.mxu1 %v3954_v21 }
 0x5c7   : > { %v1723_v30 = vpack.c.bf16 %v1693_v14, %v1693_v14  ;;  %3855 = vmatmul.msk.bf16.gmra.mxu2 %vm892_vm1, %v1888_v44 }
 0x5c8   : > { %v1761_v10 = vpop.f32.mrf.mxu0 }
 0x5c9   : > { %v1820_v16 = vunpack.c.l.b16 %v1723_v30  ;;  %v1789_v49 = vpack.c.bf16 %v1761_v10, %v1761_v10  ;;  %v3953_v30 = vld [vmem:[%s5297_s6] sm:$0xff] }
 0x5ca   : > { %2056 = vmatpush.bf16.msra.mxu1 %v3953_v30 }
 0x5cb   : > { %v1832_v36 = vpack.c.b16 %v1820_v16, %v1819_v48  ;;  %v1877_v17 = vunpack.c.l.b16 %v1789_v49 }
 0x5cd   : > { %1843 = vrot.lane.b32.xlu0 %v1832_v36, %s4078_s17 }
 0x5ce   : > { %v1696_v39 = vpop.f32.mrf.mxu3 }
 0x5cf   : > { %v1724_v51 = vpack.c.bf16 %v1696_v39, %v1696_v39 }
 0x5d0   : > { %v1763_v20 = vpop.f32.mrf.mxu0 }
 0x5d1   : > { %v1790_v58 = vpack.c.bf16 %v1763_v20, %v1763_v20  ;;  %v1821_v61 = vunpack.c.l.b16 %v1724_v51 }
 0x5d3   : > { %v1878_v2 = vunpack.c.l.b16 %v1790_v58 }
 0x5d5   : > { %v1889_v55 = vpack.c.b16 %v1878_v2, %v1877_v17 }
 0x5d6   : > { %v1698_v52 = vpop.f32.mrf.mxu3 }
 0x5d7   : > { %v1725_v54 = vpack.c.bf16 %v1698_v52, %v1698_v52  ;;  %3856 = vmatmul.msk.bf16.gmra.mxu2 %vm892_vm1, %v1889_v55 }
 0x5d8   : > { %v1766_v4 = vpop.f32.mrf.mxu0 }
 0x5d9   : > { %v1822_v11 = vunpack.c.l.b16 %v1725_v54  ;;  %v1791_v34 = vpack.c.bf16 %v1766_v4, %v1766_v4 }
 0x5db   : > { %v1833_v29 = vpack.c.b16 %v1822_v11, %v1821_v61  ;;  %v1879_v23 = vunpack.c.l.b16 %v1791_v34 }
 0x5dd   : > { %1845 = vrot.lane.b32.xlu1 %v1833_v29, %s4078_s17 }
 0x5de   : > { %v1701_v0 = vpop.f32.mrf.mxu3 }
 0x5df   : > { %v1726_v62 = vpack.c.bf16 %v1701_v0, %v1701_v0 }
 0x5e0   : > { %v1768_v37 = vpop.f32.mrf.mxu0 }
 0x5e1   : > { %v1792_v3 = vpack.c.bf16 %v1768_v37, %v1768_v37  ;;  %v1823_v43 = vunpack.c.l.b16 %v1726_v62 }
 0x5e3   : > { %v1880_v13 = vunpack.c.l.b16 %v1792_v3 }
 0x5e5   : > { %v1890_v41 = vpack.c.b16 %v1880_v13, %v1879_v23 }
 0x5e6   : > { %v1703_v42 = vpop.f32.mrf.mxu3 }
 0x5e7   : > { %v1727_v56 = vpack.c.bf16 %v1703_v42, %v1703_v42  ;;  %3857 = vmatmul.msk.bf16.gmra.mxu2 %vm892_vm1, %v1890_v41 }
 0x5e8   : > { %v1771_v57 = vpop.f32.mrf.mxu0 }
 0x5e9   : > { %v1824_v44 = vunpack.c.l.b16 %v1727_v56  ;;  %v1793_v48 = vpack.c.bf16 %v1771_v57, %v1771_v57 }
 0x5eb   : > { %v1834_v14 = vpack.c.b16 %v1824_v44, %v1823_v43  ;;  %v1881_v39 = vunpack.c.l.b16 %v1793_v48 }
 0x5ed   : > { %1847 = vrot.lane.b32.xlu2 %v1834_v14, %s4078_s17 }
 0x5ee   : > { %v1706_v10 = vpop.f32.mrf.mxu3 }
 0x5ef   : > { %v1728_v20 = vpack.c.bf16 %v1706_v10, %v1706_v10 }
 0x5f0   : > { %v1773_v16 = vpop.f32.mrf.mxu0 }
 0x5f1   : > { %v1794_v36 = vpack.c.bf16 %v1773_v16, %v1773_v16  ;;  %v1825_v47 = vunpack.c.l.b16 %v1728_v20 }
 0x5f3   : > { %v1882_v49 = vunpack.c.l.b16 %v1794_v36 }
 0x5f5   : > { %v1891_v50 = vpack.c.b16 %v1882_v49, %v1881_v39 }
 0x5f6   : > { %v1708_v58 = vpop.f32.mrf.mxu3 }
 0x5f7   : > { %v1729_v17 = vpack.c.bf16 %v1708_v58, %v1708_v58  ;;  %3858 = vmatmul.msk.bf16.gmra.mxu2 %vm892_vm1, %v1891_v50 }
 0x5f8   : > { %v1776_v2 = vpop.f32.mrf.mxu0 }
 0x5f9   : > { %v1826_v51 = vunpack.c.l.b16 %v1729_v17  ;;  %v1795_v54 = vpack.c.bf16 %v1776_v2, %v1776_v2 }
 0x5fb   : > { %v1835_v55 = vpack.c.b16 %v1826_v51, %v1825_v47  ;;  %v1883_v61 = vunpack.c.l.b16 %v1795_v54 }
 0x5fd   : > { %1849 = vrot.lane.b32.xlu0 %v1835_v55, %s4078_s17  ;;  %v4681_v55 = vld [vmem:[%s5298_s7] ss:$0 sm:$0xff] }
 0x5fe   : > { %v1711_v52 = vpop.f32.mrf.mxu3 }
 0x5ff   : > { %v1730_v29 = vpack.c.bf16 %v1711_v52, %v1711_v52 }
 0x600   : > { %v1778_v4 = vpop.f32.mrf.mxu0 }
 0x601   : > { %v1796_v18 = vpack.c.bf16 %v1778_v4, %v1778_v4  ;;  %v1827_v37 = vunpack.c.l.b16 %v1730_v29 }
 0x603   : > { %v1884_v11 = vunpack.c.l.b16 %v1796_v18 }
 0x605   : > { %v1892_v26 = vpack.c.b16 %v1884_v11, %v1883_v61 }
 0x606   : > { %v1713_v0 = vpop.f32.mrf.mxu3 }
 0x607   : > { %v1731_v34 = vpack.c.bf16 %v1713_v0, %v1713_v0  ;;  %3859 = vmatmul.msk.bf16.gmra.mxu2 %vm892_vm1, %v1892_v26 }
 0x609   : > { %v1828_v6 = vunpack.c.l.b16 %v1731_v34 }
 0x60b   : > { %v1836_v3 = vpack.c.b16 %v1828_v6, %v1827_v37 }
 0x60d   : > { %1851 = vrot.lane.b32.xlu1 %v1836_v3, %s4078_s17 }
 0x60f   : > { %v1838_v23 = vpop.permute.xlu0 %1837 }
 0x610   : > { %v1895_v13 = vsel %vm892_vm1, %v4546_v27, %v1838_v23 }
 0x611   : > { %2057 = vmatmul.bf16.vlgmr.msra.gmra.mxu1 %v1895_v13 }
 0x617   : > { %v1842_v41 = vpop.permute.xlu2 %1841 }
 0x618   : > { %v1903_v42 = vsel %vm892_vm1, %v4538_v12, %v1842_v41 }
 0x61a   : > { %v4656_v14 = vpop.f32.mrf.mxu2 }
 0x61f   : > { %v1840_v7 = vpop.permute.xlu1 %1839 }
 0x620   : > { %v1899_v62 = vsel %vm892_vm1, %v4542_v32, %v1840_v7 }
 0x621   : > { %2062 = vmatmul.bf16.gmra.mxu1 %v1899_v62 }
 0x622   : > { %v4658_v30 = vpop.f32.mrf.mxu2 }
 0x631   : > { %2067 = vmatmul.bf16.gmra.mxu1 %v1903_v42 }
 0x63f   : > { %v1844_v56 = vpop.permute.xlu0 %1843 }
 0x640   : > { %v1907_v57 = vsel %vm892_vm1, %v4534_v15, %v1844_v56 }
 0x641   : > { %2072 = vmatmul.bf16.gmra.mxu1 %v1907_v57 }
 0x647   : > { %v1848_v43 = vpop.permute.xlu2 %1847 }
 0x648   : > { %v1915_v32 = vsel %vm892_vm1, %v4521_v46, %v1848_v43 }
 0x64f   : > { %v1846_v21 = vpop.permute.xlu1 %1845 }
 0x650   : > { %v1911_v27 = vsel %vm892_vm1, %v4529_v59, %v1846_v21  ;;  %v4662_v59 = vpop.f32.mrf.mxu2 }
 0x651   : > { %2077 = vmatmul.bf16.gmra.mxu1 %v1911_v27 }
 0x658   : > { %v4666_v46 = vpop.f32.mrf.mxu2 }
 0x660   : > { %v4670_v36 = vpop.f32.mrf.mxu2 }
 0x661   : > { %2082 = vmatmul.bf16.gmra.mxu1 %v1915_v32 }
 0x668   : > { %v4674_v39 = vpop.f32.mrf.mxu2 }
 0x66f   : > { %v1850_v44 = vpop.permute.xlu0 %1849 }
 0x670   : > { %v1919_v12 = vsel %vm892_vm1, %v4511_v40, %v1850_v44  ;;  %v2122_v20 = vpop.f32.mrf.mxu2 }
 0x671   : > { %2087 = vmatmul.bf16.gmra.mxu1 %v1919_v12 }
 0x678   : > { %v2124_v58 = vpop.f32.mrf.mxu2 }
 0x67f   : > { %v1852_v15 = vpop.permute.xlu1 %1851 }
 0x680   : > { %v1923_v10 = vsel %vm892_vm1, %v4502_v1, %v1852_v15  ;;  %v2127_v2 = vpop.f32.mrf.mxu2 }
 0x681   : > { %2092 = vmatmul.bf16.gmra.mxu1 %v1923_v10 }
 0x688   : > { %v2129_v51 = vpop.f32.mrf.mxu2 }
 0x68e   : > { %v4664_v48 = vpop.f32.mrf.mxu1 }
 0x690   : > { %v2132_v18 = vpop.f32.mrf.mxu2 }
 0x696   : > { %v4668_v16 = vpop.f32.mrf.mxu1 }
 0x698   : > { %v2134_v29 = vpop.f32.mrf.mxu2 }
 0x69e   : > { %v4672_v40 = vpop.f32.mrf.mxu1 }
 0x6a0   : > { %v2137_v0 = vpop.f32.mrf.mxu2 }
 0x6a6   : > { %v4676_v49 = vpop.f32.mrf.mxu1 }
 0x6a8   : > { %v2139_v37 = vpop.f32.mrf.mxu2 }
 0x6ae   : > { %v2068_v50 = vpop.f32.mrf.mxu1 }
 0x6b0   : > { %v2142_v3 = vpop.f32.mrf.mxu2 }
 0x6b6   : > { %v2070_v1 = vpop.f32.mrf.mxu1 }
 0x6b8   : > { %v2144_v44 = vpop.f32.mrf.mxu2 }
 0x6be   : > { %v2073_v17 = vpop.f32.mrf.mxu1 }
 0x6c6   : > { %v2075_v47 = vpop.f32.mrf.mxu1 }
 0x6ce   : > { %v2078_v52 = vpop.f32.mrf.mxu1 }
 0x6cf   : > { %v2079_v54 = vadd.f32 %v4681_v55, %v2078_v52 }
 0x6d1   : > { %v4684_v4 = vadd.f32 %v2127_v2, %v2079_v54 }
 0x6d6   : > { %v2080_v61 = vpop.f32.mrf.mxu1 }
 0x6d7   : > { %v2081_v12 = vadd.f32 %v4681_v55, %v2080_v61  ;;  %v2071_v61 = vadd.f32 %v4681_v55, %v2070_v1  ;;  %v2066_v1 = vadd.f32 %v4681_v55, %v4676_v49 }
 0x6d9   : > { %v2115_v49 = vadd.f32 %v4666_v46, %v2066_v1 }
 0x6db   : > { %v2150_v46 = vmax.f32 %v2115_v49, 0.0 }
 0x6de   : > { %v2083_v11 = vpop.f32.mrf.mxu1 }
 0x6df   : > { %v2084_v21 = vadd.f32 %v4681_v55, %v2083_v11 }
 0x6e1   : > { %v2133_v52 = vadd.f32 %v2132_v18, %v2084_v21  ;;  %v2155_v21 = vmax.f32 %v4684_v4, 0.0 }
 0x6e6   : > { %v2085_v26 = vpop.f32.mrf.mxu1 }
 0x6e7   : > { %v2086_v42 = vadd.f32 %v4681_v55, %v2085_v26  ;;  %v2076_v26 = vadd.f32 %v4681_v55, %v2075_v47  ;;  %v2069_v47 = vadd.f32 %v4681_v55, %v2068_v50 }
 0x6e9   : > { %v2135_v15 = vadd.f32 %v2134_v29, %v2086_v42  ;;  %v2125_v29 = vadd.f32 %v2124_v58, %v2076_v26  ;;  %v2120_v58 = vadd.f32 %v4674_v39, %v2071_v61  ;;  %v2118_v50 = vadd.f32 %v4670_v36, %v2069_v47 }
 0x6ea   : > { %v2061_v39 = vadd.f32 %v4681_v55, %v4668_v16  ;;  %v2059_v36 = vadd.f32 %v4681_v55, %v4664_v48 }
 0x6ec   : > { %v2110_v16 = vadd.f32 %v4658_v30, %v2061_v39 }
 0x6ee   : > { %v2088_v34 = vpop.f32.mrf.mxu1 }
 0x6ef   : > { %v2089_v62 = vadd.f32 %v4681_v55, %v2088_v34 }
 0x6f1   : > { %v2138_v27 = vadd.f32 %v2137_v0, %v2089_v62  ;;  %v2074_v0 = vadd.f32 %v4681_v55, %v2073_v17  ;;  %v2154_v17 = vmax.f32 %v2125_v29, 0.0 }
 0x6f3   : > { %v2159_v54 = vmax.f32 %v2138_v27, 0.0 }
 0x6f6   : > { %v2090_v6 = vpop.f32.mrf.mxu1 }
 0x6f7   : > { %v2091_v7 = vadd.f32 %v4681_v55, %v2090_v6 }
 0x6f9   : > { %v2140_v56 = vadd.f32 %v2139_v37, %v2091_v7  ;;  %v2130_v37 = vadd.f32 %v2129_v51, %v2081_v12  ;;  %v2175_v7 = vpack.c.bf16 %v2159_v54, %v2159_v54  ;;  %v2123_v51 = vadd.f32 %v2122_v20, %v2074_v0 }
 0x6fa   : > { %v2064_v20 = vadd.f32 %v4681_v55, %v4672_v40  ;;  %v2108_v0 = vadd.f32 %v4656_v14, %v2059_v36 }
 0x6fb   : > { %v2160_v10 = vmax.f32 %v2140_v56, 0.0  ;;  %v2156_v42 = vmax.f32 %v2130_v37, 0.0  ;;  %v2153_v4 = vmax.f32 %v2123_v51, 0.0 }
 0x6fc   : > { %v2113_v40 = vadd.f32 %v4662_v59, %v2064_v20  ;;  %v2148_v59 = vmax.f32 %v2110_v16, 0.0  ;;  %v2147_v30 = vmax.f32 %v2108_v0, 0.0 }
 0x6fd   : > { %v2169_v26 = vpack.c.bf16 %v2153_v4, %v2153_v4 }
 0x6fe   : > { %v2093_v23 = vpop.f32.mrf.mxu1  ;;  %v2164_v14 = vpack.c.bf16 %v2148_v59, %v2148_v59  ;;  %v3972_v59 = vld [vmem:[%s5299_s8 + $0x38] sm:$0xff] }
 0x6ff   : > { %v2094_v13 = vadd.f32 %v4681_v55, %v2093_v23  ;;  %v2176_v23 = vpack.c.bf16 %v2160_v10, %v2160_v10  ;;  %2609 = vmatpush.bf16.msrb.mxu1 %v3972_v59 }
 0x700   : > { %v2196_v51 = vunpack.c.l.b16 %v2164_v14 }
 0x701   : > { %v2143_v41 = vadd.f32 %v2142_v3, %v2094_v13  ;;  %v2158_v3 = vmax.f32 %v2135_v15, 0.0  ;;  %v2157_v13 = vmax.f32 %v2133_v52, 0.0  ;;  %v2208_v56 = vunpack.c.l.b16 %v2176_v23 }
 0x702   : > { %v2171_v15 = vpack.c.bf16 %v2155_v21, %v2155_v21  ;;  %v2170_v52 = vpack.c.bf16 %v2154_v17, %v2154_v17 }
 0x703   : > { %v2161_v43 = vmax.f32 %v2143_v41, 0.0  ;;  %v2174_v18 = vpack.c.bf16 %v2158_v3, %v2158_v3  ;;  %v2173_v27 = vpack.c.bf16 %v2157_v13, %v2157_v13  ;;  %v2149_v13 = vmax.f32 %v2113_v40, 0.0 }
 0x704   : > { %v2203_v37 = vunpack.c.l.b16 %v2171_v15  ;;  %v2202_v23 = vunpack.c.l.b16 %v2170_v52 }
 0x705   : > { %v2177_v34 = vpack.c.bf16 %v2161_v43, %v2161_v43  ;;  %v2207_v43 = vunpack.c.l.b16 %v2175_v7  ;;  %v2205_v10 = vunpack.c.l.b16 %v2173_v27  ;;  %v2166_v7 = vpack.c.bf16 %v2150_v46, %v2150_v46 }
 0x706   : > { %v2095_v57 = vpop.f32.mrf.mxu1  ;;  %v2165_v61 = vpack.c.bf16 %v2149_v13, %v2149_v13 }
 0x707   : > { %v2096_v32 = vadd.f32 %v4681_v55, %v2095_v57  ;;  %v2209_v62 = vunpack.c.l.b16 %v2177_v34  ;;  %v4705_v12 = vpack.c.b16 %v2208_v56, %v2207_v43  ;;  %v2201_v55 = vunpack.c.l.b16 %v2169_v26 }
 0x708   : > { %v2163_v56 = vpack.c.bf16 %v2147_v30, %v2147_v30  ;;  %v2197_v47 = vunpack.c.l.b16 %v2165_v61  ;;  %v3971_v61 = vld [vmem:[%s5299_s8 + $0x30] sm:$0xff] }
 0x709   : > { %v2145_v2 = vadd.f32 %v2144_v44, %v2096_v32  ;;  %v2172_v32 = vpack.c.bf16 %v2156_v42, %v2156_v42  ;;  %v2206_v44 = vunpack.c.l.b16 %v2174_v18  ;;  %v2198_v42 = vunpack.c.l.b16 %v2166_v7  ;;  %2610 = vmatpush.bf16.msrb.mxu1 %v3971_v61 }
 0x70a   : > { %v2195_v27 = vunpack.c.l.b16 %v2163_v56  ;;  %v3970_v56 = vld [vmem:[%s5299_s8 + $0x28] sm:$0xff] }
 0x70b   : > { %v2162_v6 = vmax.f32 %v2145_v2, 0.0  ;;  %v2152_v2 = vmax.f32 %v2120_v58, 0.0  ;;  %v2204_v54 = vunpack.c.l.b16 %v2172_v32  ;;  %v4715_v34 = vpack.c.b16 %v2206_v44, %v2205_v10 }
 0x70c   : > { %v4736_v21 = vpack.c.b16 %v2198_v42, %v2197_v47  ;;  %v4740_v43 = vpack.c.b16 %v2196_v51, %v2195_v27 }
 0x70d   : > { %v2178_v11 = vpack.c.bf16 %v2162_v6, %v2162_v6  ;;  %v2151_v6 = vmax.f32 %v2118_v50, 0.0  ;;  %v2168_v3 = vpack.c.bf16 %v2152_v2, %v2152_v2  ;;  %2611 = vmatpush.bf16.msrb.mxu1 %v3970_v56 }
 0x70f   : > { %v2210_v41 = vunpack.c.l.b16 %v2178_v11  ;;  %v4723_v11 = vpack.c.b16 %v2204_v54, %v2203_v37  ;;  %v2167_v48 = vpack.c.bf16 %v2151_v6, %v2151_v6 }
 0x711   : > { %v4696_v57 = vpack.c.b16 %v2210_v41, %v2209_v62  ;;  %v2200_v62 = vunpack.c.l.b16 %v2168_v3  ;;  %v4728_v41 = vpack.c.b16 %v2202_v23, %v2201_v55  ;;  %v2199_v29 = vunpack.c.l.b16 %v2167_v48 }
 0x713   : > { %2227 = vmatpush.bf16.msrb.mxu3 %v4696_v57  ;;  %2292 = vmatpush.bf16.msrb.mxu0 %v4696_v57  ;;  %v4732_v18 = vpack.c.b16 %v2200_v62, %v2199_v29 }
 0x717   : > { %2228 = vmatpush.bf16.msrb.mxu3 %v4705_v12  ;;  %2293 = vmatpush.bf16.msrb.mxu0 %v4705_v12 }
 0x71b   : > { %2229 = vmatpush.bf16.msrb.mxu3 %v4715_v34  ;;  %2294 = vmatpush.bf16.msrb.mxu0 %v4715_v34 }
 0x71f   : > { %2230 = vmatpush.bf16.msrb.mxu3 %v4723_v11  ;;  %2295 = vmatpush.bf16.msrb.mxu0 %v4723_v11 }
 0x723   : > { %2231 = vmatpush.bf16.msrb.mxu3 %v4728_v41  ;;  %2296 = vmatpush.bf16.msrb.mxu0 %v4728_v41 }
 0x727   : > { %2232 = vmatpush.bf16.msrb.mxu3 %v4732_v18  ;;  %2297 = vmatpush.bf16.msrb.mxu0 %v4732_v18 }
 0x72b   : > { %2233 = vmatpush.bf16.msrb.mxu3 %v4736_v21  ;;  %2298 = vmatpush.bf16.msrb.mxu0 %v4736_v21 }
 0x72f   : > { %2234 = vmatpush.bf16.msrb.mxu3 %v4740_v43  ;;  %2299 = vmatpush.bf16.msrb.mxu0 %v4740_v43 }
 0x732   : > { %2235 = vmatmul.bf16.vlgmr.msrb.gmra.mxu3 %v4551_v9  ;;  %2300 = vmatmul.bf16.vlgmr.msrb.gmra.mxu0 %v4245_v19  ;;  %v3976_v19 = vld [vmem:[%s5299_s8 + $0x58] sm:$0xff] }
 0x733   : > { %2662 = vmatpush.bf16.msrb.mxu2 %v3976_v19  ;;  %v3969_v19 = vld [vmem:[%s5299_s8 + $0x20] sm:$0xff] }
 0x734   : > { %2612 = vmatpush.bf16.msrb.mxu1 %v3969_v19 }
 0x742   : > { %2240 = vmatmul.bf16.gmra.mxu3 %v4556_v63  ;;  %2305 = vmatmul.bf16.gmra.mxu0 %v4249_v22  ;;  %v3975_v22 = vld [vmem:[%s5299_s8 + $0x50] sm:$0xff] }
 0x743   : > { %2663 = vmatpush.bf16.msrb.mxu2 %v3975_v22 }
 0x752   : > { %2245 = vmatmul.bf16.gmra.mxu3 %v4561_v33  ;;  %2310 = vmatmul.bf16.gmra.mxu0 %v4253_v25  ;;  %v3974_v25 = vld [vmem:[%s5299_s8 + $0x48] sm:$0xff] }
 0x753   : > { %2664 = vmatpush.bf16.msrb.mxu2 %v3974_v25 }
 0x762   : > { %2250 = vmatmul.bf16.gmra.mxu3 %v4566_v5  ;;  %2315 = vmatmul.bf16.gmra.mxu0 %v4257_v28  ;;  %v3973_v28 = vld [vmem:[%s5299_s8 + $0x40] sm:$0xff] }
 0x763   : > { %2665 = vmatpush.bf16.msrb.mxu2 %v3973_v28 }
 0x772   : > { %2255 = vmatmul.bf16.gmra.mxu3 %v4571_v8  ;;  %2320 = vmatmul.bf16.gmra.mxu0 %v4261_v31 }
 0x782   : > { %2260 = vmatmul.bf16.gmra.mxu3 %v4576_v24  ;;  %2325 = vmatmul.bf16.gmra.mxu0 %v4264_v35 }
 0x792   : > { %2265 = vmatmul.bf16.gmra.mxu3 %v4587_v60  ;;  %2330 = vmatmul.bf16.gmra.mxu0 %v4268_v45 }
 0x7a2   : > { %2270 = vmatmul.bf16.gmra.mxu3 %v4598_v38  ;;  %2335 = vmatmul.bf16.gmra.mxu0 %v4271_v53 }
 0x7af   : > { %v2301_v31 = vpop.f32.mrf.mxu0 }
 0x7b0   : > { %v2341_v9 = vpack.c.bf16 %v2301_v31, %v2301_v31 }
 0x7b2   : > { %v2429_v33 = vunpack.c.l.b16 %v2341_v9  ;;  %v3968_v9 = vld [vmem:[%s5299_s8 + $0x18] sm:$0xff] }
 0x7b3   : > { %2613 = vmatpush.bf16.msrb.mxu1 %v3968_v9 }
 0x7b5   : > { %v2236_v35 = vpop.f32.mrf.mxu3 }
 0x7b6   : > { %v2276_v8 = vpack.c.bf16 %v2236_v35, %v2236_v35 }
 0x7b7   : > { %v2303_v63 = vpop.f32.mrf.mxu0 }
 0x7b8   : > { %v2342_v45 = vpack.c.bf16 %v2303_v63, %v2303_v63  ;;  %v2373_v17 = vunpack.c.l.b16 %v2276_v8 }
 0x7ba   : > { %v2430_v5 = vunpack.c.l.b16 %v2342_v45 }
 0x7bc   : > { %v2445_v24 = vpack.c.b16 %v2430_v5, %v2429_v33  ;;  %v3967_v5 = vld [vmem:[%s5299_s8 + $0x10] sm:$0xff] }
 0x7bd   : > { %v2238_v60 = vpop.f32.mrf.mxu3  ;;  %2614 = vmatpush.bf16.msrb.mxu1 %v3967_v5 }
 0x7be   : > { %v2277_v1 = vpack.c.bf16 %v2238_v60, %v2238_v60  ;;  %3908 = vmatmul.msk.bf16.vlgmr.msrb.gmra.mxu2 %vm892_vm1, %v2445_v24 }
 0x7bf   : > { %v2306_v58 = vpop.f32.mrf.mxu0 }
 0x7c0   : > { %v2374_v32 = vunpack.c.l.b16 %v2277_v1  ;;  %v2343_v38 = vpack.c.bf16 %v2306_v58, %v2306_v58  ;;  %v3966_v1 = vld [vmem:[%s5299_s8 + $0x8] sm:$0xff] }
 0x7c1   : > { %2615 = vmatpush.bf16.msrb.mxu1 %v3966_v1 }
 0x7c2   : > { %v2389_v44 = vpack.c.b16 %v2374_v32, %v2373_v17  ;;  %v2431_v4 = vunpack.c.l.b16 %v2343_v38 }
 0x7c4   : > { %2397 = vrot.lane.b32.xlu2 %v2389_v44, %s4078_s17  ;;  %v3965_v44 = vld [vmem:[%s5299_s8] sm:$0xff] }
 0x7c5   : > { %v2241_v53 = vpop.f32.mrf.mxu3  ;;  %2616 = vmatpush.bf16.msrb.mxu1 %v3965_v44 }
 0x7c6   : > { %v2278_v10 = vpack.c.bf16 %v2241_v53, %v2241_v53 }
 0x7c7   : > { %v2308_v20 = vpop.f32.mrf.mxu0 }
 0x7c8   : > { %v2344_v50 = vpack.c.bf16 %v2308_v20, %v2308_v20  ;;  %v2375_v54 = vunpack.c.l.b16 %v2278_v10 }
 0x7ca   : > { %v2432_v15 = vunpack.c.l.b16 %v2344_v50 }
 0x7cc   : > { %v2446_v39 = vpack.c.b16 %v2432_v15, %v2431_v4 }
 0x7cd   : > { %v2243_v49 = vpop.f32.mrf.mxu3 }
 0x7ce   : > { %v2279_v2 = vpack.c.bf16 %v2243_v49, %v2243_v49  ;;  %3909 = vmatmul.msk.bf16.gmra.mxu2 %vm892_vm1, %v2446_v39 }
 0x7cf   : > { %v2311_v52 = vpop.f32.mrf.mxu0 }
 0x7d0   : > { %v2376_v36 = vunpack.c.l.b16 %v2279_v2  ;;  %v2345_v26 = vpack.c.bf16 %v2311_v52, %v2311_v52 }
 0x7d2   : > { %v2390_v40 = vpack.c.b16 %v2376_v36, %v2375_v54  ;;  %v2433_v46 = vunpack.c.l.b16 %v2345_v26 }
 0x7d4   : > { %2399 = vrot.lane.b32.xlu0 %v2390_v40, %s4078_s17 }
 0x7d5   : > { %v2246_v6 = vpop.f32.mrf.mxu3 }
 0x7d6   : > { %v2280_v23 = vpack.c.bf16 %v2246_v6, %v2246_v6 }
 0x7d7   : > { %v2313_v37 = vpop.f32.mrf.mxu0 }
 0x7d8   : > { %v2346_v16 = vpack.c.bf16 %v2313_v37, %v2313_v37  ;;  %v2377_v7 = vunpack.c.l.b16 %v2280_v23 }
 0x7da   : > { %v2434_v3 = vunpack.c.l.b16 %v2346_v16 }
 0x7dc   : > { %v2447_v0 = vpack.c.b16 %v2434_v3, %v2433_v46 }
 0x7dd   : > { %v2248_v13 = vpop.f32.mrf.mxu3 }
 0x7de   : > { %v2281_v48 = vpack.c.bf16 %v2248_v13, %v2248_v13  ;;  %3910 = vmatmul.msk.bf16.gmra.mxu2 %vm892_vm1, %v2447_v0 }
 0x7df   : > { %v2316_v55 = vpop.f32.mrf.mxu0 }
 0x7e0   : > { %v2378_v62 = vunpack.c.l.b16 %v2281_v48  ;;  %v2347_v14 = vpack.c.bf16 %v2316_v55, %v2316_v55 }
 0x7e2   : > { %v2391_v30 = vpack.c.b16 %v2378_v62, %v2377_v7  ;;  %v2435_v51 = vunpack.c.l.b16 %v2347_v14 }
 0x7e4   : > { %2401 = vrot.lane.b32.xlu1 %v2391_v30, %s4078_s17 }
 0x7e5   : > { %v2251_v29 = vpop.f32.mrf.mxu3 }
 0x7e6   : > { %v2282_v22 = vpack.c.bf16 %v2251_v29, %v2251_v29 }
 0x7e7   : > { %v2318_v42 = vpop.f32.mrf.mxu0 }
 0x7e8   : > { %v2348_v47 = vpack.c.bf16 %v2318_v42, %v2318_v42  ;;  %v2379_v63 = vunpack.c.l.b16 %v2282_v22 }
 0x7ea   : > { %v2436_v27 = vunpack.c.l.b16 %v2348_v47 }
 0x7ec   : > { %v2448_v25 = vpack.c.b16 %v2436_v27, %v2435_v51 }
 0x7ed   : > { %v2253_v28 = vpop.f32.mrf.mxu3 }
 0x7ee   : > { %v2283_v31 = vpack.c.bf16 %v2253_v28, %v2253_v28  ;;  %3911 = vmatmul.msk.bf16.gmra.mxu2 %vm892_vm1, %v2448_v25 }
 0x7ef   : > { %v2321_v35 = vpop.f32.mrf.mxu0 }
 0x7f0   : > { %v2380_v45 = vunpack.c.l.b16 %v2283_v31  ;;  %v2349_v24 = vpack.c.bf16 %v2321_v35, %v2321_v35 }
 0x7f2   : > { %v2392_v33 = vpack.c.b16 %v2380_v45, %v2379_v63  ;;  %v2437_v17 = vunpack.c.l.b16 %v2349_v24 }
 0x7f4   : > { %2403 = vrot.lane.b32.xlu2 %v2392_v33, %s4078_s17 }
 0x7f5   : > { %v2256_v8 = vpop.f32.mrf.mxu3 }
 0x7f6   : > { %v2284_v53 = vpack.c.bf16 %v2256_v8, %v2256_v8 }
 0x7f7   : > { %v2323_v60 = vpop.f32.mrf.mxu0 }
 0x7f8   : > { %v2350_v58 = vpack.c.bf16 %v2323_v60, %v2323_v60  ;;  %v2381_v15 = vunpack.c.l.b16 %v2284_v53 }
 0x7fa   : > { %v2438_v32 = vunpack.c.l.b16 %v2350_v58 }
 0x7fc   : > { %v2449_v38 = vpack.c.b16 %v2438_v32, %v2437_v17 }
 0x7fd   : > { %v2258_v20 = vpop.f32.mrf.mxu3 }
 0x7fe   : > { %v2285_v50 = vpack.c.bf16 %v2258_v20, %v2258_v20  ;;  %3912 = vmatmul.msk.bf16.gmra.mxu2 %vm892_vm1, %v2449_v38 }
 0x7ff   : > { %v2326_v4 = vpop.f32.mrf.mxu0 }
 0x800   : > { %v2382_v10 = vunpack.c.l.b16 %v2285_v50  ;;  %v2351_v2 = vpack.c.bf16 %v2326_v4, %v2326_v4 }
 0x802   : > { %v2393_v39 = vpack.c.b16 %v2382_v10, %v2381_v15  ;;  %v2439_v36 = vunpack.c.l.b16 %v2351_v2 }
 0x804   : > { %2405 = vrot.lane.b32.xlu0 %v2393_v39, %s4078_s17 }
 0x805   : > { %v2261_v49 = vpop.f32.mrf.mxu3 }
 0x806   : > { %v2286_v6 = vpack.c.bf16 %v2261_v49, %v2261_v49 }
 0x807   : > { %v2328_v52 = vpop.f32.mrf.mxu0 }
 0x808   : > { %v2352_v54 = vpack.c.bf16 %v2328_v52, %v2328_v52  ;;  %v2383_v3 = vunpack.c.l.b16 %v2286_v6 }
 0x80a   : > { %v2440_v40 = vunpack.c.l.b16 %v2352_v54 }
 0x80c   : > { %v2450_v26 = vpack.c.b16 %v2440_v40, %v2439_v36 }
 0x80d   : > { %v2263_v37 = vpop.f32.mrf.mxu3 }
 0x80e   : > { %v2287_v16 = vpack.c.bf16 %v2263_v37, %v2263_v37  ;;  %3913 = vmatmul.msk.bf16.gmra.mxu2 %vm892_vm1, %v2450_v26 }
 0x80f   : > { %v2331_v46 = vpop.f32.mrf.mxu0 }
 0x810   : > { %v2384_v23 = vunpack.c.l.b16 %v2287_v16  ;;  %v2353_v48 = vpack.c.bf16 %v2331_v46, %v2331_v46 }
 0x812   : > { %v2394_v0 = vpack.c.b16 %v2384_v23, %v2383_v3  ;;  %v2441_v7 = vunpack.c.l.b16 %v2353_v48 }
 0x814   : > { %2407 = vrot.lane.b32.xlu1 %v2394_v0, %s4078_s17 }
 0x815   : > { %v2266_v13 = vpop.f32.mrf.mxu3 }
 0x816   : > { %v2288_v30 = vpack.c.bf16 %v2266_v13, %v2266_v13 }
 0x817   : > { %v2333_v55 = vpop.f32.mrf.mxu0 }
 0x818   : > { %v2354_v59 = vpack.c.bf16 %v2333_v55, %v2333_v55  ;;  %v2385_v51 = vunpack.c.l.b16 %v2288_v30 }
 0x81a   : > { %v2442_v62 = vunpack.c.l.b16 %v2354_v59 }
 0x81c   : > { %v2451_v61 = vpack.c.b16 %v2442_v62, %v2441_v7 }
 0x81d   : > { %v2268_v29 = vpop.f32.mrf.mxu3 }
 0x81e   : > { %v2289_v14 = vpack.c.bf16 %v2268_v29, %v2268_v29  ;;  %3914 = vmatmul.msk.bf16.gmra.mxu2 %vm892_vm1, %v2451_v61  ;;  %v2398_v42 = vpop.permute.xlu2 %2397 }
 0x81f   : > { %v2455_v56 = vsel %vm892_vm1, %v4740_v43, %v2398_v42  ;;  %v2336_v47 = vpop.f32.mrf.mxu0 }
 0x820   : > { %v2386_v27 = vunpack.c.l.b16 %v2289_v14  ;;  %2617 = vmatmul.bf16.vlgmr.msrb.gmra.mxu1 %v2455_v56  ;;  %v2355_v25 = vpack.c.bf16 %v2336_v47, %v2336_v47 }
 0x822   : > { %v2395_v19 = vpack.c.b16 %v2386_v27, %v2385_v51  ;;  %v2443_v35 = vunpack.c.l.b16 %v2355_v25 }
 0x824   : > { %2409 = vrot.lane.b32.xlu2 %v2395_v19, %s4078_s17 }
 0x825   : > { %v2271_v22 = vpop.f32.mrf.mxu3 }
 0x826   : > { %v2290_v63 = vpack.c.bf16 %v2271_v22, %v2271_v22 }
 0x827   : > { %v2338_v28 = vpop.f32.mrf.mxu0 }
 0x828   : > { %v2356_v31 = vpack.c.bf16 %v2338_v28, %v2338_v28  ;;  %v2387_v43 = vunpack.c.l.b16 %v2290_v63 }
 0x82a   : > { %v2444_v9 = vunpack.c.l.b16 %v2356_v31 }
 0x82c   : > { %v2452_v45 = vpack.c.b16 %v2444_v9, %v2443_v35 }
 0x82d   : > { %v2273_v33 = vpop.f32.mrf.mxu3 }
 0x82e   : > { %v2291_v5 = vpack.c.bf16 %v2273_v33, %v2273_v33  ;;  %3915 = vmatmul.msk.bf16.gmra.mxu2 %vm892_vm1, %v2452_v45 }
 0x830   : > { %v2388_v8 = vunpack.c.l.b16 %v2291_v5 }
 0x832   : > { %v2396_v24 = vpack.c.b16 %v2388_v8, %v2387_v43 }
 0x834   : > { %2411 = vrot.lane.b32.xlu0 %v2396_v24, %s4078_s17 }
 0x841   : > { %v2667_v4 = vpop.f32.mrf.mxu2 }
 0x846   : > { %v2400_v60 = vpop.permute.xlu0 %2399 }
 0x847   : > { %v2459_v1 = vsel %vm892_vm1, %v4736_v21, %v2400_v60 }
 0x848   : > { %2622 = vmatmul.bf16.gmra.mxu1 %v2459_v1 }
 0x84e   : > { %v2404_v32 = vpop.permute.xlu2 %2403 }
 0x84f   : > { %v2467_v44 = vsel %vm892_vm1, %v4728_v41, %v2404_v32  ;;  %v4829_v41 = vld [vmem:[%s5300_s9] ss:$0 sm:$0xff] }
 0x856   : > { %v2402_v58 = vpop.permute.xlu1 %2401 }
 0x857   : > { %v2463_v17 = vsel %vm892_vm1, %v4732_v18, %v2402_v58 }
 0x858   : > { %2627 = vmatmul.bf16.gmra.mxu1 %v2463_v17 }
 0x868   : > { %2632 = vmatmul.bf16.gmra.mxu1 %v2467_v44 }
 0x876   : > { %v2406_v53 = vpop.permute.xlu0 %2405 }
 0x877   : > { %v2471_v38 = vsel %vm892_vm1, %v4723_v11, %v2406_v53 }
 0x878   : > { %2637 = vmatmul.bf16.gmra.mxu1 %v2471_v38 }
 0x87e   : > { %v2410_v50 = vpop.permute.xlu2 %2409 }
 0x87f   : > { %v2479_v18 = vsel %vm892_vm1, %v4705_v12, %v2410_v50  ;;  %v2669_v12 = vpop.f32.mrf.mxu2 }
 0x886   : > { %v2408_v20 = vpop.permute.xlu1 %2407 }
 0x887   : > { %v2475_v21 = vsel %vm892_vm1, %v4715_v34, %v2408_v20  ;;  %v4837_v34 = vld [vmem:[%s5301_s10] ss:$0 sm:$0xff]  ;;  %v2672_v16 = vpop.f32.mrf.mxu2 }
 0x888   : > { %2642 = vmatmul.bf16.gmra.mxu1 %v2475_v21 }
 0x88f   : > { %v2674_v3 = vpop.f32.mrf.mxu2 }
 0x897   : > { %v2677_v23 = vpop.f32.mrf.mxu2 }
 0x898   : > { %2647 = vmatmul.bf16.gmra.mxu1 %v2479_v18 }
 0x89d   : > { %v2618_v15 = vpop.f32.mrf.mxu1 }
 0x89e   : > { %v2619_v11 = vadd.f32 %v4829_v41, %v2618_v15 }
 0x89f   : > { %v2679_v55 = vpop.f32.mrf.mxu2 }
 0x8a0   : > { %v4832_v10 = vadd.f32 %v2667_v4, %v2619_v11 }
 0x8a2   : > { %v2707_v39 = vmax.f32 %v4832_v10, 0.0 }
 0x8a4   : > { %v2727_v49 = vmul.f32 %v4837_v34, %v2707_v39 }
 0x8a5   : > { %v2620_v2 = vpop.f32.mrf.mxu1 }
 0x8a6   : > { %v2621_v52 = vadd.f32 %v4829_v41, %v2620_v2  ;;  %v2412_v54 = vpop.permute.xlu0 %2411  ;;  %v2743_v36 = vsel %vm892_vm1, %v2727_v49, 0.0 }
 0x8a7   : > { %2744 = vadd.xlane.f32.xlu1 %v2743_v36  ;;  %v2483_v40 = vsel %vm892_vm1, %v4696_v57, %v2412_v54  ;;  %v2682_v42 = vpop.f32.mrf.mxu2 }
 0x8a8   : > { %v4847_v6 = vadd.f32 %v2669_v12, %v2621_v52  ;;  %2652 = vmatmul.bf16.gmra.mxu1 %v2483_v40 }
 0x8aa   : > { %v2708_v26 = vmax.f32 %v4847_v6, 0.0 }
 0x8ac   : > { %v2728_v37 = vmul.f32 %v4837_v34, %v2708_v26 }
 0x8ae   : > { %v2746_v46 = vsel %vm892_vm1, %v2728_v37, 0.0 }
 0x8af   : > { %2747 = vadd.xlane.f32.xlu2 %v2746_v46  ;;  %v4879_v35 = vpop.f32.mrf.mxu2 }
 0x8b7   : > { %v2687_v24 = vpop.f32.mrf.mxu2 }
 0x8bf   : > { %v2689_v32 = vpop.f32.mrf.mxu2 }
 0x8c5   : > { %v2623_v0 = vpop.f32.mrf.mxu1 }
 0x8c6   : > { %v2624_v13 = vadd.f32 %v4829_v41, %v2623_v0 }
 0x8c7   : > { %v2692_v50 = vpop.f32.mrf.mxu2 }
 0x8c8   : > { %v4855_v48 = vadd.f32 %v2672_v16, %v2624_v13 }
 0x8ca   : > { %v2709_v57 = vmax.f32 %v4855_v48, 0.0 }
 0x8cc   : > { %v2729_v59 = vmul.f32 %v4837_v34, %v2709_v57 }
 0x8cd   : > { %v2625_v7 = vpop.f32.mrf.mxu1 }
 0x8ce   : > { %v2626_v62 = vadd.f32 %v4829_v41, %v2625_v7  ;;  %v2749_v30 = vsel %vm892_vm1, %v2729_v59, 0.0 }
 0x8cf   : > { %2750 = vadd.xlane.f32.xlu1 %v2749_v30  ;;  %v2694_v36 = vpop.f32.mrf.mxu2 }
 0x8d0   : > { %v4863_v61 = vadd.f32 %v2674_v3, %v2626_v62 }
 0x8d2   : > { %v2710_v29 = vmax.f32 %v4863_v61, 0.0 }
 0x8d4   : > { %v2730_v14 = vmul.f32 %v4837_v34, %v2710_v29 }
 0x8d5   : > { %v2628_v56 = vpop.f32.mrf.mxu1 }
 0x8d6   : > { %v2629_v47 = vadd.f32 %v4829_v41, %v2628_v56  ;;  %v2752_v51 = vsel %vm892_vm1, %v2730_v14, 0.0  ;;  %v4929_v14 = vld [vmem:[#allocation2] ss:$0 sm:$0xff] }
 0x8d7   : > { %2753 = vadd.xlane.f32.xlu0 %v2752_v51  ;;  %v2697_v13 = vpop.f32.mrf.mxu2 }
 0x8d8   : > { %v4871_v27 = vadd.f32 %v2677_v23, %v2629_v47 }
 0x8da   : > { %v2711_v19 = vmax.f32 %v4871_v27, 0.0 }
 0x8dc   : > { %v2731_v22 = vmul.f32 %v4837_v34, %v2711_v19 }
 0x8dd   : > { %v2630_v25 = vpop.f32.mrf.mxu1 }
 0x8de   : > { %v2631_v28 = vadd.f32 %v4829_v41, %v2630_v25  ;;  %v2755_v31 = vsel %vm892_vm1, %v2731_v22, 0.0 }
 0x8df   : > { %2756 = vadd.xlane.f32.xlu2 %v2755_v31  ;;  %v2699_v51 = vpop.f32.mrf.mxu2 }
 0x8e0   : > { %v4881_v9 = vadd.f32 %v2679_v55, %v2631_v28 }
 0x8e2   : > { %v2712_v63 = vmax.f32 %v4881_v9, 0.0 }
 0x8e4   : > { %v2732_v45 = vmul.f32 %v4837_v34, %v2712_v63 }
 0x8e5   : > { %v2633_v33 = vpop.f32.mrf.mxu1 }
 0x8e6   : > { %v2634_v5 = vadd.f32 %v4829_v41, %v2633_v33  ;;  %v2758_v43 = vsel %vm892_vm1, %v2732_v45, 0.0 }
 0x8e7   : > { %2759 = vadd.xlane.f32.xlu1 %v2758_v43 }
 0x8e8   : > { %v4889_v8 = vadd.f32 %v2682_v42, %v2634_v5 }
 0x8ea   : > { %v2713_v60 = vmax.f32 %v4889_v8, 0.0 }
 0x8ec   : > { %v2733_v1 = vmul.f32 %v4837_v34, %v2713_v60 }
 0x8ed   : > { %v2635_v58 = vpop.f32.mrf.mxu1 }
 0x8ee   : > { %v2761_v17 = vsel %vm892_vm1, %v2733_v1, 0.0  ;;  %v2636_v28 = vadd.f32 %v4829_v41, %v2635_v58 }
 0x8ef   : > { %2762 = vadd.xlane.f32.xlu0 %v2761_v17 }
 0x8f0   : > { %v4945_v17 = vadd.f32 %v4879_v35, %v2636_v28 }
 0x8f5   : > { %v2638_v44 = vpop.f32.mrf.mxu1 }
 0x8f6   : > { %v2639_v53 = vadd.f32 %v4829_v41, %v2638_v44 }
 0x8f8   : > { %v4897_v38 = vadd.f32 %v2687_v24, %v2639_v53 }
 0x8fa   : > { %v2715_v20 = vmax.f32 %v4897_v38, 0.0 }
 0x8fc   : > { %v2735_v21 = vmul.f32 %v4837_v34, %v2715_v20 }
 0x8fd   : > { %v2640_v18 = vpop.f32.mrf.mxu1 }
 0x8fe   : > { %v2641_v4 = vadd.f32 %v4829_v41, %v2640_v18  ;;  %v2767_v15 = vsel %vm892_vm1, %v2735_v21, 0.0  ;;  %v2702_v18 = vpop.f32.mrf.mxu2 }
 0x8ff   : > { %2768 = vadd.xlane.f32.xlu0 %v2767_v15 }
 0x900   : > { %v4905_v11 = vadd.f32 %v2689_v32, %v2641_v4  ;;  %v2714_v4 = vmax.f32 %v4945_v17, 0.0 }
 0x902   : > { %v2716_v12 = vmax.f32 %v4905_v11, 0.0 }
 0x904   : > { %v2736_v49 = vmul.f32 %v4837_v34, %v2716_v12 }
 0x905   : > { %v2643_v2 = vpop.f32.mrf.mxu1 }
 0x906   : > { %v2644_v52 = vadd.f32 %v4829_v41, %v2643_v2  ;;  %v2770_v54 = vsel %vm892_vm1, %v2736_v49, 0.0 }
 0x907   : > { %2771 = vadd.xlane.f32.xlu2 %v2770_v54 }
 0x908   : > { %v4913_v40 = vadd.f32 %v2692_v50, %v2644_v52 }
 0x90a   : > { %v5308_v37 = vmax.f32 %v4913_v40, 0.0 }
 0x90c   : > { %v2737_v16 = vmul.f32 %v4837_v34, %v5308_v37 }
 0x90d   : > { %v2645_v46 = vpop.f32.mrf.mxu1 }
 0x90e   : > { %v2646_v3 = vadd.f32 %v4829_v41, %v2645_v46  ;;  %v2773_v23 = vsel %vm892_vm1, %v2737_v16, 0.0 }
 0x90f   : > { %2774 = vadd.xlane.f32.xlu2 %v2773_v23 }
 0x910   : > { %v4921_v0 = vadd.f32 %v2694_v36, %v2646_v3  ;;  %v2734_v3 = vmul.f32 %v4837_v34, %v2714_v4 }
 0x912   : > { %v5309_v55 = vmax.f32 %v4921_v0, 0.0 }
 0x914   : > { %v2738_v59 = vmul.f32 %v4837_v34, %v5309_v55 }
 0x915   : > { %v2648_v7 = vpop.f32.mrf.mxu1 }
 0x916   : > { %v2649_v62 = vadd.f32 %v4829_v41, %v2648_v7  ;;  %v2776_v30 = vsel %vm892_vm1, %v2738_v59, 0.0 }
 0x917   : > { %2777 = vadd.xlane.f32.xlu1 %v2776_v30 }
 0x918   : > { %v4931_v42 = vadd.f32 %v2697_v13, %v2649_v62 }
 0x91a   : > { %v5307_v56 = vmax.f32 %v4931_v42, 0.0  ;;  %v2745_v47 = vpop.xlane.xlu1 %2744 }
 0x91b   : > { %v2795_v22 = vadd.f32 %v4929_v14, %v2745_v47 }
 0x91c   : > { %v2739_v25 = vmul.f32 %v4837_v34, %v5307_v56 }
 0x91d   : > { %v2812_v31 = vsel %vm2811_vm3, %v2795_v22, -inf  ;;  %v2650_v45 = vpop.f32.mrf.mxu1 }
 0x91e   : > { %v2813_v33 = vrot.slane %v2812_v31, 4  ;;  %v2651_v5 = vadd.f32 %v4829_v41, %v2650_v45  ;;  %v2779_v43 = vsel %vm892_vm1, %v2739_v25, 0.0  ;;  %v2704_v45 = vpop.f32.mrf.mxu2 }
 0x91f   : > { %2780 = vadd.xlane.f32.xlu0 %v2779_v43 }
 0x920   : > { %v2814_v24 = vmax.f32 %v2812_v31, %v2813_v33  ;;  %v4942_v1 = vadd.f32 %v2699_v51, %v2651_v5  ;;  %v2764_v51 = vsel %vm892_vm1, %v2734_v3, 0.0 }
 0x922   : > { %v2815_v32 = vrot.slane %v2814_v24, 2  ;;  %v5306_v44 = vmax.f32 %v4942_v1, 0.0  ;;  %v2748_v53 = vpop.xlane.xlu2 %2747 }
 0x923   : > { %v2796_v58 = vadd.f32 %v4929_v14, %v2748_v53 }
 0x924   : > { %v2816_v21 = vmax.f32 %v2814_v24, %v2815_v32  ;;  %v2740_v50 = vmul.f32 %v4837_v34, %v5306_v44 }
 0x925   : > { %v2819_v15 = vsel %vm2811_vm3, %v2796_v58, -inf  ;;  %v2653_v49 = vpop.f32.mrf.mxu1 }
 0x926   : > { %v2817_v2 = vrot.slane %v2816_v21, 1  ;;  %v2820_v35 = vrot.slane %v2819_v15, 4  ;;  %v2654_v52 = vadd.f32 %v4829_v41, %v2653_v49  ;;  %v2782_v54 = vsel %vm892_vm1, %v2740_v50, 0.0 }
 0x927   : > { %2783 = vadd.xlane.f32.xlu2 %v2782_v54 }
 0x928   : > { %v2818_v36 = vmax.f32 %v2816_v21, %v2817_v2  ;;  %v2821_v16 = vmax.f32 %v2819_v15, %v2820_v35  ;;  %v4956_v46 = vadd.f32 %v2702_v18, %v2654_v52  ;;  %v4079_v21 = vmov 0  }
 0x929   : > { %3988 = vset.pattern.permute.xlu1 %v4079_v21  ;;  %3989 = vset.pattern.permute.xlu2 %v4079_v21 }
 0x92a   : > { %v2924_v23 = vsub.f32 %v2795_v22, %v2818_v36  ;;  %v2822_v13 = vrot.slane %v2821_v16, 2  ;;  %v5305_v59 = vmax.f32 %v4956_v46, 0.0  ;;  %3990 = vset.pattern.permute.xlu0 %v4079_v21 }
 0x92c   : > { %v2940_v7 = vmul.f32 1.442695, %v2924_v23  ;;  %v2823_v62 = vmax.f32 %v2821_v16, %v2822_v13  ;;  %v2741_v30 = vmul.f32 %v4837_v34, %v5305_v59 }
 0x92d   : > { %v2655_v47 = vpop.f32.mrf.mxu1 }
 0x92e   : > { %3997 = vpow2.f32 %v2940_v7  ;;  %v2824_v25 = vrot.slane %v2823_v62, 1  ;;  %v2656_v28 = vadd.f32 %v4829_v41, %v2655_v47  ;;  %v2785_v31 = vsel %vm892_vm1, %v2741_v30, 0.0 }
 0x92f   : > { %2765 = vadd.xlane.f32.xlu2 %v2764_v51  ;;  %2786 = vadd.xlane.f32.xlu1 %v2785_v31 }
 0x930   : > { %v2825_v22 = vmax.f32 %v2823_v62, %v2824_v25  ;;  %v4968_v33 = vadd.f32 %v2704_v45, %v2656_v28 }
 0x932   : > { %v2925_v5 = vsub.f32 %v2796_v58, %v2825_v22  ;;  %v5304_v43 = vmax.f32 %v4968_v33, 0.0 }
 0x934   : > { %v3998_v24 = vpop.eup %3997  ;;  %v2942_v32 = vmul.f32 1.442695, %v2925_v5  ;;  %v2742_v53 = vmul.f32 %v4837_v34, %v5304_v43 }
 0x935   : > { %v2972_v41 = vsel %vm2811_vm3, %v3998_v24, 0.0 }
 0x936   : > { %v2973_v50 = vrot.slane %v2972_v41, 4  ;;  %3999 = vpow2.f32 %v2942_v32  ;;  %v2788_v18 = vsel %vm892_vm1, %v2742_v53, 0.0 }
 0x937   : > { %2789 = vadd.xlane.f32.xlu0 %v2788_v18 }
 0x938   : > { %v2974_v58 = vadd.f32 %v2973_v50, %v2972_v41 }
 0x93a   : > { %v2975_v15 = vrot.slane %v2974_v58, 2 }
 0x93c   : > { %v4976_v49 = vpop.eup %3999  ;;  %v2976_v2 = vadd.f32 %v2975_v15, %v2974_v58 }
 0x93d   : > { %v2979_v35 = vsel %vm2811_vm3, %v4976_v49, 0.0 }
 0x93e   : > { %v2977_v34 = vrot.slane %v2976_v2, 1  ;;  %v2980_v52 = vrot.slane %v2979_v35, 4 }
 0x940   : > { %v2978_v54 = vadd.f32 %v2977_v34, %v2976_v2  ;;  %v2981_v36 = vadd.f32 %v2980_v52, %v2979_v35 }
 0x942   : > { %4001 = vrcp.f32 %v2978_v54  ;;  %v2982_v16 = vrot.slane %v2981_v36, 2  ;;  %v2751_v3 = vpop.xlane.xlu1 %2750  ;;  %v3095_v53 = vand.u32 2147483648, %v2978_v54  ;;  %v3093_v50 = vand.u32 2147483647, %v2978_v54 }
 0x943   : > { %v2797_v23 = vadd.f32 %v4929_v14, %v2751_v3  ;;  %vm3089_vm5 = vweird.f32 %v2978_v54 }
 0x944   : > { %v2983_v13 = vadd.f32 %v2982_v16, %v2981_v36  ;;  %v3096_v52 = vor.u32 1.1754944e-38, %v3095_v53  ;;  %vm3094_vm7 = vcmp.eq.f32.partialorder %v3093_v50, 8.507059e+37 }
 0x945   : > { %v2826_v7 = vsel %vm2811_vm3, %v2797_v23, -inf }
 0x946   : > { %v2984_v62 = vrot.slane %v2983_v13, 1  ;;  %v2827_v30 = vrot.slane %v2826_v7, 4 }
 0x948   : > { %v4002_v47 = vpop.eup %4001  ;;  %v2985_v51 = vadd.f32 %v2984_v62, %v2983_v13  ;;  %v2828_v25 = vmax.f32 %v2826_v7, %v2827_v30 }
 0x949   : > { %v3085_v28 = vmul.f32 %v4002_v47, %v2978_v54  ;;  %vm3090_vm4 = vweird.f32 %v4002_v47 }
 0x94a   : > { %4003 = vrcp.f32 %v2985_v51  ;;  %v2829_v31 = vrot.slane %v2828_v25, 2  ;;  %v2754_v45 = vpop.xlane.xlu0 %2753  ;;  %vm3091_vm6 = vmor %vm3089_vm5, %vm3090_vm4  ;;  %v3108_v53 = vand.u32 2147483647, %v2985_v51  ;;  %vm3104_vm9 = vweird.f32 %v2985_v51 }
 0x94b   : > { %v2798_v22 = vadd.f32 %v4929_v14, %v2754_v45  ;;  %v3086_v5 = vsub.f32 1.0, %v3085_v28 }
 0x94c   : > { %v2830_v32 = vmax.f32 %v2828_v25, %v2829_v31  ;;  %vm3109_vm11 = vcmp.eq.f32.partialorder %v3108_v53, 8.507059e+37 }
 0x94d   : > { %v2833_v21 = vsel %vm2811_vm3, %v2798_v22, -inf  ;;  %v3087_v41 = vmul.f32 %v4002_v47, %v3086_v5  ;;  %v3110_v5 = vand.u32 2147483648, %v2985_v51 }
 0x94e   : > { %v2831_v18 = vrot.slane %v2830_v32, 1  ;;  %v2834_v58 = vrot.slane %v2833_v21, 4 }
 0x94f   : > { %v3088_v15 = vadd.f32 %v4002_v47, %v3087_v41 }
 0x950   : > { %v4004_v2 = vpop.eup %4003  ;;  %v2832_v35 = vmax.f32 %v2830_v32, %v2831_v18  ;;  %v2835_v34 = vmax.f32 %v2833_v21, %v2834_v58  ;;  %v3111_v18 = vor.u32 1.1754944e-38, %v3110_v5 }
 0x951   : > { %v3092_v36 = vsel %vm3091_vm6, %v4002_v47, %v3088_v15  ;;  %v3100_v16 = vmul.f32 %v4004_v2, %v2985_v51  ;;  %vm3105_vm8 = vweird.f32 %v4004_v2 }
 0x952   : > { %v2926_v3 = vsub.f32 %v2797_v23, %v2832_v35  ;;  %v2836_v13 = vrot.slane %v2835_v34, 2  ;;  %v2757_v7 = vpop.xlane.xlu2 %2756  ;;  %v3097_v62 = vsel %vm3094_vm7, %v3096_v52, %v3092_v36  ;;  %vm3106_vm10 = vmor %vm3104_vm9, %vm3105_vm8 }
 0x953   : > { %v2799_v30 = vadd.f32 %v4929_v14, %v2757_v7  ;;  %v3098_v25 = vmul.f32 %v3998_v24, %v3097_v62  ;;  %v3101_v28 = vsub.f32 1.0, %v3100_v16 }
 0x954   : > { %v2944_v31 = vmul.f32 1.442695, %v2926_v3  ;;  %v2837_v45 = vmax.f32 %v2835_v34, %v2836_v13 }
 0x955   : > { %v2840_v54 = vsel %vm2811_vm3, %v2799_v30, -inf  ;;  %3326 = vperm.xlu1 %3988, %v3098_v25   ;;  %v3102_v32 = vmul.f32 %v4004_v2, %v3101_v28 }
 0x956   : > { %4005 = vpow2.f32 %v2944_v31  ;;  %v2838_v47 = vrot.slane %v2837_v45, 1  ;;  %v2841_v21 = vrot.slane %v2840_v54, 4 }
 0x957   : > { %v3103_v23 = vadd.f32 %v4004_v2, %v3102_v32 }
 0x958   : > { %v2839_v41 = vmax.f32 %v2837_v45, %v2838_v47  ;;  %v2842_v50 = vmax.f32 %v2840_v54, %v2841_v21 }
 0x959   : > { %v3107_v24 = vsel %vm3106_vm10, %v4004_v2, %v3103_v23 }
 0x95a   : > { %v2927_v58 = vsub.f32 %v2798_v22, %v2839_v41  ;;  %v2843_v15 = vrot.slane %v2842_v50, 2  ;;  %v2760_v35 = vpop.xlane.xlu1 %2759  ;;  %v3112_v34 = vsel %vm3109_vm11, %v3111_v18, %v3107_v24 }
 0x95b   : > { %v2800_v52 = vadd.f32 %v4929_v14, %v2760_v35  ;;  %v3113_v36 = vmul.f32 %v4976_v49, %v3112_v34 }
 0x95c   : > { %v4988_v16 = vpop.eup %4005  ;;  %v2946_v3 = vmul.f32 1.442695, %v2927_v58  ;;  %v2844_v13 = vmax.f32 %v2842_v50, %v2843_v15 }
 0x95d   : > { %v2986_v51 = vsel %vm2811_vm3, %v4988_v16, 0.0  ;;  %v2847_v7 = vsel %vm2811_vm3, %v2800_v52, -inf  ;;  %3331 = vperm.xlu2 %3989, %v3113_v36  }
 0x95e   : > { %v2987_v2 = vrot.slane %v2986_v51, 4  ;;  %4007 = vpow2.f32 %v2946_v3  ;;  %v2845_v22 = vrot.slane %v2844_v13, 1  ;;  %v2848_v62 = vrot.slane %v2847_v7, 4 }
 0x960   : > { %v2988_v25 = vadd.f32 %v2987_v2, %v2986_v51  ;;  %v2846_v28 = vmax.f32 %v2844_v13, %v2845_v22  ;;  %v2849_v31 = vmax.f32 %v2847_v7, %v2848_v62 }
 0x962   : > { %v2989_v45 = vrot.slane %v2988_v25, 2  ;;  %v2928_v5 = vsub.f32 %v2799_v30, %v2846_v28  ;;  %v2850_v49 = vrot.slane %v2849_v31, 2  ;;  %v2763_v54 = vpop.xlane.xlu0 %2762 }
 0x963   : > { %v2801_v32 = vadd.f32 %v4929_v14, %v2763_v54 }
 0x964   : > { %v4994_v53 = vpop.eup %4007  ;;  %v2990_v47 = vadd.f32 %v2989_v45, %v2988_v25  ;;  %v2948_v21 = vmul.f32 1.442695, %v2928_v5  ;;  %v2851_v23 = vmax.f32 %v2849_v31, %v2850_v49 }
 0x965   : > { %v2993_v41 = vsel %vm2811_vm3, %v4994_v53, 0.0  ;;  %v2854_v50 = vsel %vm2811_vm3, %v2801_v32, -inf }
 0x966   : > { %v2991_v18 = vrot.slane %v2990_v47, 1  ;;  %v2994_v24 = vrot.slane %v2993_v41, 4  ;;  %4009 = vpow2.f32 %v2948_v21  ;;  %v2852_v58 = vrot.slane %v2851_v23, 1 }
 0x967   : > { %v2855_v15 = vrot.slane %v2854_v50, 4 }
 0x968   : > { %v2992_v30 = vadd.f32 %v2991_v18, %v2990_v47  ;;  %v2995_v35 = vadd.f32 %v2994_v24, %v2993_v41  ;;  %v2853_v34 = vmax.f32 %v2851_v23, %v2852_v58 }
 0x969   : > { %v2856_v36 = vmax.f32 %v2854_v50, %v2855_v15 }
 0x96a   : > { %4011 = vrcp.f32 %v2992_v30  ;;  %v2996_v3 = vrot.slane %v2995_v35, 2  ;;  %v2929_v13 = vsub.f32 %v2800_v52, %v2853_v34  ;;  %v3123_v15 = vand.u32 2147483647, %v2992_v30 }
 0x96b   : > { %v2857_v51 = vrot.slane %v2856_v36, 2  ;;  %vm3119_vm13 = vweird.f32 %v2992_v30 }
 0x96c   : > { %v4999_v7 = vpop.eup %4009  ;;  %v2997_v2 = vadd.f32 %v2996_v3, %v2995_v35  ;;  %v2950_v22 = vmul.f32 1.442695, %v2929_v13  ;;  %v3125_v35 = vand.u32 2147483648, %v2992_v30  ;;  %vm3124_vm15 = vcmp.eq.f32.partialorder %v3123_v15, 8.507059e+37 }
 0x96d   : > { %v3000_v62 = vsel %vm2811_vm3, %v4999_v7, 0.0  ;;  %v2858_v25 = vmax.f32 %v2856_v36, %v2857_v51 }
 0x96e   : > { %v2998_v28 = vrot.slane %v2997_v2, 1  ;;  %v3001_v31 = vrot.slane %v3000_v62, 4  ;;  %4013 = vpow2.f32 %v2950_v22 }
 0x96f   : > { %v2859_v45 = vrot.slane %v2858_v25, 1 }
 0x970   : > { %v4012_v5 = vpop.eup %4011  ;;  %v5003_v49 = vadd.f32 %v2998_v28, %v2997_v2  ;;  %v3002_v54 = vadd.f32 %v3001_v31, %v3000_v62 }
 0x971   : > { %v2860_v47 = vmax.f32 %v2858_v25, %v2859_v45  ;;  %v3115_v21 = vmul.f32 %v4012_v5, %v2992_v30  ;;  %vm3120_vm12 = vweird.f32 %v4012_v5  ;;  %v3126_v45 = vor.u32 1.1754944e-38, %v3125_v35 }
 0x972   : > { %4015 = vrcp.f32 %v5003_v49  ;;  %v3003_v52 = vrot.slane %v3002_v54, 2  ;;  %v2769_v23 = vpop.xlane.xlu0 %2768  ;;  %vm3121_vm14 = vmor %vm3119_vm13, %vm3120_vm12  ;;  %v3140_v35 = vand.u32 2147483648, %v5003_v49  ;;  %vm3134_vm2 = vweird.f32 %v5003_v49 }
 0x973   : > { %v2930_v41 = vsub.f32 %v2801_v32, %v2860_v47  ;;  %v5007_v50 = vadd.f32 %v4929_v14, %v2769_v23  ;;  %v3116_v18 = vsub.f32 1.0, %v3115_v21 }
 0x974   : > { %v5009_v24 = vpop.eup %4013  ;;  %v3004_v58 = vadd.f32 %v3003_v52, %v3002_v54 }
 0x975   : > { %v3007_v34 = vsel %vm2811_vm3, %v5009_v24, 0.0  ;;  %v2952_v36 = vmul.f32 1.442695, %v2930_v41  ;;  %v2868_v3 = vsel %vm2811_vm3, %v5007_v50, -inf  ;;  %v3117_v13 = vmul.f32 %v4012_v5, %v3116_v18 }
 0x976   : > { %v3005_v51 = vrot.slane %v3004_v58, 1  ;;  %v3008_v32 = vrot.slane %v3007_v34, 4  ;;  %v2869_v2 = vrot.slane %v2868_v3, 4 }
 0x977   : > { %4017 = vpow2.f32 %v2952_v36  ;;  %v3118_v22 = vadd.f32 %v4012_v5, %v3117_v13  ;;  %v3138_v13 = vand.u32 2147483647, %v5003_v49 }
 0x978   : > { %v4016_v62 = vpop.eup %4015  ;;  %v5015_v25 = vadd.f32 %v3005_v51, %v3004_v58  ;;  %v3009_v28 = vadd.f32 %v3008_v32, %v3007_v34  ;;  %v2870_v31 = vmax.f32 %v2868_v3, %v2869_v2 }
 0x979   : > { %v3122_v54 = vsel %vm3121_vm14, %v4012_v5, %v3118_v22  ;;  %v3130_v47 = vmul.f32 %v4016_v62, %v5003_v49  ;;  %vm3135_vm0 = vweird.f32 %v4016_v62  ;;  %vm3139_vm5 = vcmp.eq.f32.partialorder %v3138_v13, 8.507059e+37 }
 0x97a   : > { %4019 = vrcp.f32 %v5015_v25  ;;  %v3010_v21 = vrot.slane %v3009_v28, 2  ;;  %v2871_v52 = vrot.slane %v2870_v31, 2  ;;  %v2772_v23 = vpop.xlane.xlu2 %2771  ;;  %v3127_v41 = vsel %vm3124_vm15, %v3126_v45, %v3122_v54  ;;  %vm3136_vm4 = vmor %vm3134_vm2, %vm3135_vm0 }
 0x97b   : > { %v5021_v30 = vadd.f32 %v4929_v14, %v2772_v23  ;;  %v3128_v18 = vmul.f32 %v4988_v16, %v3127_v41  ;;  %v3131_v58 = vsub.f32 1.0, %v3130_v47  ;;  %v3155_v13 = vand.u32 2147483648, %v5015_v25 }
 0x97c   : > { %v3011_v34 = vadd.f32 %v3010_v21, %v3009_v28  ;;  %v2872_v36 = vmax.f32 %v2870_v31, %v2871_v52  ;;  %v3141_v21 = vor.u32 1.1754944e-38, %v3140_v35  ;;  %vm3149_vm7 = vweird.f32 %v5015_v25 }
 0x97d   : > { %v5025_v5 = vpop.eup %4017  ;;  %v2875_v15 = vsel %vm2811_vm3, %v5021_v30, -inf  ;;  %3336 = vperm.xlu0 %3990, %v3128_v18   ;;  %v3132_v3 = vmul.f32 %v4016_v62, %v3131_v58 }
 0x97e   : > { %v3012_v51 = vrot.slane %v3011_v34, 1  ;;  %v3014_v32 = vsel %vm2811_vm3, %v5025_v5, 0.0  ;;  %v2873_v16 = vrot.slane %v2872_v36, 1  ;;  %v2876_v2 = vrot.slane %v2875_v15, 4 }
 0x97f   : > { %v3015_v22 = vrot.slane %v3014_v32, 4  ;;  %v3133_v28 = vadd.f32 %v4016_v62, %v3132_v3 }
 0x980   : > { %v4020_v31 = vpop.eup %4019  ;;  %v5033_v45 = vadd.f32 %v3012_v51, %v3011_v34  ;;  %v2874_v54 = vmax.f32 %v2872_v36, %v2873_v16  ;;  %v2877_v47 = vmax.f32 %v2875_v15, %v2876_v2 }
 0x981   : > { %v3016_v52 = vadd.f32 %v3015_v22, %v3014_v32  ;;  %v3137_v23 = vsel %vm3136_vm4, %v4016_v62, %v3133_v28  ;;  %v3145_v41 = vmul.f32 %v4020_v31, %v5015_v25  ;;  %v3153_v62 = vand.u32 2147483647, %v5015_v25 }
 0x982   : > { %4021 = vrcp.f32 %v5033_v45  ;;  %v2932_v18 = vsub.f32 %v5007_v50, %v2874_v54  ;;  %v2878_v58 = vrot.slane %v2877_v47, 2  ;;  %v2775_v3 = vpop.xlane.xlu2 %2774  ;;  %v3142_v43 = vsel %vm3139_vm5, %v3141_v21, %v3137_v23 }
 0x983   : > { %v3017_v49 = vrot.slane %v3016_v52, 2  ;;  %v5039_v34 = vadd.f32 %v4929_v14, %v2775_v3  ;;  %v3143_v36 = vmul.f32 %v4994_v53, %v3142_v43  ;;  %v3146_v15 = vsub.f32 1.0, %v3145_v41 }
 0x984   : > { %v2956_v35 = vmul.f32 1.442695, %v2932_v18  ;;  %v2879_v51 = vmax.f32 %v2877_v47, %v2878_v58  ;;  %vm3150_vm6 = vweird.f32 %v4020_v31  ;;  %v3156_v21 = vor.u32 1.1754944e-38, %v3155_v13 }
 0x985   : > { %v3018_v32 = vadd.f32 %v3017_v49, %v3016_v52  ;;  %v2882_v50 = vsel %vm2811_vm3, %v5039_v34, -inf  ;;  %3341 = vperm.xlu1 %3988, %v3143_v36   ;;  %v3147_v16 = vmul.f32 %v4020_v31, %v3146_v15  ;;  %vm3151_vm8 = vmor %vm3149_vm7, %vm3150_vm6  ;;  %vm3154_vm9 = vcmp.eq.f32.partialorder %v3153_v62, 8.507059e+37 }
 0x986   : > { %4023 = vpow2.f32 %v2956_v35  ;;  %v2880_v2 = vrot.slane %v2879_v51, 1  ;;  %v2883_v22 = vrot.slane %v2882_v50, 4  ;;  %v3168_v62 = vand.u32 2147483647, %v5033_v45 }
 0x987   : > { %v3019_v28 = vrot.slane %v3018_v32, 1  ;;  %v3148_v54 = vadd.f32 %v4020_v31, %v3147_v16  ;;  %v3170_v13 = vand.u32 2147483648, %v5033_v45  ;;  %vm3164_vm11 = vweird.f32 %v5033_v45 }
 0x988   : > { %v4022_v43 = vpop.eup %4021  ;;  %v2881_v53 = vmax.f32 %v2879_v51, %v2880_v2  ;;  %v2884_v47 = vmax.f32 %v2882_v50, %v2883_v22  ;;  %vm3169_vm13 = vcmp.eq.f32.partialorder %v3168_v62, 8.507059e+37 }
 0x989   : > { %v5047_v23 = vadd.f32 %v3019_v28, %v3018_v32  ;;  %v3152_v52 = vsel %vm3151_vm8, %v4020_v31, %v3148_v54  ;;  %v3160_v41 = vmul.f32 %v4022_v43, %v5033_v45  ;;  %vm3165_vm10 = vweird.f32 %v4022_v43 }
 0x98a   : > { %v2933_v18 = vsub.f32 %v5021_v30, %v2881_v53  ;;  %v2885_v58 = vrot.slane %v2884_v47, 2  ;;  %v2778_v3 = vpop.xlane.xlu1 %2777  ;;  %v3157_v49 = vsel %vm3154_vm9, %v3156_v21, %v3152_v52  ;;  %vm3166_vm12 = vmor %vm3164_vm11, %vm3165_vm10 }
 0x98b   : > { %4025 = vrcp.f32 %v5047_v23  ;;  %v5053_v25 = vadd.f32 %v4929_v14, %v2778_v3  ;;  %v3158_v36 = vmul.f32 %v4999_v7, %v3157_v49  ;;  %v3161_v15 = vsub.f32 1.0, %v3160_v41 }
 0x98c   : > { %v5056_v35 = vpop.eup %4023  ;;  %v2958_v51 = vmul.f32 1.442695, %v2933_v18  ;;  %v2886_v31 = vmax.f32 %v2884_v47, %v2885_v58  ;;  %v3171_v47 = vor.u32 1.1754944e-38, %v3170_v13  ;;  %vm3179_vm15 = vweird.f32 %v5047_v23 }
 0x98d   : > { %v3028_v30 = vsel %vm2811_vm3, %v5056_v35, 0.0  ;;  %v2889_v32 = vsel %vm2811_vm3, %v5053_v25, -inf  ;;  %3346 = vperm.xlu2 %3989, %v3158_v36   ;;  %v3162_v50 = vmul.f32 %v4022_v43, %v3161_v15 }
 0x98e   : > { %v3029_v16 = vrot.slane %v3028_v30, 4  ;;  %4027 = vpow2.f32 %v2958_v51  ;;  %v2887_v7 = vrot.slane %v2886_v31, 1  ;;  %v2890_v2 = vrot.slane %v2889_v32, 4 }
 0x98f   : > { %v3163_v22 = vadd.f32 %v4022_v43, %v3162_v50 }
 0x990   : > { %v3030_v28 = vadd.f32 %v3029_v16, %v3028_v30  ;;  %v2888_v54 = vmax.f32 %v2886_v31, %v2887_v7  ;;  %v2891_v53 = vmax.f32 %v2889_v32, %v2890_v2  ;;  %v3185_v32 = vand.u32 2147483648, %v5047_v23 }
 0x991   : > { %v4026_v21 = vpop.eup %4025  ;;  %v3167_v52 = vsel %vm3166_vm12, %v4022_v43, %v3163_v22  ;;  %v3183_v22 = vand.u32 2147483647, %v5047_v23 }
 0x992   : > { %v3031_v41 = vrot.slane %v3030_v28, 2  ;;  %v2934_v18 = vsub.f32 %v5039_v34, %v2888_v54  ;;  %v2892_v58 = vrot.slane %v2891_v53, 2  ;;  %v2781_v3 = vpop.xlane.xlu0 %2780  ;;  %v3172_v49 = vsel %vm3169_vm13, %v3171_v47, %v3167_v52 }
 0x993   : > { %v5067_v36 = vadd.f32 %v4929_v14, %v2781_v3  ;;  %v3173_v15 = vmul.f32 %v5009_v24, %v3172_v49  ;;  %v3175_v45 = vmul.f32 %v4026_v21, %v5047_v23  ;;  %vm3180_vm14 = vweird.f32 %v4026_v21 }
 0x994   : > { %v5071_v51 = vpop.eup %4027  ;;  %v3032_v31 = vadd.f32 %v3031_v41, %v3030_v28  ;;  %v2960_v13 = vmul.f32 1.442695, %v2934_v18  ;;  %v2893_v30 = vmax.f32 %v2891_v53, %v2892_v58  ;;  %vm3181_vm0 = vmor %vm3179_vm15, %vm3180_vm14  ;;  %v3186_v3 = vor.u32 1.1754944e-38, %v3185_v32 }
 0x995   : > { %v3035_v43 = vsel %vm2811_vm3, %v5071_v51, 0.0  ;;  %v2896_v34 = vsel %vm2811_vm3, %v5067_v36, -inf  ;;  %3351 = vperm.xlu1 %3988, %v3173_v15   ;;  %v3176_v62 = vsub.f32 1.0, %v3175_v45  ;;  %vm3184_vm2 = vcmp.eq.f32.partialorder %v3183_v22, 8.507059e+37 }
 0x996   : > { %v3033_v50 = vrot.slane %v3032_v31, 1  ;;  %v3036_v16 = vrot.slane %v3035_v43, 4  ;;  %4029 = vpow2.f32 %v2960_v13  ;;  %v2894_v24 = vrot.slane %v2893_v30, 1 }
 0x997   : > { %v2897_v7 = vrot.slane %v2896_v34, 4  ;;  %v3177_v2 = vmul.f32 %v4026_v21, %v3176_v62 }
 0x998   : > { %v5079_v28 = vadd.f32 %v3033_v50, %v3032_v31  ;;  %v3037_v54 = vadd.f32 %v3036_v16, %v3035_v43  ;;  %v2895_v53 = vmax.f32 %v2893_v30, %v2894_v24 }
 0x999   : > { %v2898_v47 = vmax.f32 %v2896_v34, %v2897_v7  ;;  %v3178_v52 = vadd.f32 %v4026_v21, %v3177_v2 }
 0x99a   : > { %4031 = vrcp.f32 %v5079_v28  ;;  %v3038_v41 = vrot.slane %v3037_v54, 2  ;;  %v2935_v18 = vsub.f32 %v5053_v25, %v2895_v53  ;;  %v2784_v58 = vpop.xlane.xlu2 %2783  ;;  %v3215_v23 = vand.u32 2147483648, %v5079_v28 }
 0x99b   : > { %v2899_v49 = vrot.slane %v2898_v47, 2  ;;  %v5085_v15 = vadd.f32 %v4929_v14, %v2784_v58  ;;  %v3182_v45 = vsel %vm3181_vm0, %v4026_v21, %v3178_v52  ;;  %v3213_v7 = vand.u32 2147483647, %v5079_v28 }
 0x99c   : > { %v5087_v31 = vpop.eup %4029  ;;  %v3039_v13 = vadd.f32 %v3038_v41, %v3037_v54  ;;  %v2962_v30 = vmul.f32 1.442695, %v2935_v18  ;;  %v3187_v43 = vsel %vm3184_vm2, %v3186_v3, %v3182_v45  ;;  %vm3209_vm4 = vweird.f32 %v5079_v28 }
 0x99d   : > { %v3042_v34 = vsel %vm2811_vm3, %v5087_v31, 0.0  ;;  %v2900_v25 = vmax.f32 %v2898_v47, %v2899_v49  ;;  %v2903_v62 = vsel %vm2811_vm3, %v5085_v15, -inf  ;;  %v3188_v32 = vmul.f32 %v5025_v5, %v3187_v43 }
 0x99e   : > { %v3040_v50 = vrot.slane %v3039_v13, 1  ;;  %v3043_v16 = vrot.slane %v3042_v34, 4  ;;  %4033 = vpow2.f32 %v2962_v30  ;;  %v2904_v21 = vrot.slane %v2903_v62, 4 }
 0x99f   : > { %v2901_v24 = vrot.slane %v2900_v25, 1  ;;  %3356 = vperm.xlu0 %3990, %v3188_v32   ;;  %v3216_v3 = vor.u32 1.1754944e-38, %v3215_v23  ;;  %vm5108_vm5 = vcmp.eq.f32.partialorder %v3213_v7, 8.507059e+37 }
 0x9a0   : > { %v4032_v2 = vpop.eup %4031  ;;  %v5096_v22 = vadd.f32 %v3040_v50, %v3039_v13  ;;  %v3044_v54 = vadd.f32 %v3043_v16, %v3042_v34  ;;  %v2905_v53 = vmax.f32 %v2903_v62, %v2904_v21 }
 0x9a1   : > { %v2902_v52 = vmax.f32 %v2900_v25, %v2901_v24  ;;  %v3205_v47 = vmul.f32 %v4032_v2, %v5079_v28  ;;  %vm3210_vm6 = vweird.f32 %v4032_v2 }
 0x9a2   : > { %4035 = vrcp.f32 %v5096_v22  ;;  %v3045_v5 = vrot.slane %v3044_v54, 2  ;;  %v2906_v41 = vrot.slane %v2905_v53, 2  ;;  %v2766_v18 = vpop.xlane.xlu2 %2765  ;;  %v2787_v58 = vpop.xlane.xlu1 %2786  ;;  %v3228_v23 = vand.u32 2147483647, %v5096_v22  ;;  %vm3211_vm9 = vmor %vm3209_vm4, %vm3210_vm6 }
 0x9a3   : > { %v2936_v49 = vsub.f32 %v5067_v36, %v2902_v52  ;;  %v5103_v45 = vadd.f32 %v4929_v14, %v2766_v18  ;;  %v5106_v13 = vadd.f32 %v4929_v14, %v2787_v58  ;;  %v3206_v30 = vsub.f32 1.0, %v3205_v47 }
 0x9a4   : > { %v5112_v34 = vpop.eup %4033  ;;  %v3046_v25 = vadd.f32 %v3045_v5, %v3044_v54  ;;  %v2907_v62 = vmax.f32 %v2905_v53, %v2906_v41  ;;  %vm3224_vm7 = vweird.f32 %v5096_v22  ;;  %v3230_v47 = vand.u32 2147483648, %v5096_v22 }
 0x9a5   : > { %v3049_v36 = vsel %vm2811_vm3, %v5112_v34, 0.0  ;;  %v2964_v32 = vmul.f32 1.442695, %v2936_v49  ;;  %v2861_v50 = vsel %vm2811_vm3, %v5103_v45, -inf  ;;  %v2910_v16 = vsel %vm2811_vm3, %v5106_v13, -inf }
 0x9a6   : > { %v3047_v21 = vrot.slane %v3046_v25, 1  ;;  %v3050_v24 = vrot.slane %v3049_v36, 4  ;;  %v2908_v7 = vrot.slane %v2907_v62, 1  ;;  %v2862_v52 = vrot.slane %v2861_v50, 4 }
 0x9a7   : > { %4037 = vpow2.f32 %v2964_v32  ;;  %v2911_v54 = vrot.slane %v2910_v16, 4  ;;  %v3207_v53 = vmul.f32 %v4032_v2, %v3206_v30  ;;  %vm3229_vm11 = vcmp.eq.f32.partialorder %v3228_v23, 8.507059e+37 }
 0x9a8   : > { %v4036_v5 = vpop.eup %4035  ;;  %v5123_v41 = vadd.f32 %v3047_v21, %v3046_v25  ;;  %v3051_v18 = vadd.f32 %v3050_v24, %v3049_v36  ;;  %v2909_v58 = vmax.f32 %v2907_v62, %v2908_v7  ;;  %v2863_v49 = vmax.f32 %v2861_v50, %v2862_v52 }
 0x9a9   : > { %v2912_v59 = vmax.f32 %v2910_v16, %v2911_v54  ;;  %v3208_v44 = vadd.f32 %v4032_v2, %v3207_v53  ;;  %v3220_v56 = vmul.f32 %v4036_v5, %v5096_v22  ;;  %vm3225_vm8 = vweird.f32 %v4036_v5 }
 0x9aa   : > { %4039 = vrcp.f32 %v5123_v41  ;;  %v3052_v32 = vrot.slane %v3051_v18, 2  ;;  %v2937_v30 = vsub.f32 %v5085_v15, %v2909_v58  ;;  %v2864_v37 = vrot.slane %v2863_v49, 2  ;;  %v2790_v55 = vpop.xlane.xlu0 %2789  ;;  %vm3226_vm10 = vmor %vm3224_vm7, %vm3225_vm8 }
 0x9ab   : > { %v2913_v25 = vrot.slane %v2912_v59, 2  ;;  %v5132_v62 = vadd.f32 %v4929_v14, %v2790_v55  ;;  %v3212_v36 = vsel %vm3211_vm9, %v4032_v2, %v3208_v44  ;;  %v3221_v50 = vsub.f32 1.0, %v3220_v56 }
 0x9ac   : > { %v3053_v16 = vadd.f32 %v3052_v32, %v3051_v18  ;;  %v2966_v21 = vmul.f32 1.442695, %v2937_v30  ;;  %v2865_v24 = vmax.f32 %v2863_v49, %v2864_v37  ;;  %v3217_v7 = vsel %vm5108_vm5, %v3216_v3, %v3212_v36 }
 0x9ad   : > { %v5136_v52 = vpop.eup %4037  ;;  %v2914_v15 = vmax.f32 %v2912_v59, %v2913_v25  ;;  %v2917_v54 = vsel %vm2811_vm3, %v5132_v62, -inf  ;;  %v3218_v28 = vmul.f32 %v5056_v35, %v3217_v7  ;;  %v3222_v53 = vmul.f32 %v4036_v5, %v3221_v50 }
 0x9ae   : > { %v3054_v58 = vrot.slane %v3053_v16, 1  ;;  %v3056_v55 = vsel %vm2811_vm3, %v5136_v52, 0.0  ;;  %4041 = vpow2.f32 %v2966_v21  ;;  %v2866_v14 = vrot.slane %v2865_v24, 1 }
 0x9af   : > { %v3057_v56 = vrot.slane %v3056_v55, 4  ;;  %v2915_v37 = vrot.slane %v2914_v15, 1  ;;  %v2918_v44 = vrot.slane %v2917_v54, 4  ;;  %3366 = vperm.xlu2 %3989, %v3218_v28   ;;  %v3223_v2 = vadd.f32 %v4036_v5, %v3222_v53 }
 0x9b0   : > { %v4040_v3 = vpop.eup %4039  ;;  %v5143_v43 = vadd.f32 %v3054_v58, %v3053_v16  ;;  %v2867_v59 = vmax.f32 %v2865_v24, %v2866_v14  ;;  %v3231_v35 = vor.u32 1.1754944e-38, %v3230_v47  ;;  %vm3239_vm13 = vweird.f32 %v5123_v41 }
 0x9b1   : > { %v3058_v18 = vadd.f32 %v3057_v56, %v3056_v55  ;;  %v2916_v49 = vmax.f32 %v2914_v15, %v2915_v37  ;;  %v2919_v32 = vmax.f32 %v2917_v54, %v2918_v44  ;;  %v3227_v30 = vsel %vm3226_vm10, %v4036_v5, %v3223_v2 }
 0x9b2   : > { %4043 = vrcp.f32 %v5143_v43  ;;  %v2931_v25 = vsub.f32 %v5103_v45, %v2867_v59  ;;  %v3232_v36 = vsel %vm3229_vm11, %v3231_v35, %v3227_v30  ;;  %v3235_v50 = vmul.f32 %v4040_v3, %v5123_v41 }
 0x9b3   : > { %v3059_v16 = vrot.slane %v3058_v18, 2  ;;  %v2938_v21 = vsub.f32 %v5106_v13, %v2916_v49  ;;  %v2920_v24 = vrot.slane %v2919_v32, 2  ;;  %v3233_v22 = vmul.f32 %v5071_v51, %v3232_v36 }
 0x9b4   : > { %v5153_v7 = vpop.eup %4041  ;;  %v2954_v23 = vmul.f32 1.442695, %v2931_v25  ;;  %v3236_v47 = vsub.f32 1.0, %v3235_v50  ;;  %vm3240_vm12 = vweird.f32 %v4040_v3  ;;  %v3243_v13 = vand.u32 2147483647, %v5123_v41 }
 0x9b5   : > { %v3060_v15 = vadd.f32 %v3059_v16, %v3058_v18  ;;  %v3063_v5 = vsel %vm2811_vm3, %v5153_v7, 0.0  ;;  %v2968_v54 = vmul.f32 1.442695, %v2938_v21  ;;  %v2921_v45 = vmax.f32 %v2919_v32, %v2920_v24  ;;  %3371 = vperm.xlu1 %3988, %v3233_v22   ;;  %vm3241_vm14 = vmor %vm3239_vm13, %vm3240_vm12 }
 0x9b6   : > { %v3064_v28 = vrot.slane %v3063_v5, 4  ;;  %4045 = vpow2.f32 %v2954_v23  ;;  %v3237_v53 = vmul.f32 %v4040_v3, %v3236_v47  ;;  %v3245_v55 = vand.u32 2147483648, %v5123_v41 }
 0x9b7   : > { %v3061_v58 = vrot.slane %v3060_v15, 1  ;;  %4047 = vpow2.f32 %v2968_v54  ;;  %v2922_v51 = vrot.slane %v2921_v45, 1  ;;  %vm3244_vm15 = vcmp.eq.f32.partialorder %v3243_v13, 8.507059e+37 }
 0x9b8   : > { %v4044_v14 = vpop.eup %4043  ;;  %v3065_v56 = vadd.f32 %v3064_v28, %v3063_v5  ;;  %v3238_v37 = vadd.f32 %v4040_v3, %v3237_v53  ;;  %v3246_v59 = vor.u32 1.1754944e-38, %v3245_v55  ;;  %v3260_v22 = vand.u32 2147483648, %v5143_v43 }
 0x9b9   : > { %v5160_v44 = vadd.f32 %v3061_v58, %v3060_v15  ;;  %v2923_v2 = vmax.f32 %v2921_v45, %v2922_v51  ;;  %v3250_v35 = vmul.f32 %v4044_v14, %v5143_v43  ;;  %vm3255_vm0 = vweird.f32 %v4044_v14 }
 0x9ba   : > { %v3066_v18 = vrot.slane %v3065_v56, 2  ;;  %v3242_v49 = vsel %vm3241_vm14, %v4040_v3, %v3238_v37  ;;  %v3258_v3 = vand.u32 2147483647, %v5143_v43  ;;  %vm3254_vm2 = vweird.f32 %v5143_v43 }
 0x9bb   : > { %4049 = vrcp.f32 %v5160_v44  ;;  %v2939_v32 = vsub.f32 %v5132_v62, %v2923_v2  ;;  %v3247_v30 = vsel %vm3244_vm15, %v3246_v59, %v3242_v49  ;;  %v3251_v50 = vsub.f32 1.0, %v3250_v35  ;;  %vm3256_vm4 = vmor %vm3254_vm2, %vm3255_vm0 }
 0x9bc   : > { %v5166_v25 = vpop.eup %4045  ;;  %v3067_v36 = vadd.f32 %v3066_v18, %v3065_v56  ;;  %v3248_v41 = vmul.f32 %v5087_v31, %v3247_v30  ;;  %vm3259_vm5 = vcmp.eq.f32.partialorder %v3258_v3, 8.507059e+37  ;;  %v3261_v13 = vor.u32 1.1754944e-38, %v3260_v22 }
 0x9bd   : > { %v5169_v16 = vpop.eup %4047  ;;  %v3021_v21 = vsel %vm2811_vm3, %v5166_v25, 0.0  ;;  %v2970_v24 = vmul.f32 1.442695, %v2939_v32  ;;  %v3252_v15 = vmul.f32 %v4044_v14, %v3251_v50  ;;  %v3275_v49 = vand.u32 2147483648, %v5160_v44 }
 0x9be   : > { %v3068_v23 = vrot.slane %v3067_v36, 1  ;;  %v3022_v62 = vrot.slane %v3021_v21, 4  ;;  %v3070_v47 = vsel %vm2811_vm3, %v5169_v16, 0.0  ;;  %3376 = vperm.xlu2 %3989, %v3248_v41   ;;  %vm3269_vm7 = vweird.f32 %v5160_v44 }
 0x9bf   : > { %v3071_v31 = vrot.slane %v3070_v47, 4  ;;  %4051 = vpow2.f32 %v2970_v24  ;;  %v3253_v45 = vadd.f32 %v4044_v14, %v3252_v15 }
 0x9c0   : > { %v5177_v5 = vadd.f32 %v3068_v23, %v3067_v36  ;;  %v3023_v54 = vadd.f32 %v3022_v62, %v3021_v21  ;;  %v3273_v36 = vand.u32 2147483647, %v5160_v44  ;;  %v3276_v23 = vor.u32 1.1754944e-38, %v3275_v49 }
 0x9c1   : > { %v4050_v28 = vpop.eup %4049  ;;  %v3072_v53 = vadd.f32 %v3071_v31, %v3070_v47  ;;  %v3257_v51 = vsel %vm3256_vm4, %v4044_v14, %v3253_v45 }
 0x9c2   : > { %4053 = vrcp.f32 %v5177_v5  ;;  %v3024_v58 = vrot.slane %v3023_v54, 2  ;;  %v3265_v55 = vmul.f32 %v4050_v28, %v5160_v44  ;;  %v3262_v37 = vsel %vm3259_vm5, %v3261_v13, %v3257_v51 }
 0x9c3   : > { %v3073_v56 = vrot.slane %v3072_v53, 2  ;;  %v3263_v59 = vmul.f32 %v5112_v34, %v3262_v37  ;;  %vm3270_vm6 = vweird.f32 %v4050_v28  ;;  %v3290_v13 = vand.u32 2147483648, %v5177_v5 }
 0x9c4   : > { %v3025_v2 = vadd.f32 %v3024_v58, %v3023_v54  ;;  %v3266_v35 = vsub.f32 1.0, %v3265_v55  ;;  %vm3271_vm8 = vmor %vm3269_vm7, %vm3270_vm6  ;;  %v3288_v58 = vand.u32 2147483647, %v5177_v5  ;;  %vm3284_vm10 = vweird.f32 %v5177_v5 }
 0x9c5   : > { %v5184_v18 = vpop.eup %4051  ;;  %v3074_v43 = vadd.f32 %v3073_v56, %v3072_v53  ;;  %3381 = vperm.xlu0 %3990, %v3263_v59  }
 0x9c6   : > { %v3026_v32 = vrot.slane %v3025_v2, 1  ;;  %v3077_v30 = vsel %vm2811_vm3, %v5184_v18, 0.0  ;;  %v3267_v14 = vmul.f32 %v4050_v28, %v3266_v35  ;;  %vm3274_vm3 = vcmp.eq.f32.partialorder %v3273_v36, 8.507059e+37 }
 0x9c7   : > { %v3075_v41 = vrot.slane %v3074_v43, 1  ;;  %v3078_v50 = vrot.slane %v3077_v30, 4  ;;  %vm3289_vm12 = vcmp.eq.f32.partialorder %v3288_v58, 8.507059e+37 }
 0x9c8   : > { %v4054_v21 = vpop.eup %4053  ;;  %v3027_v24 = vadd.f32 %v3026_v32, %v3025_v2  ;;  %v3268_v34 = vadd.f32 %v4050_v28, %v3267_v14  ;;  %v3291_v2 = vor.u32 1.1754944e-38, %v3290_v13 }
 0x9c9   : > { %v3076_v3 = vadd.f32 %v3075_v41, %v3074_v43  ;;  %v3079_v22 = vadd.f32 %v3078_v50, %v3077_v30  ;;  %v3280_v62 = vmul.f32 %v4054_v21, %v5177_v5  ;;  %vm3285_vm9 = vweird.f32 %v4054_v21 }
 0x9ca   : > { %4055 = vrcp.f32 %v3027_v24  ;;  %v3272_v47 = vsel %vm3271_vm8, %v4050_v28, %v3268_v34  ;;  %vm3286_vm11 = vmor %vm3284_vm10, %vm3285_vm9  ;;  %v3200_v30 = vand.u32 2147483648, %v3027_v24  ;;  %v3198_v41 = vand.u32 2147483647, %v3027_v24 }
 0x9cb   : > { %4057 = vrcp.f32 %v3076_v3  ;;  %v3080_v15 = vrot.slane %v3079_v22, 2  ;;  %v3277_v31 = vsel %vm3274_vm3, %v3276_v23, %v3272_v47  ;;  %v3281_v45 = vsub.f32 1.0, %v3280_v62 }
 0x9cc   : > { %v3278_v54 = vmul.f32 %v5136_v52, %v3277_v31  ;;  %v3305_v50 = vand.u32 2147483648, %v3076_v3  ;;  %v3303_v34 = vand.u32 2147483647, %v3076_v3  ;;  %vm3194_vm15 = vweird.f32 %v3027_v24 }
 0x9cd   : > { %v3081_v53 = vadd.f32 %v3080_v15, %v3079_v22  ;;  %v3282_v44 = vmul.f32 %v4054_v21, %v3281_v45  ;;  %vm3299_vm2 = vweird.f32 %v3076_v3  ;;  %vm3199_vm4 = vcmp.eq.f32.partialorder %v3198_v41, 8.507059e+37 }
 0x9ce   : > { %3386 = vperm.xlu1 %3988, %v3278_v54   ;;  %vm3304_vm6 = vcmp.eq.f32.partialorder %v3303_v34, 8.507059e+37  ;;  %vm3548_vm10 = vcmask 1041409  }
 0x9cf   : > { %v3082_v51 = vrot.slane %v3081_v53, 1  ;;  %v3283_v56 = vadd.f32 %v4054_v21, %v3282_v44 }
 0x9d0   : > { %v4056_v55 = vpop.eup %4055 }
 0x9d1   : > { %v4058_v28 = vpop.eup %4057  ;;  %v3083_v37 = vadd.f32 %v3082_v51, %v3081_v53  ;;  %v3190_v59 = vmul.f32 %v4056_v55, %v3027_v24  ;;  %v3287_v52 = vsel %vm3286_vm11, %v4054_v21, %v3283_v56  ;;  %vm3195_vm13 = vweird.f32 %v4056_v55 }
 0x9d2   : > { %v3295_v35 = vmul.f32 %v4058_v28, %v3076_v3  ;;  %v3292_v43 = vsel %vm3289_vm12, %v3291_v2, %v3287_v52  ;;  %vm3300_vm14 = vweird.f32 %v4058_v28  ;;  %vm3196_vm0 = vmor %vm3194_vm15, %vm3195_vm13  ;;  %v3201_v21 = vor.u32 1.1754944e-38, %v3200_v30 }
 0x9d3   : > { %4059 = vrcp.f32 %v3083_v37  ;;  %v3191_v49 = vsub.f32 1.0, %v3190_v59  ;;  %v3293_v32 = vmul.f32 %v5153_v7, %v3292_v43  ;;  %vm3301_vm5 = vmor %vm3299_vm2, %vm3300_vm14  ;;  %v3306_v7 = vor.u32 1.1754944e-38, %v3305_v50  ;;  %v3327_v59 = vpop.permute.xlu1 %3326 }
 0x9d4   : > { %v3296_v14 = vsub.f32 1.0, %v3295_v35  ;;  %v3320_v24 = vand.u32 2147483648, %v3083_v37  ;;  %v3318_v3 = vand.u32 2147483647, %v3083_v37  ;;  %vm3314_vm8 = vweird.f32 %v3083_v37 }
 0x9d5   : > { %v3192_v36 = vmul.f32 %v4056_v55, %v3191_v49  ;;  %3391 = vperm.xlu2 %3989, %v3293_v32   ;;  %v3404_v49 = vmul.f32 %v3327_v59, %v2707_v39  ;;  %vm3550_vm11 = vcmask 1042434   ;;  %vm3552_vm12 = vcmask 1043459  }
 0x9d6   : > { %v3297_v5 = vmul.f32 %v4058_v28, %v3296_v14  ;;  %vm3319_vm9 = vcmp.eq.f32.partialorder %v3318_v3, 8.507059e+37  ;;  %vm3554_vm13 = vcmask 1044484   ;;  %vm3556_vm14 = vcmask 1045509  }
 0x9d7   : > { %v3193_v22 = vadd.f32 %v4056_v55, %v3192_v36  ;;  %v3420_v14 = vsel %vm892_vm1, %v3404_v49, 0.0  ;;  %vm3558_vm15 = vcmask 1046534  }
 0x9d8   : > { %v3298_v23 = vadd.f32 %v4058_v28, %v3297_v5  ;;  %v3421_v6 = vrot.slane %v3420_v14, 4 }
 0x9d9   : > { %v4060_v62 = vpop.eup %4059  ;;  %v3197_v47 = vsel %vm3196_vm0, %v4056_v55, %v3193_v22  ;;  %v3321_v55 = vor.u32 1.1754944e-38, %v3320_v24  ;;  %vm3560_vm0 = vcmask 1047559  }
 0x9da   : > { %v3202_v15 = vsel %vm3199_vm4, %v3201_v21, %v3197_v47  ;;  %v3302_v31 = vsel %vm3301_vm5, %v4058_v28, %v3298_v23  ;;  %v3310_v54 = vmul.f32 %v4060_v62, %v3083_v37  ;;  %vm3315_vm7 = vweird.f32 %v4060_v62 }
 0x9db   : > { %v3203_v45 = vmul.f32 %v5166_v25, %v3202_v15  ;;  %v3307_v53 = vsel %vm3304_vm6, %v3306_v7, %v3302_v31  ;;  %vm3316_vm3 = vmor %vm3314_vm8, %vm3315_vm7  ;;  %v3332_v25 = vpop.permute.xlu2 %3331  ;;  %v3422_v22 = vadd.f32 %v3421_v6, %v3420_v14 }
 0x9dc   : > { %v3308_v13 = vmul.f32 %v5169_v16, %v3307_v53  ;;  %v3311_v44 = vsub.f32 1.0, %v3310_v54  ;;  %v3405_v37 = vmul.f32 %v3332_v25, %v2708_v26 }
 0x9dd   : > { %3361 = vperm.xlu2 %3989, %v3203_v45   ;;  %v3423_v8 = vrot.slane %v3422_v22, 2 }
 0x9de   : > { %3396 = vperm.xlu1 %3988, %v3308_v13   ;;  %v3312_v58 = vmul.f32 %v4060_v62, %v3311_v44  ;;  %v3427_v41 = vsel %vm892_vm1, %v3405_v37, 0.0 }
 0x9df   : > { %v3428_v61 = vrot.slane %v3427_v41, 4  ;;  %v3424_v13 = vadd.f32 %v3423_v8, %v3422_v22 }
 0x9e0   : > { %v3313_v51 = vadd.f32 %v4060_v62, %v3312_v58 }
 0x9e2   : > { %v3317_v56 = vsel %vm3316_vm3, %v4060_v62, %v3313_v51 }
 0x9e3   : > { %v3322_v28 = vsel %vm3319_vm9, %v3321_v55, %v3317_v56  ;;  %v3425_v56 = vrot.slane %v3424_v13, 1 }
 0x9e4   : > { %v3323_v2 = vmul.f32 %v5184_v18, %v3322_v28 }
 0x9e6   : > { %3401 = vperm.xlu0 %3990, %v3323_v2  }
 0x9e7   : > { %v3347_v16 = vpop.permute.xlu2 %3346 }
 0x9e8   : > { %v3408_v26 = vmul.f32 %v3347_v16, %v2711_v19 }
 0x9ea   : > { %v3448_v21 = vsel %vm892_vm1, %v3408_v26, 0.0 }
 0x9eb   : > { %v3449_v19 = vrot.slane %v3448_v21, 4 }
 0x9ed   : > { %v3450_v45 = vadd.f32 %v3449_v19, %v3448_v21 }
 0x9ef   : > { %v3337_v35 = vpop.permute.xlu0 %3336  ;;  %v3451_v51 = vrot.slane %v3450_v45, 2 }
 0x9f0   : > { %v3406_v32 = vmul.f32 %v3337_v35, %v2709_v57 }
 0x9f1   : > { %v3452_v49 = vadd.f32 %v3451_v51, %v3450_v45  ;;  %v5316_v45 = vmax.f32 %v4942_v1, 0.0  ;;  %v5317_v1 = vmax.f32 %v4956_v46, 0.0  ;;  %v5318_v46 = vmax.f32 %v4968_v33, 0.0 }
 0x9f2   : > { %v3434_v50 = vsel %vm892_vm1, %v3406_v32, 0.0 }
 0x9f7   : > { %v3342_v52 = vpop.permute.xlu1 %3341 }
 0x9f8   : > { %v3407_v18 = vmul.f32 %v3342_v52, %v2710_v29  ;;  %v3435_v29 = vrot.slane %v3434_v50, 4 }
 0x9fa   : > { %v3441_v10 = vsel %vm892_vm1, %v3407_v18, 0.0  ;;  %v3436_v23 = vadd.f32 %v3435_v29, %v3434_v50  ;;  %v3426_v18 = vadd.f32 %v3425_v56, %v3424_v13  ;;  %v3453_v50 = vrot.slane %v3452_v49, 1 }
 0x9fb   : > { %v3442_v5 = vrot.slane %v3441_v10, 4 }
 0x9fc   : > { %v3437_v15 = vrot.slane %v3436_v23, 2 }
 0x9fd   : > { %v3443_v62 = vadd.f32 %v3442_v5, %v3441_v10 }
 0x9fe   : > { %v3438_v24 = vadd.f32 %v3437_v15, %v3436_v23 }
 0x9ff   : > { %v3444_v31 = vrot.slane %v3443_v62, 2 }
 0xa00   : > { %v3439_v25 = vrot.slane %v3438_v24, 1 }
 0xa01   : > { %v3445_v58 = vadd.f32 %v3444_v31, %v3443_v62  ;;  %v5314_v62 = vmax.f32 %v4913_v40, 0.0 }
 0xa03   : > { %v3446_v52 = vrot.slane %v3445_v58, 1 }
 0xa07   : > { %v3352_v30 = vpop.permute.xlu1 %3351 }
 0xa08   : > { %v3409_v39 = vmul.f32 %v3352_v30, %v2712_v63  ;;  %v3429_v63 = vadd.f32 %v3428_v61, %v3427_v41  ;;  %v3447_v41 = vadd.f32 %v3446_v52, %v3445_v58 }
 0xa09   : > { %v5201_v43 = vpop.permute.xlu2 %3366 }
 0xa0a   : > { %v3455_v34 = vsel %vm892_vm1, %v3409_v39, 0.0  ;;  %v3430_v7 = vrot.slane %v3429_v63, 2  ;;  %v3412_v29 = vmul.f32 %v5201_v43, %v2715_v20  ;;  %v5315_v43 = vmax.f32 %v4931_v42, 0.0 }
 0xa0b   : > { %v3456_v27 = vrot.slane %v3455_v34, 4 }
 0xa0c   : > { %v3431_v44 = vadd.f32 %v3430_v7, %v3429_v63  ;;  %v5313_v63 = vmax.f32 %v4921_v0, 0.0 }
 0xa0d   : > { %v3457_v54 = vadd.f32 %v3456_v27, %v3455_v34 }
 0xa0e   : > { %v3432_v2 = vrot.slane %v3431_v44, 1 }
 0xa0f   : > { %v3458_v3 = vrot.slane %v3457_v54, 2 }
 0xa10   : > { %v3433_v14 = vadd.f32 %v3432_v2, %v3431_v44 }
 0xa11   : > { %v3357_v36 = vpop.permute.xlu0 %3356  ;;  %v3459_v35 = vadd.f32 %v3458_v3, %v3457_v54 }
 0xa12   : > { %v3410_v48 = vmul.f32 %v3357_v36, %v2713_v60  ;;  %v3440_v36 = vadd.f32 %v3439_v25, %v3438_v24  ;;  %v3549_v6 = vsel %vm3548_vm10, %v3433_v14, %v3426_v18 }
 0xa13   : > { %v3460_v17 = vrot.slane %v3459_v35, 1 }
 0xa14   : > { %v3462_v9 = vsel %vm892_vm1, %v3410_v48, 0.0  ;;  %v3551_v61 = vsel %vm3550_vm11, %v3440_v36, %v3549_v6 }
 0xa15   : > { %v3463_v47 = vrot.slane %v3462_v9, 4  ;;  %v3553_v34 = vsel %vm3552_vm12, %v3447_v41, %v3551_v61  ;;  %v3461_v22 = vadd.f32 %v3460_v17, %v3459_v35 }
 0xa17   : > { %v3464_v53 = vadd.f32 %v3463_v47, %v3462_v9  ;;  %v3476_v47 = vsel %vm892_vm1, %v3412_v29, 0.0 }
 0xa18   : > { %v5221_v57 = vpop.permute.xlu2 %3376 }
 0xa19   : > { %v3465_v55 = vrot.slane %v3464_v53, 2  ;;  %v3414_v38 = vmul.f32 %v5221_v57, %v5314_v62  ;;  %v3477_v57 = vrot.slane %v3476_v47, 4 }
 0xa1b   : > { %v3466_v37 = vadd.f32 %v3465_v55, %v3464_v53  ;;  %v3490_v15 = vsel %vm892_vm1, %v3414_v38, 0.0  ;;  %v3478_v3 = vadd.f32 %v3477_v57, %v3476_v47 }
 0xa1c   : > { %v3491_v24 = vrot.slane %v3490_v15, 4 }
 0xa1d   : > { %v3467_v10 = vrot.slane %v3466_v37, 1  ;;  %v3479_v25 = vrot.slane %v3478_v3, 2 }
 0xa1f   : > { %v3468_v21 = vadd.f32 %v3467_v10, %v3466_v37  ;;  %v3480_v18 = vadd.f32 %v3479_v25, %v3478_v3 }
 0xa21   : > { %v3481_v10 = vrot.slane %v3480_v18, 1 }
 0xa27   : > { %v3372_v59 = vpop.permute.xlu1 %3371 }
 0xa28   : > { %v3413_v39 = vmul.f32 %v3372_v59, %v2716_v12  ;;  %v3454_v12 = vadd.f32 %v3453_v50, %v3452_v49 }
 0xa2a   : > { %v3483_v9 = vsel %vm892_vm1, %v3413_v39, 0.0  ;;  %v3555_v19 = vsel %vm3554_vm13, %v3454_v12, %v3553_v34  ;;  %v3482_v12 = vadd.f32 %v3481_v10, %v3480_v18 }
 0xa2b   : > { %v3557_v8 = vsel %vm3556_vm14, %v3461_v22, %v3555_v19  ;;  %v3484_v7 = vrot.slane %v3483_v9, 4 }
 0xa2c   : > { %v3559_v0 = vsel %vm3558_vm15, %v3468_v21, %v3557_v8 }
 0xa2d   : > { %v3485_v13 = vadd.f32 %v3484_v7, %v3483_v9 }
 0xa2f   : > { %v5226_v60 = vpop.permute.xlu2 %3391  ;;  %v3486_v55 = vrot.slane %v3485_v13, 2 }
 0xa30   : > { %v3417_v53 = vmul.f32 %v5226_v60, %v5316_v45 }
 0xa31   : > { %v3487_v60 = vadd.f32 %v3486_v55, %v3485_v13 }
 0xa32   : > { %v3511_v51 = vsel %vm892_vm1, %v3417_v53, 0.0 }
 0xa33   : > { %v3512_v59 = vrot.slane %v3511_v51, 4  ;;  %v3488_v36 = vrot.slane %v3487_v60, 1 }
 0xa35   : > { %v3489_v61 = vadd.f32 %v3488_v36, %v3487_v60 }
 0xa37   : > { %v3362_v28 = vpop.permute.xlu2 %3361  ;;  %v3382_v48 = vpop.permute.xlu0 %3381 }
 0xa38   : > { %v3411_v16 = vmul.f32 %v3362_v28, %v2714_v4  ;;  %v3415_v23 = vmul.f32 %v3382_v48, %v5313_v63  ;;  %v3492_v28 = vadd.f32 %v3491_v24, %v3490_v15  ;;  %v3562_v63 = vsel %vm3548_vm10, %v3489_v61, %v3482_v12 }
 0xa3a   : > { %v3469_v32 = vsel %vm892_vm1, %v3411_v16, 0.0  ;;  %v3497_v42 = vsel %vm892_vm1, %v3415_v23, 0.0  ;;  %v3493_v49 = vrot.slane %v3492_v28, 2 }
 0xa3b   : > { %v3470_v30 = vrot.slane %v3469_v32, 4  ;;  %v3498_v44 = vrot.slane %v3497_v42, 4 }
 0xa3d   : > { %v3471_v4 = vadd.f32 %v3470_v30, %v3469_v32  ;;  %v3499_v56 = vadd.f32 %v3498_v44, %v3497_v42  ;;  %v3513_v30 = vadd.f32 %v3512_v59, %v3511_v51 }
 0xa3f   : > { %v3472_v26 = vrot.slane %v3471_v4, 2  ;;  %v3500_v35 = vrot.slane %v3499_v56, 2  ;;  %v3514_v39 = vrot.slane %v3513_v30, 2 }
 0xa40   : > { %v3387_v5 = vpop.permute.xlu1 %3386 }
 0xa41   : > { %v3473_v11 = vadd.f32 %v3472_v26, %v3471_v4  ;;  %v3416_v27 = vmul.f32 %v3387_v5, %v5315_v43  ;;  %v3501_v41 = vadd.f32 %v3500_v35, %v3499_v56  ;;  %v3494_v4 = vadd.f32 %v3493_v49, %v3492_v28 }
 0xa42   : > { %v3515_v21 = vadd.f32 %v3514_v39, %v3513_v30 }
 0xa43   : > { %v3474_v20 = vrot.slane %v3473_v11, 1  ;;  %v3504_v54 = vsel %vm892_vm1, %v3416_v27, 0.0  ;;  %v3502_v29 = vrot.slane %v3501_v41, 1  ;;  %v3495_v5 = vrot.slane %v3494_v4, 1 }
 0xa44   : > { %v3505_v58 = vrot.slane %v3504_v54, 4  ;;  %v3516_v33 = vrot.slane %v3515_v21, 1 }
 0xa45   : > { %v3475_v40 = vadd.f32 %v3474_v20, %v3473_v11  ;;  %v3503_v23 = vadd.f32 %v3502_v29, %v3501_v41  ;;  %v3496_v38 = vadd.f32 %v3495_v5, %v3494_v4 }
 0xa46   : > { %v3506_v2 = vadd.f32 %v3505_v58, %v3504_v54 }
 0xa47   : > { %v3561_v31 = vsel %vm3560_vm0, %v3475_v40, %v3559_v0  ;;  %v3563_v19 = vsel %vm3550_vm11, %v3496_v38, %v3562_v63  ;;  %v3517_v0 = vadd.f32 %v3516_v33, %v3515_v21 }
 0xa48   : > { %3571 = vst.msk [vmem:[%s5260_s21] sm:$0xff] %vm892_vm1, %v3561_v31  ;;  %v3507_v37 = vrot.slane %v3506_v2, 2  ;;  %v3564_v47 = vsel %vm3552_vm12, %v3503_v23, %v3563_v19 }
 0xa4a   : > { %v3508_v50 = vadd.f32 %v3507_v37, %v3506_v2 }
 0xa4c   : > { %v3509_v34 = vrot.slane %v3508_v50, 1 }
 0xa4e   : > { %v3510_v20 = vadd.f32 %v3509_v34, %v3508_v50 }
 0xa50   : > { %v3397_v16 = vpop.permute.xlu1 %3396  ;;  %v3565_v7 = vsel %vm3554_vm13, %v3510_v20, %v3564_v47 }
 0xa51   : > { %v3418_v52 = vmul.f32 %v3397_v16, %v5317_v1  ;;  %v3566_v57 = vsel %vm3556_vm14, %v3517_v0, %v3565_v7 }
 0xa53   : > { %v3518_v32 = vsel %vm892_vm1, %v3418_v52, 0.0 }
 0xa54   : > { %v3519_v14 = vrot.slane %v3518_v32, 4 }
 0xa56   : > { %v3520_v17 = vadd.f32 %v3519_v14, %v3518_v32 }
 0xa58   : > { %v3521_v6 = vrot.slane %v3520_v17, 2  ;;  %v3402_v26 = vpop.permute.xlu0 %3401 }
 0xa59   : > { %v3419_v48 = vmul.f32 %v3402_v26, %v5318_v46 }
 0xa5a   : > { %v3522_v22 = vadd.f32 %v3521_v6, %v3520_v17 }
 0xa5b   : > { %v3525_v11 = vsel %vm892_vm1, %v3419_v48, 0.0 }
 0xa5c   : > { %v3526_v9 = vrot.slane %v3525_v11, 4  ;;  %v3523_v43 = vrot.slane %v3522_v22, 1 }
 0xa5e   : > { %v3527_v62 = vadd.f32 %v3526_v9, %v3525_v11  ;;  %v3524_v40 = vadd.f32 %v3523_v43, %v3522_v22 }
 0xa60   : > { %v3528_v27 = vrot.slane %v3527_v62, 2  ;;  %v3567_v31 = vsel %vm3558_vm15, %v3524_v40, %v3566_v57 }
 0xa62   : > { %v3529_v8 = vadd.f32 %v3528_v27, %v3527_v62 }
 0xa64   : > { %v3530_v42 = vrot.slane %v3529_v8, 1 }
 0xa66   : > { %v3531_v15 = vadd.f32 %v3530_v42, %v3529_v8 }
 0xa68   : > { %v3568_v54 = vsel %vm3560_vm0, %v3531_v15, %v3567_v31 }
 0xa69   : > { %3572 = vst.msk [vmem:[%s5260_s21 + $0x8] sm:$0xff] %vm892_vm1, %v3568_v54 }
 0xa6a PF: > { %s24_s23 = sadd.s32 1, %s4075_s23  }
 0xa6b   : > { %p21_p6 = scmp.ge.s32.totalorder %s24_s23, 9  }
 0xa6d   :  { %23 = sbr.rel (!%p21_p6) target bundleno = 3 (0x3), region = 101 }

</bundles_post_ra>
